<compile_context>
chip_gen: v7x
topology: tpu7x:2x2x1
jax: 0.10.0
libtpu: 0.0.40
codegen_flags: <defaults>
</compile_context>

<pallas_src>
import functools

import jax
import jax.numpy as jnp
from jax.experimental import pallas as pl


def _round_up(v, m):
    return ((v + m - 1) // m) * m


# ----------------------------------------------------------------------------
# Single fused kernel: MLP + grid placement + dconv1 + dconv2.
#
# Flat-lane activation layout for the conv stages: (channels, flat_pixels),
# flat index i = b*G + r*gw + c on a zero-padded "absolute" gh x gw grid per
# image (pad = 2*(k-1) per side, enough for both transposed convs).  A conv tap
# (ky, kx) is then a lane shift by s = ky*gw + kx; stacking the k*k shifted
# slices along the contraction axis turns each ConvTranspose2d into a single
# matmul.  Shifts that wrap across image/batch boundaries only ever read the
# zero padding (asserted statically in the wrapper).
# ----------------------------------------------------------------------------
def _generator_kernel(z_ref, w1_ref, b1_ref, w2g_ref, b2g_ref,
                      wd1_ref, bd1i_ref, wd2_ref, bd2_ref, o_ref,
                      *, n, c1, c2, k, gw, G, l1, l2, lx):
    # ---- fused MLP: lin1 -> relu -> lin2 (grid-remapped) -> relu ------------
    h1 = jnp.dot(z_ref[...], w1_ref[...], preferred_element_type=jnp.float32)
    h1 = jnp.maximum(h1 + b1_ref[...], 0.0)                        # (n, fc) f32
    h2 = jnp.dot(h1.astype(jnp.bfloat16), w2g_ref[...],
                 preferred_element_type=jnp.float32)
    h2 = jnp.maximum(h2 + b2g_ref[...], 0.0).astype(jnp.bfloat16)  # (n, c2*G)

    # ---- relayout (n, c2*G) -> (c2, n*G), zero-extended to lx lanes ---------
    # lin2's columns already sit on the zero-padded absolute grid, so this is
    # just n*c2 static lane-slice copies; the implicit padding stays exactly 0.
    blocks = []
    for b in range(n):
        chans = [h2[b:b + 1, c * G:(c + 1) * G] for c in range(c2)]
        blocks.append(jnp.concatenate(chans, axis=0))              # (c2, G)
    if lx > n * G:
        blocks.append(jnp.zeros((c2, lx - n * G), jnp.bfloat16))
    x_cat = jnp.concatenate(blocks, axis=1)                        # (c2, lx)

    shifts = [ky * gw + kx for ky in range(k) for kx in range(k)]

    # ---- dconv1: ONE im2col matmul, K = c2*k*k ------------------------------
    xs = jnp.concatenate([x_cat[:, s:s + l1] for s in shifts], axis=0)  # (c2*k*k, l1)
    bias_parts = [bd1i_ref[...]] * n                               # masked per-image bias
    if l1 > n * G:
        bias_parts.append(jnp.zeros((c1, l1 - n * G), jnp.float32))
    bias1 = jnp.concatenate(bias_parts, axis=1)                    # (c1, l1)
    y1 = jnp.dot(wd1_ref[...], xs, preferred_element_type=jnp.float32) + bias1
    y1 = y1.astype(jnp.bfloat16)                                   # (c1, l1)

    # ---- dconv2: ONE im2col matmul, K = c1*k*k ------------------------------
    ys = jnp.concatenate([y1[:, s:s + l2] for s in shifts], axis=0)     # (c1*k*k, l2)
    y2 = jnp.dot(wd2_ref[...], ys, preferred_element_type=jnp.float32)
    o_ref[...] = y2 + bd2_ref[...]                                 # (cin, l2) f32


# ----------------------------------------------------------------------------
# Parameters (PyTorch-equivalent init) + one-time kernel-ready packing.
# ----------------------------------------------------------------------------
def init_generator_params(key, in_channels, latent_dim, img_h, img_w,
                          n_fil_1, n_fil_2, k, fc_size):
    hr, wr = img_h - 2 * (k - 1), img_w - 2 * (k - 1)
    fc_size_2 = n_fil_2 * hr * wr                    # calculate_fc_size_decoder

    keys = jax.random.split(key, 8)

    def uni(kk, shape, fan):
        bound = 1.0 / jnp.sqrt(float(fan))
        return jax.random.uniform(kk, shape, jnp.float32, -bound, bound)

    params = {
        # Linear weights stored as (in, out) for x @ w; fan_in = in_features.
        "w1": uni(keys[0], (latent_dim, fc_size), latent_dim),
        "b1": uni(keys[1], (fc_size,), latent_dim),
        "w2": uni(keys[2], (fc_size, fc_size_2), fc_size),
        "b2": uni(keys[3], (fc_size_2,), fc_size),
        # ConvTranspose2d weights, PyTorch layout (Cin, Cout, kH, kW).
        # PyTorch's default init computes fan from weight.size(1)*k*k = Cout*k*k.
        "wd1": uni(keys[4], (n_fil_2, n_fil_1, k, k), n_fil_1 * k * k),
        "bd1": uni(keys[5], (n_fil_1,), n_fil_1 * k * k),
        "wd2": uni(keys[6], (n_fil_1, in_channels, k, k), in_channels * k * k),
        "bd2": uni(keys[7], (in_channels,), in_channels * k * k),
    }
    cfg = dict(in_channels=in_channels, latent_dim=latent_dim, img_h=img_h,
               img_w=img_w, n_fil_1=n_fil_1, n_fil_2=n_fil_2, k=k,
               fc_size=fc_size, fc_size_2=fc_size_2)
    return params, cfg


def pack_params(params, cfg):
    """One-time weight rearrangement into kernel-ready operands."""
    k = cfg["k"]
    c1, c2 = cfg["n_fil_1"], cfg["n_fil_2"]
    img_h, img_w = cfg["img_h"], cfg["img_w"]
    hr, wr = img_h - 2 * (k - 1), img_w - 2 * (k - 1)
    gh, gw = img_h + 2 * (k - 1), img_w + 2 * (k - 1)
    pad = 2 * (k - 1)
    fc = params["w2"].shape[0]

    # lin2 remapped onto the absolute grid: output column order (c2, r, c) over
    # the (c2, gh, gw) grid; columns for the zero padding are identically zero,
    # so relu(0 + 0) keeps the implicit conv padding exactly zero in-kernel.
    w2g = jnp.zeros((fc, c2, gh, gw), jnp.float32)
    w2g = w2g.at[:, :, pad:pad + hr, pad:pad + wr].set(
        params["w2"].reshape(fc, c2, hr, wr))
    b2g = jnp.zeros((c2, gh, gw), jnp.float32)
    b2g = b2g.at[:, pad:pad + hr, pad:pad + wr].set(
        params["b2"].reshape(c2, hr, wr))

    def im2col_weights(w_t):
        # PyTorch ConvTranspose2d weight (Cin, Cout, kH, kW) ->
        # (Cout, kH*kW*Cin) for the stacked-shift im2col contraction, with the
        # kernel spatially flipped (deconv == correlate padded input w/ flip).
        ci, co = w_t.shape[0], w_t.shape[1]
        wf = jnp.transpose(w_t[:, :, ::-1, ::-1], (2, 3, 1, 0))    # (ky, kx, co, ci)
        wf = jnp.transpose(wf.reshape(k * k, co, ci), (1, 0, 2))   # (co, tap, ci)
        return wf.reshape(co, k * k * ci).astype(jnp.bfloat16)

    # dconv1 bias, pre-masked onto its valid output region of ONE image grid
    # (rows/cols [k-1, k-1 + img-(k-1)) of the absolute grid); tiled over the
    # batch inside the kernel, so it stays batch-size independent.
    h1o, w1o = img_h - (k - 1), img_w - (k - 1)
    mask = jnp.zeros((gh, gw), jnp.float32)
    mask = mask.at[k - 1:k - 1 + h1o, k - 1:k - 1 + w1o].set(1.0)
    bd1_img = params["bd1"][:, None] * mask.reshape(1, gh * gw)    # (c1, G) f32

    return {
        "w1": params["w1"].astype(jnp.float32),        # tiny matmul kept f32
        "b1": params["b1"].reshape(1, -1).astype(jnp.float32),
        "w2g": w2g.reshape(fc, c2 * gh * gw).astype(jnp.bfloat16),
        "b2g": b2g.reshape(1, c2 * gh * gw),
        "wd1m": im2col_weights(params["wd1"]),         # (c1,  c2*k*k) bf16
        "bd1_img": bd1_img,                            # (c1,  gh*gw)  f32
        "wd2m": im2col_weights(params["wd2"]),         # (cin, c1*k*k) bf16
        "bd2_col": params["bd2"].reshape(-1, 1).astype(jnp.float32),
    }


# ----------------------------------------------------------------------------
# Forward pass: one pallas_call + a few-KiB crop/transpose epilogue in XLA.
# ----------------------------------------------------------------------------
def generator_forward(packed, x, z_key, *, cfg):
    n = int(x.shape[0])                              # forward() only uses batch size
    k = cfg["k"]
    c1, c2, cin = cfg["n_fil_1"], cfg["n_fil_2"], cfg["in_channels"]
    img_h, img_w = cfg["img_h"], cfg["img_w"]
    hr, wr = img_h - 2 * (k - 1), img_w - 2 * (k - 1)
    gh, gw = img_h + 2 * (k - 1), img_w + 2 * (k - 1)
    G = gh * gw

    # Static safety checks tying the pad/crop to k and the image size: the
    # flat-lane shift trick relies on 2*(k-1) zero rows/cols around every image
    # so shifts that wrap across image/batch boundaries only read zeros.
    assert hr >= 1 and wr >= 1, "image too small for two k x k transposed convs"
    assert gh == hr + 4 * (k - 1) and gw == wr + 4 * (k - 1)
    max_shift = (k - 1) * gw + (k - 1)
    assert 2 * (k - 1) * gw >= max_shift, "per-image zero pad can't absorb lane shifts"

    l2 = _round_up(n * G, 128)                       # output compute width (lane-dense)
    l1 = _round_up(l2 + max_shift, 128)              # dconv1 output width
    lx = _round_up(l1 + max_shift, 128)              # placed-input width

    # TODO(synk): could be generated in-kernel with pltpu.prng_* instead.
    z = jax.random.normal(z_key, (n, cfg["latent_dim"]), jnp.float32)

    kernel = functools.partial(_generator_kernel, n=n, c1=c1, c2=c2, k=k,
                               gw=gw, G=G, l1=l1, l2=l2, lx=lx)
    y2 = pl.pallas_call(
        kernel,
        out_shape=jax.ShapeDtypeStruct((cin, l2), jnp.float32),
    )(z, packed["w1"], packed["b1"], packed["w2g"], packed["b2g"],
      packed["wd1m"], packed["bd1_img"], packed["wd2m"], packed["bd2_col"])

    # Final crop + NCHW transpose (a few KiB of XLA work on the kernel output).
    out = y2[:, :n * G].reshape(cin, n, gh, gw)[:, :, :img_h, :img_w]
    return out.transpose(1, 0, 2, 3)                 # (n, in_channels, H, W)


if __name__ == "__main__":
    batch, in_channels, img_h, img_w = 2, 3, 16, 16
    latent_dim, fc_size = 8, 32
    n_fil_1, n_fil_2, kernel_size = 8, 16, 3

    root = jax.random.PRNGKey(0)
    k_params, k_x, k_z = jax.random.split(root, 3)

    params, cfg = init_generator_params(
        k_params, in_channels, latent_dim, img_h, img_w,
        n_fil_1, n_fil_2, kernel_size, fc_size)
    packed = pack_params(params, cfg)

    # Input x: only its batch dimension is used by Generator.forward.
    x = jax.random.normal(k_x, (batch, in_channels, img_h, img_w), jnp.float32)

    fwd = jax.jit(functools.partial(generator_forward, cfg=cfg))
    out = jax.block_until_ready(fwd(packed, x, k_z))

    assert out.shape == (batch, in_channels, img_h, img_w), out.shape
    assert out.dtype == jnp.float32
    assert bool(jnp.all(jnp.isfinite(out)))

    print("KERNEL_OK")
</pallas_src>

<mosaic_0001>
module attributes {stable_mosaic.version = 11 : i64} {
  func.func @_generator_kernel(%arg0: memref<2x8xf32, #tpu.memory_space<vmem>>, %arg1: memref<8x32xf32, #tpu.memory_space<vmem>>, %arg2: memref<1x32xf32, #tpu.memory_space<vmem>>, %arg3: memref<32x6400xbf16, #tpu.memory_space<vmem>>, %arg4: memref<1x6400xf32, #tpu.memory_space<vmem>>, %arg5: memref<8x144xbf16, #tpu.memory_space<vmem>>, %arg6: memref<8x400xf32, #tpu.memory_space<vmem>>, %arg7: memref<3x72xbf16, #tpu.memory_space<vmem>>, %arg8: memref<3x1xf32, #tpu.memory_space<vmem>>, %arg9: memref<3x896xf32, #tpu.memory_space<vmem>>) attributes {dimension_semantics = [], scalar_prefetch = 0 : i64, scratch_operands = 0 : i64, tpu.core_type = #tpu.core_type<tc>} {
    %c0 = arith.constant 0 : index
    %c0_0 = arith.constant 0 : index
    %0 = vector.load %arg0[%c0, %c0_0] : memref<2x8xf32, #tpu.memory_space<vmem>>, vector<2x8xf32>
    %c0_1 = arith.constant 0 : index
    %c0_2 = arith.constant 0 : index
    %1 = vector.load %arg1[%c0_1, %c0_2] : memref<8x32xf32, #tpu.memory_space<vmem>>, vector<8x32xf32>
    %cst = arith.constant dense<0.000000e+00> : vector<2x32xf32>
    %2 = tpu.matmul %0, %1, %cst {dimension_numbers = #tpu.dot_dimension_numbers<[1], [0], [0], [1], [0, 0, 1, 1], [], []>} : vector<2x8xf32>, vector<8x32xf32>, vector<2x32xf32> -> vector<2x32xf32>
    %c0_3 = arith.constant 0 : index
    %c0_4 = arith.constant 0 : index
    %3 = vector.load %arg2[%c0_3, %c0_4] : memref<1x32xf32, #tpu.memory_space<vmem>>, vector<1x32xf32>
    %4 = vector.broadcast %3 : vector<1x32xf32> to vector<2x32xf32>
    %5 = arith.addf %2, %4 : vector<2x32xf32>
    %cst_5 = arith.constant 0.000000e+00 : f32
    %6 = vector.broadcast %cst_5 : f32 to vector<2x32xf32>
    %7 = arith.maximumf %5, %6 : vector<2x32xf32>
    %8 = arith.truncf %7 : vector<2x32xf32> to vector<2x32xbf16>
    %c0_6 = arith.constant 0 : index
    %c0_7 = arith.constant 0 : index
    %9 = vector.load %arg3[%c0_6, %c0_7] : memref<32x6400xbf16, #tpu.memory_space<vmem>>, vector<32x6400xbf16>
    %cst_8 = arith.constant dense<0.000000e+00> : vector<2x6400xf32>
    %10 = tpu.matmul %8, %9, %cst_8 {dimension_numbers = #tpu.dot_dimension_numbers<[1], [0], [0], [1], [0, 0, 1, 1], [], []>} : vector<2x32xbf16>, vector<32x6400xbf16>, vector<2x6400xf32> -> vector<2x6400xf32>
    %c0_9 = arith.constant 0 : index
    %c0_10 = arith.constant 0 : index
    %11 = vector.load %arg4[%c0_9, %c0_10] : memref<1x6400xf32, #tpu.memory_space<vmem>>, vector<1x6400xf32>
    %12 = vector.broadcast %11 : vector<1x6400xf32> to vector<2x6400xf32>
    %13 = arith.addf %10, %12 : vector<2x6400xf32>
    %cst_11 = arith.constant 0.000000e+00 : f32
    %14 = vector.broadcast %cst_11 : f32 to vector<2x6400xf32>
    %15 = arith.maximumf %13, %14 : vector<2x6400xf32>
    %16 = arith.truncf %15 : vector<2x6400xf32> to vector<2x6400xbf16>
    %17 = vector.extract_strided_slice %16 {offsets = [0, 0], sizes = [1, 400], strides = [1, 1]} : vector<2x6400xbf16> to vector<1x400xbf16>
    %18 = vector.extract_strided_slice %16 {offsets = [0, 400], sizes = [1, 400], strides = [1, 1]} : vector<2x6400xbf16> to vector<1x400xbf16>
    %19 = vector.extract_strided_slice %16 {offsets = [0, 800], sizes = [1, 400], strides = [1, 1]} : vector<2x6400xbf16> to vector<1x400xbf16>
    %20 = vector.extract_strided_slice %16 {offsets = [0, 1200], sizes = [1, 400], strides = [1, 1]} : vector<2x6400xbf16> to vector<1x400xbf16>
    %21 = vector.extract_strided_slice %16 {offsets = [0, 1600], sizes = [1, 400], strides = [1, 1]} : vector<2x6400xbf16> to vector<1x400xbf16>
    %22 = vector.extract_strided_slice %16 {offsets = [0, 2000], sizes = [1, 400], strides = [1, 1]} : vector<2x6400xbf16> to vector<1x400xbf16>
    %23 = vector.extract_strided_slice %16 {offsets = [0, 2400], sizes = [1, 400], strides = [1, 1]} : vector<2x6400xbf16> to vector<1x400xbf16>
    %24 = vector.extract_strided_slice %16 {offsets = [0, 2800], sizes = [1, 400], strides = [1, 1]} : vector<2x6400xbf16> to vector<1x400xbf16>
    %25 = vector.extract_strided_slice %16 {offsets = [0, 3200], sizes = [1, 400], strides = [1, 1]} : vector<2x6400xbf16> to vector<1x400xbf16>
    %26 = vector.extract_strided_slice %16 {offsets = [0, 3600], sizes = [1, 400], strides = [1, 1]} : vector<2x6400xbf16> to vector<1x400xbf16>
    %27 = vector.extract_strided_slice %16 {offsets = [0, 4000], sizes = [1, 400], strides = [1, 1]} : vector<2x6400xbf16> to vector<1x400xbf16>
    %28 = vector.extract_strided_slice %16 {offsets = [0, 4400], sizes = [1, 400], strides = [1, 1]} : vector<2x6400xbf16> to vector<1x400xbf16>
    %29 = vector.extract_strided_slice %16 {offsets = [0, 4800], sizes = [1, 400], strides = [1, 1]} : vector<2x6400xbf16> to vector<1x400xbf16>
    %30 = vector.extract_strided_slice %16 {offsets = [0, 5200], sizes = [1, 400], strides = [1, 1]} : vector<2x6400xbf16> to vector<1x400xbf16>
    %31 = vector.extract_strided_slice %16 {offsets = [0, 5600], sizes = [1, 400], strides = [1, 1]} : vector<2x6400xbf16> to vector<1x400xbf16>
    %32 = vector.extract_strided_slice %16 {offsets = [0, 6000], sizes = [1, 400], strides = [1, 1]} : vector<2x6400xbf16> to vector<1x400xbf16>
    %33 = tpu.concatenate %17, %18, %19, %20, %21, %22, %23, %24, %25, %26, %27, %28, %29, %30, %31, %32 in 0 : vector<1x400xbf16>, vector<1x400xbf16>, vector<1x400xbf16>, vector<1x400xbf16>, vector<1x400xbf16>, vector<1x400xbf16>, vector<1x400xbf16>, vector<1x400xbf16>, vector<1x400xbf16>, vector<1x400xbf16>, vector<1x400xbf16>, vector<1x400xbf16>, vector<1x400xbf16>, vector<1x400xbf16>, vector<1x400xbf16>, vector<1x400xbf16> -> vector<16x400xbf16>
    %34 = vector.extract_strided_slice %16 {offsets = [1, 0], sizes = [1, 400], strides = [1, 1]} : vector<2x6400xbf16> to vector<1x400xbf16>
    %35 = vector.extract_strided_slice %16 {offsets = [1, 400], sizes = [1, 400], strides = [1, 1]} : vector<2x6400xbf16> to vector<1x400xbf16>
    %36 = vector.extract_strided_slice %16 {offsets = [1, 800], sizes = [1, 400], strides = [1, 1]} : vector<2x6400xbf16> to vector<1x400xbf16>
    %37 = vector.extract_strided_slice %16 {offsets = [1, 1200], sizes = [1, 400], strides = [1, 1]} : vector<2x6400xbf16> to vector<1x400xbf16>
    %38 = vector.extract_strided_slice %16 {offsets = [1, 1600], sizes = [1, 400], strides = [1, 1]} : vector<2x6400xbf16> to vector<1x400xbf16>
    %39 = vector.extract_strided_slice %16 {offsets = [1, 2000], sizes = [1, 400], strides = [1, 1]} : vector<2x6400xbf16> to vector<1x400xbf16>
    %40 = vector.extract_strided_slice %16 {offsets = [1, 2400], sizes = [1, 400], strides = [1, 1]} : vector<2x6400xbf16> to vector<1x400xbf16>
    %41 = vector.extract_strided_slice %16 {offsets = [1, 2800], sizes = [1, 400], strides = [1, 1]} : vector<2x6400xbf16> to vector<1x400xbf16>
    %42 = vector.extract_strided_slice %16 {offsets = [1, 3200], sizes = [1, 400], strides = [1, 1]} : vector<2x6400xbf16> to vector<1x400xbf16>
    %43 = vector.extract_strided_slice %16 {offsets = [1, 3600], sizes = [1, 400], strides = [1, 1]} : vector<2x6400xbf16> to vector<1x400xbf16>
    %44 = vector.extract_strided_slice %16 {offsets = [1, 4000], sizes = [1, 400], strides = [1, 1]} : vector<2x6400xbf16> to vector<1x400xbf16>
    %45 = vector.extract_strided_slice %16 {offsets = [1, 4400], sizes = [1, 400], strides = [1, 1]} : vector<2x6400xbf16> to vector<1x400xbf16>
    %46 = vector.extract_strided_slice %16 {offsets = [1, 4800], sizes = [1, 400], strides = [1, 1]} : vector<2x6400xbf16> to vector<1x400xbf16>
    %47 = vector.extract_strided_slice %16 {offsets = [1, 5200], sizes = [1, 400], strides = [1, 1]} : vector<2x6400xbf16> to vector<1x400xbf16>
    %48 = vector.extract_strided_slice %16 {offsets = [1, 5600], sizes = [1, 400], strides = [1, 1]} : vector<2x6400xbf16> to vector<1x400xbf16>
    %49 = vector.extract_strided_slice %16 {offsets = [1, 6000], sizes = [1, 400], strides = [1, 1]} : vector<2x6400xbf16> to vector<1x400xbf16>
    %50 = tpu.concatenate %34, %35, %36, %37, %38, %39, %40, %41, %42, %43, %44, %45, %46, %47, %48, %49 in 0 : vector<1x400xbf16>, vector<1x400xbf16>, vector<1x400xbf16>, vector<1x400xbf16>, vector<1x400xbf16>, vector<1x400xbf16>, vector<1x400xbf16>, vector<1x400xbf16>, vector<1x400xbf16>, vector<1x400xbf16>, vector<1x400xbf16>, vector<1x400xbf16>, vector<1x400xbf16>, vector<1x400xbf16>, vector<1x400xbf16>, vector<1x400xbf16> -> vector<16x400xbf16>
    %cst_12 = arith.constant 0.000000e+00 : bf16
    %51 = vector.broadcast %cst_12 : bf16 to vector<16x352xbf16>
    %52 = tpu.concatenate %33, %50, %51 in 1 : vector<16x400xbf16>, vector<16x400xbf16>, vector<16x352xbf16> -> vector<16x1152xbf16>
    %53 = vector.extract_strided_slice %52 {offsets = [0, 0], sizes = [16, 1024], strides = [1, 1]} : vector<16x1152xbf16> to vector<16x1024xbf16>
    %54 = vector.extract_strided_slice %52 {offsets = [0, 1], sizes = [16, 1024], strides = [1, 1]} : vector<16x1152xbf16> to vector<16x1024xbf16>
    %55 = vector.extract_strided_slice %52 {offsets = [0, 2], sizes = [16, 1024], strides = [1, 1]} : vector<16x1152xbf16> to vector<16x1024xbf16>
    %56 = vector.extract_strided_slice %52 {offsets = [0, 20], sizes = [16, 1024], strides = [1, 1]} : vector<16x1152xbf16> to vector<16x1024xbf16>
    %57 = vector.extract_strided_slice %52 {offsets = [0, 21], sizes = [16, 1024], strides = [1, 1]} : vector<16x1152xbf16> to vector<16x1024xbf16>
    %58 = vector.extract_strided_slice %52 {offsets = [0, 22], sizes = [16, 1024], strides = [1, 1]} : vector<16x1152xbf16> to vector<16x1024xbf16>
    %59 = vector.extract_strided_slice %52 {offsets = [0, 40], sizes = [16, 1024], strides = [1, 1]} : vector<16x1152xbf16> to vector<16x1024xbf16>
    %60 = vector.extract_strided_slice %52 {offsets = [0, 41], sizes = [16, 1024], strides = [1, 1]} : vector<16x1152xbf16> to vector<16x1024xbf16>
    %61 = vector.extract_strided_slice %52 {offsets = [0, 42], sizes = [16, 1024], strides = [1, 1]} : vector<16x1152xbf16> to vector<16x1024xbf16>
    %62 = tpu.concatenate %53, %54, %55, %56, %57, %58, %59, %60, %61 in 0 : vector<16x1024xbf16>, vector<16x1024xbf16>, vector<16x1024xbf16>, vector<16x1024xbf16>, vector<16x1024xbf16>, vector<16x1024xbf16>, vector<16x1024xbf16>, vector<16x1024xbf16>, vector<16x1024xbf16> -> vector<144x1024xbf16>
    %c0_13 = arith.constant 0 : index
    %c0_14 = arith.constant 0 : index
    %63 = vector.load %arg6[%c0_13, %c0_14] : memref<8x400xf32, #tpu.memory_space<vmem>>, vector<8x400xf32>
    %cst_15 = arith.constant 0.000000e+00 : f32
    %64 = vector.broadcast %cst_15 : f32 to vector<8x224xf32>
    %65 = tpu.concatenate %63, %63, %64 in 1 : vector<8x400xf32>, vector<8x400xf32>, vector<8x224xf32> -> vector<8x1024xf32>
    %c0_16 = arith.constant 0 : index
    %c0_17 = arith.constant 0 : index
    %66 = vector.load %arg5[%c0_16, %c0_17] : memref<8x144xbf16, #tpu.memory_space<vmem>>, vector<8x144xbf16>
    %cst_18 = arith.constant dense<0.000000e+00> : vector<8x1024xf32>
    %67 = tpu.matmul %66, %62, %cst_18 {dimension_numbers = #tpu.dot_dimension_numbers<[1], [0], [0], [1], [0, 0, 1, 1], [], []>} : vector<8x144xbf16>, vector<144x1024xbf16>, vector<8x1024xf32> -> vector<8x1024xf32>
    %68 = arith.addf %67, %65 : vector<8x1024xf32>
    %69 = arith.truncf %68 : vector<8x1024xf32> to vector<8x1024xbf16>
    %70 = vector.extract_strided_slice %69 {offsets = [0, 0], sizes = [8, 896], strides = [1, 1]} : vector<8x1024xbf16> to vector<8x896xbf16>
    %71 = vector.extract_strided_slice %69 {offsets = [0, 1], sizes = [8, 896], strides = [1, 1]} : vector<8x1024xbf16> to vector<8x896xbf16>
    %72 = vector.extract_strided_slice %69 {offsets = [0, 2], sizes = [8, 896], strides = [1, 1]} : vector<8x1024xbf16> to vector<8x896xbf16>
    %73 = vector.extract_strided_slice %69 {offsets = [0, 20], sizes = [8, 896], strides = [1, 1]} : vector<8x1024xbf16> to vector<8x896xbf16>
    %74 = vector.extract_strided_slice %69 {offsets = [0, 21], sizes = [8, 896], strides = [1, 1]} : vector<8x1024xbf16> to vector<8x896xbf16>
    %75 = vector.extract_strided_slice %69 {offsets = [0, 22], sizes = [8, 896], strides = [1, 1]} : vector<8x1024xbf16> to vector<8x896xbf16>
    %76 = vector.extract_strided_slice %69 {offsets = [0, 40], sizes = [8, 896], strides = [1, 1]} : vector<8x1024xbf16> to vector<8x896xbf16>
    %77 = vector.extract_strided_slice %69 {offsets = [0, 41], sizes = [8, 896], strides = [1, 1]} : vector<8x1024xbf16> to vector<8x896xbf16>
    %78 = vector.extract_strided_slice %69 {offsets = [0, 42], sizes = [8, 896], strides = [1, 1]} : vector<8x1024xbf16> to vector<8x896xbf16>
    %79 = tpu.concatenate %70, %71, %72, %73, %74, %75, %76, %77, %78 in 0 : vector<8x896xbf16>, vector<8x896xbf16>, vector<8x896xbf16>, vector<8x896xbf16>, vector<8x896xbf16>, vector<8x896xbf16>, vector<8x896xbf16>, vector<8x896xbf16>, vector<8x896xbf16> -> vector<72x896xbf16>
    %c0_19 = arith.constant 0 : index
    %c0_20 = arith.constant 0 : index
    %80 = vector.load %arg7[%c0_19, %c0_20] : memref<3x72xbf16, #tpu.memory_space<vmem>>, vector<3x72xbf16>
    %cst_21 = arith.constant dense<0.000000e+00> : vector<3x896xf32>
    %81 = tpu.matmul %80, %79, %cst_21 {dimension_numbers = #tpu.dot_dimension_numbers<[1], [0], [0], [1], [0, 0, 1, 1], [], []>} : vector<3x72xbf16>, vector<72x896xbf16>, vector<3x896xf32> -> vector<3x896xf32>
    %c0_22 = arith.constant 0 : index
    %c0_23 = arith.constant 0 : index
    %82 = vector.load %arg8[%c0_22, %c0_23] : memref<3x1xf32, #tpu.memory_space<vmem>>, vector<3x1xf32>
    %83 = vector.broadcast %82 : vector<3x1xf32> to vector<3x896xf32>
    %84 = arith.addf %81, %83 : vector<3x896xf32>
    %c0_24 = arith.constant 0 : index
    %c0_25 = arith.constant 0 : index
    %85 = vector.load %arg9[%c0_24, %c0_25] : memref<3x896xf32, #tpu.memory_space<vmem>>, vector<3x896xf32>
    tpu.vector_store %arg9[%c0_24, %c0_25], %84 {strides = array<i32>} : memref<3x896xf32, #tpu.memory_space<vmem>>, vector<3x896xf32>,
    return
  }
}

</mosaic_0001>

<bundles_post_ra>
// kernel: generator_forward.1
= control target key start
LH: loop header
LB: loop body
LE: loop exit
PB: predicated region body
PF: predicated region fallthrough
CT: control target
= control target key end

     0   :  { %14 = vsyncpa [#allocation3], 0  ;;  %s6634_s0 = inlined_call_operand.vmem [shape: f32[2,8], index: 0, kind: input, shape index: {}]   ;;  %s6635_s1 = inlined_call_operand.vmem [shape: f32[8,32], index: 1, kind: input, shape index: {}]   ;;  %s6636_s2 = inlined_call_operand.vmem [shape: f32[1,32], index: 2, kind: input, shape index: {}]   ;;  %s6637_s3 = inlined_call_operand.hbm [shape: bf16[32,6400], index: 3, kind: input, shape index: {}]   ;;  %s6638_s4 = inlined_call_operand.vmem [shape: f32[1,6400], index: 4, kind: input, shape index: {}]   ;;  %s6639_s5 = inlined_call_operand.vmem [shape: bf16[8,144], index: 5, kind: input, shape index: {}]   ;;  %s6640_s6 = inlined_call_operand.hbm [shape: f32[8,400], index: 6, kind: input, shape index: {}]   ;;  %s6641_s7 = inlined_call_operand.vmem [shape: bf16[3,72], index: 7, kind: input, shape index: {}]   ;;  %s6642_s8 = inlined_call_operand.vmem [shape: f32[3,1], index: 8, kind: input, shape index: {}]   ;;  %s6643_s9 = inlined_call_operand.vmem [shape: f32[3,896], index: 9, kind: output, shape index: {}]  }
   0x1   :  { %15 = vsyncpa [#allocation5], 0  ;;  %s4664_s30 = smov [#allocation2]   ;;  %s4616_s13 = scalar_lea.hbm %s6637_s3, 12800 }
   0x2   :  { %s27_s10 = sshll.u32 %s4664_s30, 4  ;;  %p4617_p0 = scmp.ne.s32.totalorder %s6637_s3, %s4616_s13  ;;  %s28_s10 = int_to_ptr.vmem [resolvable:$true] %s27_s10 }
   0x3   :  { %p4620_p1 = scmp.lt.u32.totalorder %s4616_s13, %s6637_s3 }
   0x5   :  { %p4622_p2 = pnand %p4620_p1, %p4617_p0 }
   0x7   :  { %4625 = shalt.err (!%p4622_p2)
}
   0x8   :  { %s4626_s18 = scalar_lea.vmem %s28_s10, 12800  ;;  %p4631_p4 = scmp.lt.s32.totalorder %s28_s10, %s28_s10 }
   0x9   :  { %p4627_p3 = scmp.ne.s32.totalorder %s28_s10, %s4626_s18  ;;  %p4632_p5 = scmp.lt.s32.totalorder %s4626_s18, %s4626_s18 }
   0xb   :  { %p4633_p6 = por %p4632_p5, %p4631_p4 }
   0xd   :  { %p4634_p7 = pnand %p4633_p6, %p4627_p3 }
   0xf   :  { %4637 = shalt.err (!%p4634_p7)
}
  0x10   :  { %s4665_s19 = smov 3200   ;;  %s4666_s20 = smov 200  }
  0x11   :  { %33 = dma.hbm_to_vmem [thread:$0]  %s6637_s3, 12800, %s28_s10, [#allocation3], %s4665_s19, %s4665_s19, %s4666_s20  }
  0x12   :  { %s4667_s23 = smov [#allocation4]   ;;  %s4638_s27 = scalar_lea.hbm %s6640_s6, 512 }
  0x13   :  { %s44_s24 = sshll.u32 %s4667_s23, 4  ;;  %p4639_p8 = scmp.ne.s32.totalorder %s6640_s6, %s4638_s27  ;;  %s45_s24 = int_to_ptr.vmem [resolvable:$true] %s44_s24 }
  0x14   :  { %p4642_p9 = scmp.lt.u32.totalorder %s4638_s27, %s6640_s6 }
  0x16   :  { %p4644_p10 = pnand %p4642_p9, %p4639_p8 }
  0x18   :  { %4647 = shalt.err (!%p4644_p10)
}
  0x19   :  { %s4648_s12 = scalar_lea.vmem %s45_s24, 512  ;;  %p4653_p12 = scmp.lt.s32.totalorder %s45_s24, %s45_s24 }
  0x1a   :  { %p4649_p11 = scmp.ne.s32.totalorder %s45_s24, %s4648_s12  ;;  %p4654_p13 = scmp.lt.s32.totalorder %s4648_s12, %s4648_s12 }
  0x1c   :  { %p4655_p0 = por %p4654_p13, %p4653_p12 }
  0x1e   :  { %p4656_p1 = pnand %p4655_p0, %p4649_p11 }
  0x20   :  { %4659 = shalt.err (!%p4656_p1)
}
  0x21   :  { %47 = dma.hbm_to_vmem [thread:$0]  %s6640_s6, 512, %s45_s24, [#allocation5]  }
  0x22   :  { %4660 = dma.done.wait [#allocation3], 12800  }
  0x23   :  { %4661 = vsyncadd [#allocation3], 4294954496 }
  0x24   :  { %4662 = dma.done.wait [#allocation5], 512  }
  0x25   :  { %4663 = vsyncadd [#allocation5], 4294966784  ;;  %v6644_v0 = vmov 0.0   ;;  %vm6660_vm0 = vmmov 0   ;;  %vm68_vm1 = vcmask 64512   ;;  %v60_v1 = vld [vmem:[%s6635_s1] sm:$0xff] }
  0x26   :  { %4341 = vmatprep.subr.mxu0 %v6644_v0  ;;  %4343 = vmatprep.mubr.msk.f32.mxu0 %vm6660_vm0, %v6644_v0  ;;  %v59_v2 = vld [vmem:[%s6634_s0] sm:$0x3]  ;;  %v4463_v3 = vld [vmem:[#allocation2 + $0x4] ss:$200 sps:$4 sm:$0xff]   ;;  %v4466_v5 = vld [vmem:[#allocation2 + $0x8] ss:$200 sps:$4 sm:$0xff]  }
  0x27   :  { %4342 = vmatpush3.msra.mxu0 %v60_v1  ;;  %v4465_v4 = vld [vmem:[#allocation2] ss:$200 sps:$4 sm:$0xff]   ;;  %1012 = vmatprep.subr.bf16.mxu1 %v4463_v3  ;;  %v4468_v6 = vld [vmem:[#allocation2 + $0xc] ss:$200 sps:$4 sm:$0xff]   ;;  %v4474_v8 = vld [vmem:[#allocation2 + $0x19c] ss:$200 sps:$4 sm:$0xff]  }
  0x28   :  { %4344 = vmatmul.mubr.msk.f32.vlgmr.msra.gmra.mrb[0].mxu0 %vm68_vm1, %v59_v2  ;;  %1013 = vmatpush1.bf16.msra.mxu1 %v4465_v4  ;;  %v4469_v7 = vld [vmem:[#allocation2 + $0x194] ss:$200 sps:$4 sm:$0xff]   ;;  %v4471_v9 = vld [vmem:[#allocation2 + $0x190] ss:$200 sps:$4 sm:$0xff]   ;;  %v6646_v12 = vmov 0   ;;  %vm1008_vm2 = vcmask 261120  }
  0x29   :  { %1053 = vmatprep.subr.bf16.mxu0 %v4468_v6  ;;  %v4472_v10 = vld [vmem:[#allocation2 + $0x198] ss:$200 sps:$4 sm:$0xff]   ;;  %1014 = vmatprep.subr.bf16.mxu1 %v4469_v7  ;;  %v4477_v11 = vld [vmem:[#allocation2 + $0x14] ss:$200 sps:$4 sm:$0xff]   ;;  %v4483_v22 = vld [vmem:[#allocation2 + $0x1a4] ss:$200 sps:$4 sm:$0xff]  }
  0x2a   :  { %1054 = vmatpush1.bf16.msra.mxu0 %v4466_v5  ;;  %1044 = vmatprep.mubr.bf16.mxu1 %v6646_v12  ;;  %v4480_v13 = vld [vmem:[#allocation2 + $0x1c] ss:$200 sps:$4 sm:$0xff]   ;;  %v4193_v14 = vld [vmem:[%s6636_s2] ss:$0 sm:$0xff]  ;;  %v4475_v19 = vld [vmem:[#allocation2 + $0x10] ss:$200 sps:$4 sm:$0xff]  }
  0x2b   :  { %1055 = vmatprep.subr.bf16.mxu0 %v4474_v8  ;;  %1085 = vmatprep.mubr.bf16.mxu0 %v6646_v12  ;;  %v4478_v20 = vld [vmem:[#allocation2 + $0x18] ss:$200 sps:$4 sm:$0xff]   ;;  %v4486_v23 = vld [vmem:[#allocation2 + $0x1ac] ss:$200 sps:$4 sm:$0xff]   ;;  %v4484_v25 = vld [vmem:[#allocation2 + $0x1a8] ss:$200 sps:$4 sm:$0xff]  }
  0x2c   :  { %1015 = vmatpush1.bf16.msra.mxu1 %v4471_v9  ;;  %4462 = vset.pattern.permute.xlu0 %v6646_v12  ;;  %v4481_v24 = vld [vmem:[#allocation2 + $0x1a0] ss:$200 sps:$4 sm:$0xff]   ;;  %v4489_v26 = vld [vmem:[#allocation2 + $0x24] ss:$200 sps:$4 sm:$0xff]   ;;  %v4495_v30 = vld [vmem:[#allocation2 + $0x1b4] ss:$200 sps:$4 sm:$0xff]  }
  0x2d   :  { %1094 = vmatprep.subr.bf16.mxu1 %v4477_v11  ;;  %v4492_v27 = vld [vmem:[#allocation2 + $0x2c] ss:$200 sps:$4 sm:$0xff]   ;;  %v4487_v28 = vld [vmem:[#allocation2 + $0x20] ss:$200 sps:$4 sm:$0xff]   ;;  %v4498_v31 = vld [vmem:[#allocation2 + $0x1bc] ss:$200 sps:$4 sm:$0xff]  }
  0x2e   :  { %1056 = vmatpush1.bf16.msra.mxu0 %v4472_v10  ;;  %v4490_v29 = vld [vmem:[#allocation2 + $0x28] ss:$200 sps:$4 sm:$0xff]   ;;  %v4496_v33 = vld [vmem:[#allocation2 + $0x1b8] ss:$200 sps:$4 sm:$0xff]   ;;  %v4501_v34 = vld [vmem:[#allocation2 + $0x34] ss:$200 sps:$4 sm:$0xff]  }
  0x2f   :  { %1135 = vmatprep.subr.bf16.mxu0 %v4480_v13  ;;  %v4493_v32 = vld [vmem:[#allocation2 + $0x1b0] ss:$200 sps:$4 sm:$0xff]   ;;  %v4504_v35 = vld [vmem:[#allocation2 + $0x3c] ss:$200 sps:$4 sm:$0xff]   ;;  %v4510_v39 = vld [vmem:[#allocation2 + $0x1cc] ss:$200 sps:$4 sm:$0xff]  }
  0x30   :  { %v4499_v36 = vld [vmem:[#allocation2 + $0x30] ss:$200 sps:$4 sm:$0xff]   ;;  %v4507_v38 = vld [vmem:[#allocation2 + $0x1c4] ss:$200 sps:$4 sm:$0xff]   ;;  %v4505_v40 = vld [vmem:[#allocation2 + $0x1c0] ss:$200 sps:$4 sm:$0xff]  }
  0x31   :  { %v4502_v37 = vld [vmem:[#allocation2 + $0x38] ss:$200 sps:$4 sm:$0xff]   ;;  %v4508_v41 = vld [vmem:[#allocation2 + $0x1c8] ss:$200 sps:$4 sm:$0xff]   ;;  %v4513_v42 = vld [vmem:[#allocation2 + $0x44] ss:$200 sps:$4 sm:$0xff]  }
  0x32   :  { %v4516_v43 = vld [vmem:[#allocation2 + $0x4c] ss:$200 sps:$4 sm:$0xff]   ;;  %v4511_v44 = vld [vmem:[#allocation2 + $0x40] ss:$200 sps:$4 sm:$0xff]   ;;  %v4522_v47 = vld [vmem:[#allocation2 + $0x1dc] ss:$200 sps:$4 sm:$0xff]  }
  0x33   :  { %v4514_v45 = vld [vmem:[#allocation2 + $0x48] ss:$200 sps:$4 sm:$0xff]   ;;  %v4519_v46 = vld [vmem:[#allocation2 + $0x1d4] ss:$200 sps:$4 sm:$0xff]   ;;  %v4520_v49 = vld [vmem:[#allocation2 + $0x1d8] ss:$200 sps:$4 sm:$0xff]  }
  0x34   :  { %v4517_v48 = vld [vmem:[#allocation2 + $0x1d0] ss:$200 sps:$4 sm:$0xff]   ;;  %v4525_v50 = vld [vmem:[#allocation2 + $0x54] ss:$200 sps:$4 sm:$0xff]   ;;  %v4531_v54 = vld [vmem:[#allocation2 + $0x1e4] ss:$200 sps:$4 sm:$0xff]  }
  0x35   :  { %v4528_v51 = vld [vmem:[#allocation2 + $0x5c] ss:$200 sps:$4 sm:$0xff]   ;;  %v4523_v52 = vld [vmem:[#allocation2 + $0x50] ss:$200 sps:$4 sm:$0xff]   ;;  %v4534_v55 = vld [vmem:[#allocation2 + $0x1ec] ss:$200 sps:$4 sm:$0xff]  }
  0x36   :  { %v4526_v53 = vld [vmem:[#allocation2 + $0x58] ss:$200 sps:$4 sm:$0xff]   ;;  %v4532_v57 = vld [vmem:[#allocation2 + $0x1e8] ss:$200 sps:$4 sm:$0xff]   ;;  %v4537_v58 = vld [vmem:[#allocation2 + $0x64] ss:$200 sps:$4 sm:$0xff]  }
  0x37   :  { %v4529_v56 = vld [vmem:[#allocation2 + $0x1e0] ss:$200 sps:$4 sm:$0xff]   ;;  %v4540_v59 = vld [vmem:[#allocation2 + $0x6c] ss:$200 sps:$4 sm:$0xff]   ;;  %v4546_v63 = vld [vmem:[#allocation2 + $0x1fc] ss:$200 sps:$4 sm:$0xff]  }
  0x38   :  { %v4535_v60 = vld [vmem:[#allocation2 + $0x60] ss:$200 sps:$4 sm:$0xff]   ;;  %v4543_v62 = vld [vmem:[#allocation2 + $0x1f4] ss:$200 sps:$4 sm:$0xff]   ;;  %v4541_v1 = vld [vmem:[#allocation2 + $0x1f0] ss:$200 sps:$4 sm:$0xff]  }
  0x39   :  { %v4538_v61 = vld [vmem:[#allocation2 + $0x68] ss:$200 sps:$4 sm:$0xff]   ;;  %v4544_v2 = vld [vmem:[#allocation2 + $0x1f8] ss:$200 sps:$4 sm:$0xff]   ;;  %v4549_v3 = vld [vmem:[#allocation2 + $0x74] ss:$200 sps:$4 sm:$0xff]  }
  0x3a   :  { %v4552_v4 = vld [vmem:[#allocation2 + $0x7c] ss:$200 sps:$4 sm:$0xff]   ;;  %v4547_v5 = vld [vmem:[#allocation2 + $0x70] ss:$200 sps:$4 sm:$0xff]   ;;  %v4558_v8 = vld [vmem:[#allocation2 + $0x20c] ss:$200 sps:$4 sm:$0xff]  }
  0x3b   :  { %v4550_v6 = vld [vmem:[#allocation2 + $0x78] ss:$200 sps:$4 sm:$0xff]   ;;  %v4555_v7 = vld [vmem:[#allocation2 + $0x204] ss:$200 sps:$4 sm:$0xff]   ;;  %v4556_v10 = vld [vmem:[#allocation2 + $0x208] ss:$200 sps:$4 sm:$0xff]  }
  0x3c   :  { %v4553_v9 = vld [vmem:[#allocation2 + $0x200] ss:$200 sps:$4 sm:$0xff]   ;;  %v4561_v11 = vld [vmem:[#allocation2 + $0x84] ss:$200 sps:$4 sm:$0xff]   ;;  %s4671_s17 = smov 112   ;;  %s4672_s20 = smov 96  }
  0x3d   :  { %v4564_v13 = vld [vmem:[#allocation2 + $0x8c] ss:$200 sps:$4 sm:$0xff]   ;;  %s4673_s23 = smov 80   ;;  %s4674_s26 = smov 64   ;;  %vm2510_vm3 = vcmask 1040384   ;;  %vm2157_vm5 = vcmask 916480  }
  0x3e   :  { %s4675_s27 = smov 48   ;;  %s4676_s12 = smov 32   ;;  %vm2511_vm4 = vsmask.f32 256  ;;  %vm2534_vm7 = vcmask 1041408   ;;  %vm6661_vm9 = vcmask 785408  }
  0x3f   :  { %s4677_s3 = smov 16   ;;  %vm5330_vm6 = vmand %vm2510_vm3, %vm2511_vm4  ;;  %vm2535_vm8 = vsmask.f32 1280  ;;  %vm2209_vm10 = vcmask 654336   ;;  %vm2558_vm12 = vcmask 1042432   ;;  %vm2233_vm15 = vcmask 523264  }
  0x40   :  { %vm5426_vm11 = vmand %vm2534_vm7, %vm2535_vm8  ;;  %vm2559_vm13 = vsmask.f32 2304  ;;  %vm2261_vm1 = vcmask 392192   ;;  %vm2582_vm4 = vcmask 1043456   ;;  %vm2583_vm8 = vsmask.f32 3328 }
  0x41   :  { %vm5542_vm14 = vmand %vm2558_vm12, %vm2559_vm13  ;;  %vm2313_vm13 = vcmask 130048   ;;  %s4679_s16 = smov 127   ;;  %s4680_s0 = smov 107  }
  0x42   :  { %vm5674_vm0 = vmand %vm2582_vm4, %vm2583_vm8  ;;  %vm2607_vm8 = vsmask.f32 4352  ;;  %s4681_s1 = smov 108   ;;  %s4682_s2 = smov 88  }
  0x43   :  { %s4683_s6 = smov 106   ;;  %s4685_s18 = smov 87  }
  0xfb   :  { %v138_v15 = vpop.f32.mrb[0].mxu0 }
  0xfc   :  { %v139_v16 = vadd.f32 %v4193_v14, %v138_v15  ;;  %v4345_v17 = vpop.f32.mrb[1].mxu0  ;;  %v4559_v14 = vld [vmem:[#allocation2 + $0x80] ss:$200 sps:$4 sm:$0xff]  }
  0xfd   :  { %v4562_v15 = vld [vmem:[#allocation2 + $0x88] ss:$200 sps:$4 sm:$0xff]   ;;  %v4570_v17 = vld [vmem:[#allocation2 + $0x21c] ss:$200 sps:$4 sm:$0xff]  }
  0xfe   :  { %v142_v18 = vmax.f32 %v139_v16, 0.0  ;;  %v4567_v16 = vld [vmem:[#allocation2 + $0x214] ss:$200 sps:$4 sm:$0xff]  }
 0x100   :  { %v4775_v21 = vpack.c.bf16 %v142_v18, %v142_v18  ;;  %v4565_v18 = vld [vmem:[#allocation2 + $0x210] ss:$200 sps:$4 sm:$0xff]  }
 0x102   :  { %4295 = vmatmul.mubr.msk.bf16.vlgmr.msra.gmra.mrb[0].mxu1 %vm1008_vm2, %v4775_v21  ;;  %4296 = vmatmul.mubr.msk.bf16.vlgmr.msra.gmra.mrb[4].mxu0 %vm1008_vm2, %v4775_v21 }
 0x103   :  { %1095 = vmatpush1.bf16.msra.mxu1 %v4475_v19  ;;  %1136 = vmatpush1.bf16.msra.mxu0 %v4478_v20  ;;  %v4568_v19 = vld [vmem:[#allocation2 + $0x218] ss:$200 sps:$4 sm:$0xff]   ;;  %v4573_v20 = vld [vmem:[#allocation2 + $0x94] ss:$200 sps:$4 sm:$0xff]  }
 0x104   :  { %1096 = vmatprep.subr.bf16.mxu1 %v4483_v22  ;;  %1137 = vmatprep.subr.bf16.mxu0 %v4486_v23  ;;  %v4576_v22 = vld [vmem:[#allocation2 + $0x9c] ss:$200 sps:$4 sm:$0xff]   ;;  %v4571_v23 = vld [vmem:[#allocation2 + $0x90] ss:$200 sps:$4 sm:$0xff]  }
 0x105   :  { %1126 = vmatprep.mubr.bf16.mxu1 %v6646_v12  ;;  %1167 = vmatprep.mubr.bf16.mxu0 %v6646_v12 }
 0x107   :  { %1097 = vmatpush1.bf16.msra.mxu1 %v4481_v24  ;;  %1138 = vmatpush1.bf16.msra.mxu0 %v4484_v25  ;;  %v4574_v24 = vld [vmem:[#allocation2 + $0x98] ss:$200 sps:$4 sm:$0xff]   ;;  %v4579_v25 = vld [vmem:[#allocation2 + $0x224] ss:$200 sps:$4 sm:$0xff]  }
 0x108   :  { %1176 = vmatprep.subr.bf16.mxu1 %v4489_v26  ;;  %1217 = vmatprep.subr.bf16.mxu0 %v4492_v27  ;;  %v4582_v26 = vld [vmem:[#allocation2 + $0x22c] ss:$200 sps:$4 sm:$0xff]   ;;  %v4577_v27 = vld [vmem:[#allocation2 + $0x220] ss:$200 sps:$4 sm:$0xff]  }
 0x10a   :  { %4297 = vmatmul.mubr.msk.bf16.vlgmr.msra.gmra.mrb[4].mxu1 %vm1008_vm2, %v4775_v21  ;;  %4298 = vmatmul.mubr.msk.bf16.vlgmr.msra.gmra.mrb[8].mxu0 %vm1008_vm2, %v4775_v21 }
 0x10b   :  { %1177 = vmatpush1.bf16.msra.mxu1 %v4487_v28  ;;  %1218 = vmatpush1.bf16.msra.mxu0 %v4490_v29  ;;  %v4580_v28 = vld [vmem:[#allocation2 + $0x228] ss:$200 sps:$4 sm:$0xff]   ;;  %v4585_v29 = vld [vmem:[#allocation2 + $0xa4] ss:$200 sps:$4 sm:$0xff]  }
 0x10c   :  { %1178 = vmatprep.subr.bf16.mxu1 %v4495_v30  ;;  %1219 = vmatprep.subr.bf16.mxu0 %v4498_v31  ;;  %v4588_v30 = vld [vmem:[#allocation2 + $0xac] ss:$200 sps:$4 sm:$0xff]   ;;  %v4583_v31 = vld [vmem:[#allocation2 + $0xa0] ss:$200 sps:$4 sm:$0xff]  }
 0x10d   :  { %1208 = vmatprep.mubr.bf16.mxu1 %v6646_v12  ;;  %1249 = vmatprep.mubr.bf16.mxu0 %v6646_v12 }
 0x10f   :  { %1179 = vmatpush1.bf16.msra.mxu1 %v4493_v32  ;;  %1220 = vmatpush1.bf16.msra.mxu0 %v4496_v33  ;;  %v4586_v32 = vld [vmem:[#allocation2 + $0xa8] ss:$200 sps:$4 sm:$0xff]   ;;  %v4591_v33 = vld [vmem:[#allocation2 + $0x234] ss:$200 sps:$4 sm:$0xff]  }
 0x110   :  { %1258 = vmatprep.subr.bf16.mxu1 %v4501_v34  ;;  %1299 = vmatprep.subr.bf16.mxu0 %v4504_v35  ;;  %v4594_v34 = vld [vmem:[#allocation2 + $0x23c] ss:$200 sps:$4 sm:$0xff]   ;;  %v4589_v35 = vld [vmem:[#allocation2 + $0x230] ss:$200 sps:$4 sm:$0xff]  }
 0x112   :  { %4299 = vmatmul.mubr.msk.bf16.vlgmr.msra.gmra.mrb[8].mxu1 %vm1008_vm2, %v4775_v21  ;;  %4300 = vmatmul.mubr.msk.bf16.vlgmr.msra.gmra.mrb[12].mxu0 %vm1008_vm2, %v4775_v21 }
 0x113   :  { %1259 = vmatpush1.bf16.msra.mxu1 %v4499_v36  ;;  %1300 = vmatpush1.bf16.msra.mxu0 %v4502_v37  ;;  %v4592_v36 = vld [vmem:[#allocation2 + $0x238] ss:$200 sps:$4 sm:$0xff]   ;;  %v4597_v37 = vld [vmem:[#allocation2 + $0xb4] ss:$200 sps:$4 sm:$0xff]  }
 0x114   :  { %1260 = vmatprep.subr.bf16.mxu1 %v4507_v38  ;;  %1301 = vmatprep.subr.bf16.mxu0 %v4510_v39  ;;  %v4600_v38 = vld [vmem:[#allocation2 + $0xbc] ss:$200 sps:$4 sm:$0xff]   ;;  %v4595_v39 = vld [vmem:[#allocation2 + $0xb0] ss:$200 sps:$4 sm:$0xff]  }
 0x115   :  { %1290 = vmatprep.mubr.bf16.mxu1 %v6646_v12  ;;  %1331 = vmatprep.mubr.bf16.mxu0 %v6646_v12 }
 0x117   :  { %1261 = vmatpush1.bf16.msra.mxu1 %v4505_v40  ;;  %1302 = vmatpush1.bf16.msra.mxu0 %v4508_v41  ;;  %v4598_v40 = vld [vmem:[#allocation2 + $0xb8] ss:$200 sps:$4 sm:$0xff]   ;;  %v4603_v41 = vld [vmem:[#allocation2 + $0x244] ss:$200 sps:$4 sm:$0xff]  }
 0x118   :  { %1340 = vmatprep.subr.bf16.mxu1 %v4513_v42  ;;  %1381 = vmatprep.subr.bf16.mxu0 %v4516_v43  ;;  %v4606_v42 = vld [vmem:[#allocation2 + $0x24c] ss:$200 sps:$4 sm:$0xff]   ;;  %v4601_v43 = vld [vmem:[#allocation2 + $0x240] ss:$200 sps:$4 sm:$0xff]  }
 0x11a   :  { %4301 = vmatmul.mubr.msk.bf16.vlgmr.msra.gmra.mrb[12].mxu1 %vm1008_vm2, %v4775_v21  ;;  %4302 = vmatmul.mubr.msk.bf16.vlgmr.msra.gmra.mrb[16].mxu0 %vm1008_vm2, %v4775_v21 }
 0x11b   :  { %1341 = vmatpush1.bf16.msra.mxu1 %v4511_v44  ;;  %1382 = vmatpush1.bf16.msra.mxu0 %v4514_v45  ;;  %v4604_v44 = vld [vmem:[#allocation2 + $0x248] ss:$200 sps:$4 sm:$0xff]   ;;  %v4609_v45 = vld [vmem:[#allocation2 + $0xc4] ss:$200 sps:$4 sm:$0xff]  }
 0x11c   :  { %1342 = vmatprep.subr.bf16.mxu1 %v4519_v46  ;;  %1383 = vmatprep.subr.bf16.mxu0 %v4522_v47  ;;  %v4607_v46 = vld [vmem:[#allocation2 + $0xc0] ss:$200 sps:$4 sm:$0xff]   ;;  %v4612_v47 = vld [vmem:[#allocation2 + $0x254] ss:$200 sps:$4 sm:$0xff]  }
 0x11d   :  { %1372 = vmatprep.mubr.bf16.mxu1 %v6646_v12  ;;  %1413 = vmatprep.mubr.bf16.mxu0 %v6646_v12 }
 0x11f   :  { %1343 = vmatpush1.bf16.msra.mxu1 %v4517_v48  ;;  %1384 = vmatpush1.bf16.msra.mxu0 %v4520_v49  ;;  %v4610_v48 = vld [vmem:[#allocation2 + $0x250] ss:$200 sps:$4 sm:$0xff]   ;;  %v258_v49 = vlaneseq }
 0x120   :  { %1422 = vmatprep.subr.bf16.mxu1 %v4525_v50  ;;  %1463 = vmatprep.subr.bf16.mxu0 %v4528_v51 }
 0x121   :  { %v259_v50 = vshrl.u32 %v258_v49, 7 }
 0x122   :  { %4303 = vmatmul.mubr.msk.bf16.vlgmr.msra.gmra.mrb[16].mxu1 %vm1008_vm2, %v4775_v21  ;;  %4304 = vmatmul.mubr.msk.bf16.vlgmr.msra.gmra.mrb[20].mxu0 %vm1008_vm2, %v4775_v21 }
 0x123   :  { %1423 = vmatpush1.bf16.msra.mxu1 %v4523_v52  ;;  %1464 = vmatpush1.bf16.msra.mxu0 %v4526_v53  ;;  %v4850_v51 = vsub.s32 3, %v259_v50  ;;  %v4855_v52 = vld [vmem:[%s6638_s4] sm:$0xff] }
 0x124   :  { %1424 = vmatprep.subr.bf16.mxu1 %v4531_v54  ;;  %1465 = vmatprep.subr.bf16.mxu0 %v4534_v55 }
 0x125   :  { %1454 = vmatprep.mubr.bf16.mxu1 %v6646_v12  ;;  %1495 = vmatprep.mubr.bf16.mxu0 %v6646_v12  ;;  %v273_v53 = vrot.slane %v4855_v52, %v4850_v51 }
 0x127   :  { %1425 = vmatpush1.bf16.msra.mxu1 %v4529_v56  ;;  %1466 = vmatpush1.bf16.msra.mxu0 %v4532_v57 }
 0x128   :  { %1504 = vmatprep.subr.bf16.mxu1 %v4537_v58  ;;  %1545 = vmatprep.subr.bf16.mxu0 %v4540_v59  ;;  %v4867_v58 = vsub.s32 6, %v259_v50 }
 0x12a   :  { %4305 = vmatmul.mubr.msk.bf16.vlgmr.msra.gmra.mrb[20].mxu1 %vm1008_vm2, %v4775_v21  ;;  %4306 = vmatmul.mubr.msk.bf16.vlgmr.msra.gmra.mrb[24].mxu0 %vm1008_vm2, %v4775_v21 }
 0x12b   :  { %1505 = vmatpush1.bf16.msra.mxu1 %v4535_v60  ;;  %1546 = vmatpush1.bf16.msra.mxu0 %v4538_v61 }
 0x12c   :  { %1506 = vmatprep.subr.bf16.mxu1 %v4543_v62  ;;  %1547 = vmatprep.subr.bf16.mxu0 %v4546_v63  ;;  %v4869_v62 = vsub.s32 5, %v259_v50 }
 0x12d   :  { %1536 = vmatprep.mubr.bf16.mxu1 %v6646_v12  ;;  %1577 = vmatprep.mubr.bf16.mxu0 %v6646_v12 }
 0x12f   :  { %1507 = vmatpush1.bf16.msra.mxu1 %v4541_v1  ;;  %1548 = vmatpush1.bf16.msra.mxu0 %v4544_v2 }
 0x130   :  { %1586 = vmatprep.subr.bf16.mxu1 %v4549_v3  ;;  %1627 = vmatprep.subr.bf16.mxu0 %v4552_v4  ;;  %v285_v4 = vrot.slane %v4855_v52, %v4867_v58 }
 0x132   :  { %4307 = vmatmul.mubr.msk.bf16.vlgmr.msra.gmra.mrb[24].mxu1 %vm1008_vm2, %v4775_v21  ;;  %4308 = vmatmul.mubr.msk.bf16.vlgmr.msra.gmra.mrb[28].mxu0 %vm1008_vm2, %v4775_v21 }
 0x133   :  { %1587 = vmatpush1.bf16.msra.mxu1 %v4547_v5  ;;  %1628 = vmatpush1.bf16.msra.mxu0 %v4550_v6  ;;  %v4875_v5 = vsub.s32 7, %v259_v50 }
 0x134   :  { %1588 = vmatprep.subr.bf16.mxu1 %v4555_v7  ;;  %1629 = vmatprep.subr.bf16.mxu0 %v4558_v8  ;;  %v281_v7 = vrot.slane %v4855_v52, %v4869_v62 }
 0x135   :  { %1618 = vmatprep.mubr.bf16.mxu1 %v6646_v12  ;;  %1659 = vmatprep.mubr.bf16.mxu0 %v6646_v12 }
 0x137   :  { %1589 = vmatpush1.bf16.msra.mxu1 %v4553_v9  ;;  %1630 = vmatpush1.bf16.msra.mxu0 %v4556_v10 }
 0x138   :  { %1668 = vmatprep.subr.bf16.mxu1 %v4561_v11  ;;  %1709 = vmatprep.subr.bf16.mxu0 %v4564_v13 }
 0x13a   :  { %4309 = vmatmul.mubr.msk.bf16.vlgmr.msra.gmra.mrb[28].mxu1 %vm1008_vm2, %v4775_v21  ;;  %4310 = vmatmul.mubr.msk.bf16.vlgmr.msra.gmra.mrb[32].mxu0 %vm1008_vm2, %v4775_v21 }
 0x13b   :  { %1669 = vmatpush1.bf16.msra.mxu1 %v4559_v14  ;;  %1710 = vmatpush1.bf16.msra.mxu0 %v4562_v15  ;;  %v289_v14 = vrot.slane %v4855_v52, %v4875_v5 }
 0x13c   :  { %1670 = vmatprep.subr.bf16.mxu1 %v4567_v16  ;;  %1711 = vmatprep.subr.bf16.mxu0 %v4570_v17 }
 0x13d   :  { %1700 = vmatprep.mubr.bf16.mxu1 %v6646_v12  ;;  %1741 = vmatprep.mubr.bf16.mxu0 %v6646_v12 }
 0x13f   :  { %1671 = vmatpush1.bf16.msra.mxu1 %v4565_v18  ;;  %1712 = vmatpush1.bf16.msra.mxu0 %v4568_v19  ;;  %v4888_v19 = vld [vmem:[%s6638_s4 + $0x8] sm:$0xff] }
 0x140   :  { %1750 = vmatprep.subr.bf16.mxu1 %v4573_v20  ;;  %1791 = vmatprep.subr.bf16.mxu0 %v4576_v22  ;;  %v4890_v20 = vsub.s32 2, %v259_v50 }
 0x142   :  { %4311 = vmatmul.mubr.msk.bf16.vlgmr.msra.gmra.mrb[32].mxu1 %vm1008_vm2, %v4775_v21  ;;  %4312 = vmatmul.mubr.msk.bf16.vlgmr.msra.gmra.mrb[36].mxu0 %vm1008_vm2, %v4775_v21 }
 0x143   :  { %1751 = vmatpush1.bf16.msra.mxu1 %v4571_v23  ;;  %1792 = vmatpush1.bf16.msra.mxu0 %v4574_v24 }
 0x144   :  { %1752 = vmatprep.subr.bf16.mxu1 %v4579_v25  ;;  %1793 = vmatprep.subr.bf16.mxu0 %v4582_v26 }
 0x145   :  { %1782 = vmatprep.mubr.bf16.mxu1 %v6646_v12  ;;  %1823 = vmatprep.mubr.bf16.mxu0 %v6646_v12 }
 0x147   :  { %1753 = vmatpush1.bf16.msra.mxu1 %v4577_v27  ;;  %1794 = vmatpush1.bf16.msra.mxu0 %v4580_v28 }
 0x148   :  { %1832 = vmatprep.subr.bf16.mxu1 %v4585_v29  ;;  %1873 = vmatprep.subr.bf16.mxu0 %v4588_v30  ;;  %v301_v30 = vrot.slane %v4888_v19, %v4890_v20 }
 0x14a   :  { %4313 = vmatmul.mubr.msk.bf16.vlgmr.msra.gmra.mrb[36].mxu1 %vm1008_vm2, %v4775_v21  ;;  %4314 = vmatmul.mubr.msk.bf16.vlgmr.msra.gmra.mrb[40].mxu0 %vm1008_vm2, %v4775_v21 }
 0x14b   :  { %1833 = vmatpush1.bf16.msra.mxu1 %v4583_v31  ;;  %1874 = vmatpush1.bf16.msra.mxu0 %v4586_v32  ;;  %v4894_v31 = vsub.s32 0, %v259_v50  ;;  %v4896_v32 = vsub.s32 1, %v259_v50 }
 0x14c   :  { %1834 = vmatprep.subr.bf16.mxu1 %v4591_v33  ;;  %1875 = vmatprep.subr.bf16.mxu0 %v4594_v34  ;;  %v305_v34 = vrot.slane %v4888_v19, %v4850_v51 }
 0x14d   :  { %1864 = vmatprep.mubr.bf16.mxu1 %v6646_v12  ;;  %1905 = vmatprep.mubr.bf16.mxu0 %v6646_v12 }
 0x14f   :  { %1835 = vmatpush1.bf16.msra.mxu1 %v4589_v35  ;;  %1876 = vmatpush1.bf16.msra.mxu0 %v4592_v36 }
 0x150   :  { %1914 = vmatprep.subr.bf16.mxu1 %v4597_v37  ;;  %1955 = vmatprep.subr.bf16.mxu0 %v4600_v38  ;;  %v293_v38 = vrot.slane %v4888_v19, %v4894_v31 }
 0x152   :  { %4315 = vmatmul.mubr.msk.bf16.vlgmr.msra.gmra.mrb[40].mxu1 %vm1008_vm2, %v4775_v21  ;;  %4316 = vmatmul.mubr.msk.bf16.vlgmr.msra.gmra.mrb[44].mxu0 %vm1008_vm2, %v4775_v21 }
 0x153   :  { %1915 = vmatpush1.bf16.msra.mxu1 %v4595_v39  ;;  %1956 = vmatpush1.bf16.msra.mxu0 %v4598_v40 }
 0x154   :  { %1916 = vmatprep.subr.bf16.mxu1 %v4603_v41  ;;  %1957 = vmatprep.subr.bf16.mxu0 %v4606_v42  ;;  %v297_v42 = vrot.slane %v4888_v19, %v4896_v32 }
 0x155   :  { %1946 = vmatprep.mubr.bf16.mxu1 %v6646_v12  ;;  %1987 = vmatprep.mubr.bf16.mxu0 %v6646_v12 }
 0x157   :  { %1917 = vmatpush1.bf16.msra.mxu1 %v4601_v43  ;;  %1958 = vmatpush1.bf16.msra.mxu0 %v4604_v44 }
 0x158   :  { %1996 = vmatprep.subr.bf16.mxu1 %v4609_v45 }
 0x15a   :  { %4317 = vmatmul.mubr.msk.bf16.vlgmr.msra.gmra.mrb[44].mxu1 %vm1008_vm2, %v4775_v21  ;;  %4318 = vmatmul.mubr.msk.bf16.vlgmr.msra.gmra.mrb[48].mxu0 %vm1008_vm2, %v4775_v21 }
 0x15b   :  { %1997 = vmatpush1.bf16.msra.mxu1 %v4607_v46  ;;  %2028 = vmatprep.mubr.bf16.mxu1 %v6646_v12 }
 0x15c   :  { %1998 = vmatprep.subr.bf16.mxu1 %v4612_v47 }
 0x15f   :  { %1999 = vmatpush1.bf16.msra.mxu1 %v4610_v48 }
 0x162   :  { %4319 = vmatmul.mubr.msk.bf16.vlgmr.msra.gmra.mrb[48].mxu1 %vm1008_vm2, %v4775_v21  ;;  %v4865_v21 = vsub.s32 4, %v259_v50 }
 0x164   :  { %v277_v3 = vrot.slane %v4855_v52, %v4865_v21 }
 0x1d5   :  { %v4859_v54 = vpop.f32.mrb[0].mxu1  ;;  %v4861_v55 = vpop.f32.mrb[4].mxu0 }
 0x1d6   :  { %6662 = vst [vmem:[#allocation8_spill] sm:$0xff] %v4859_v54  ;;  %v4863_v56 = vpop.f32.mrb[1].mxu1  ;;  %v1089_v57 = vpop.f32.mrb[5].mxu0 }
 0x1d7   :  { %v1090_v59 = vadd.f32 %v1089_v57, %v273_v53  ;;  %v1050_v60 = vpop.f32.mrb[2].mxu1  ;;  %v1091_v61 = vpop.f32.mrb[6].mxu0 }
 0x1d8   :  { %v1051_v63 = vpop.f32.mrb[3].mxu1  ;;  %v1092_v1 = vpop.f32.mrb[7].mxu0 }
 0x1d9   :  { %v2040_v2 = vmax.f32 %v1090_v59, 0.0 }
 0x1db   :  { %v4877_v6 = vpack.c.bf16 %v2040_v2, %v2040_v2 }
 0x1dd   :  { %6663 = vst [vmem:[#allocation9_spill] sm:$0xff] %v4877_v6  ;;  %v1128_v8 = vpop.f32.mrb[4].mxu1  ;;  %v1169_v9 = vpop.f32.mrb[8].mxu0  ;;  %2703 = vrot.lane.b32.xlu0 %v4877_v6, %s4671_s17  ;;  %v2138_v36 = vshll.u32 %v4877_v6, 16 }
 0x1de   :  { %v1129_v10 = vadd.f32 %v1128_v8, %v277_v3  ;;  %v1170_v11 = vadd.f32 %v1169_v9, %v285_v4  ;;  %v1130_v13 = vpop.f32.mrb[5].mxu1  ;;  %v1171_v15 = vpop.f32.mrb[9].mxu0  ;;  %v309_v4 = vrot.slane %v4888_v19, %v4865_v21 }
 0x1df   :  { %v1131_v16 = vadd.f32 %v1130_v13, %v281_v7  ;;  %v1132_v17 = vpop.f32.mrb[6].mxu1  ;;  %v1173_v18 = vpop.f32.mrb[10].mxu0  ;;  %v1172_v29 = vadd.f32 %v1171_v15, %v289_v14 }
 0x1e0   :  { %v2041_v22 = vmax.f32 %v1129_v10, 0.0  ;;  %v2043_v23 = vmax.f32 %v1170_v11, 0.0  ;;  %v1133_v24 = vpop.f32.mrb[7].mxu1  ;;  %v1174_v25 = vpop.f32.mrb[11].mxu0 }
 0x1e1   :  { %v2042_v26 = vmax.f32 %v1131_v16, 0.0  ;;  %v2044_v43 = vmax.f32 %v1172_v29, 0.0 }
 0x1e2   :  { %v2091_v27 = vpack.c.bf16 %v2041_v22, %v2041_v22  ;;  %v2093_v28 = vpack.c.bf16 %v2043_v23, %v2043_v23 }
 0x1e3   :  { %v2092_v33 = vpack.c.bf16 %v2042_v26, %v2042_v26  ;;  %v2094_v2 = vpack.c.bf16 %v2044_v43, %v2044_v43 }
 0x1e4   :  { %v2141_v35 = vshll.u32 %v2091_v27, 16  ;;  %2705 = vrot.lane.b32.xlu0 %v2091_v27, %s4671_s17  ;;  %v2147_v37 = vshll.u32 %v2093_v28, 16  ;;  %v2169_v8 = vrot.slane %v2093_v28, 7  ;;  %v2718_v9 = vshrl.u32 %v2093_v28, 16 }
 0x1e5   :  { %v1210_v39 = vpop.f32.mrb[8].mxu1  ;;  %2707 = vrot.lane.b32.xlu1 %v2092_v33, %s4671_s17  ;;  %v2144_v40 = vshll.u32 %v2092_v33, 16  ;;  %v1251_v41 = vpop.f32.mrb[12].mxu0  ;;  %v2170_v17 = vrot.slane %v2094_v2, 7  ;;  %v2722_v18 = vshrl.u32 %v2094_v2, 16  ;;  %v321_v27 = vrot.slane %v4888_v19, %v4875_v5  ;;  %v4927_v33 = vld [vmem:[%s6638_s4 + $0x10] sm:$0xff] }
 0x1e6   :  { %v1252_v44 = vadd.f32 %v1251_v41, %v301_v30  ;;  %v1212_v45 = vpop.f32.mrb[9].mxu1  ;;  %v1253_v46 = vpop.f32.mrb[13].mxu0  ;;  %v4382_v47 = vpack.i.bf16 %v2138_v36, %v2147_v37  ;;  %v1211_v61 = vadd.f32 %v1210_v39, %v293_v38  ;;  %v2720_v30 = vrot.slane %v2718_v9, 7 }
 0x1e7   :  { %v1254_v48 = vadd.f32 %v1253_v46, %v305_v34  ;;  %v1214_v49 = vpop.f32.mrb[10].mxu1  ;;  %v1255_v50 = vpop.f32.mrb[14].mxu0  ;;  %v4387_v53 = vpack.i.bf16 %v2144_v40, %v2141_v35  ;;  %v1213_v63 = vadd.f32 %v1212_v45, %v297_v42  ;;  %v317_v40 = vrot.slane %v4888_v19, %v4867_v58 }
 0x1e8   :  { %v2047_v57 = vmax.f32 %v1252_v44, 0.0  ;;  %v1215_v59 = vpop.f32.mrb[11].mxu1  ;;  %v1256_v60 = vpop.f32.mrb[15].mxu0  ;;  %2709 = vrot.lane.b32.xlu0 %v2093_v28, %s4671_s17  ;;  %v2045_v11 = vmax.f32 %v1211_v61, 0.0  ;;  %v2724_v41 = vrot.slane %v2722_v18, 7  ;;  %v325_v42 = vrot.slane %v4927_v33, %v4894_v31 }
 0x1e9   :  { %v2048_v1 = vmax.f32 %v1254_v48, 0.0  ;;  %4383 = vrot.lane.b32.xlu1 %v4382_v47, %s4671_s17  ;;  %v2046_v13 = vmax.f32 %v1213_v63, 0.0  ;;  %v333_v43 = vrot.slane %v4927_v33, %v4890_v20  ;;  %v329_v47 = vrot.slane %v4927_v33, %v4896_v32 }
 0x1ea   :  { %v2097_v3 = vpack.c.bf16 %v2047_v57, %v2047_v57  ;;  %v2095_v37 = vpack.c.bf16 %v2045_v11, %v2045_v11 }
 0x1eb   :  { %v4911_v7 = vpack.c.bf16 %v2048_v1, %v2048_v1  ;;  %v4930_v38 = vpack.c.bf16 %v2046_v13, %v2046_v13 }
 0x1ec   :  { %v2190_v10 = vshll.u32 %v2097_v3, 16  ;;  %4388 = vrot.lane.b32.xlu0 %v4387_v53, %s4671_s17  ;;  %v2745_v44 = vrot.slane %v2097_v3, 7  ;;  %v2171_v48 = vrot.slane %v2095_v37, 7  ;;  %v2726_v2 = vshrl.u32 %v2095_v37, 16 }
 0x1ed   :  { %v2194_v14 = vshll.u32 %v4911_v7, 16  ;;  %v1292_v15 = vpop.f32.mrb[12].mxu1  ;;  %v1333_v16 = vpop.f32.mrb[16].mxu0  ;;  %2173 = vrot.lane.b32.xlu1 %v2169_v8, %s4672_s20  ;;  %v2186_v49 = vshll.u32 %v4930_v38, 16  ;;  %v2172_v1 = vrot.slane %v4930_v38, 7 }
 0x1ee   :  { %v4916_v22 = vrot.slane %v2190_v10, 7  ;;  %v1293_v23 = vadd.f32 %v1292_v15, %v309_v4  ;;  %v4918_v24 = vpop.f32.mrb[13].mxu1  ;;  %v1335_v25 = vpop.f32.mrb[17].mxu0  ;;  %v1334_v57 = vadd.f32 %v1333_v16, %v317_v40  ;;  %v349_v16 = vrot.slane %v4927_v33, %v4867_v58 }
 0x1ef   :  { %v4920_v26 = vrot.slane %v2194_v14, 7  ;;  %v1296_v28 = vpop.f32.mrb[14].mxu1  ;;  %v1337_v29 = vpop.f32.mrb[18].mxu0  ;;  %v1336_v46 = vadd.f32 %v1335_v25, %v321_v27  ;;  %v4960_v25 = vrot.slane %v2186_v49, 7  ;;  %v2728_v37 = vrot.slane %v2726_v2, 7 }
 0x1f0   :  { %v2049_v34 = vmax.f32 %v1293_v23, 0.0  ;;  %v1297_v35 = vpop.f32.mrb[15].mxu1  ;;  %v1338_v36 = vpop.f32.mrb[19].mxu0  ;;  %2175 = vrot.lane.b32.xlu0 %v2170_v17, %s4672_s20  ;;  %v345_v17 = vrot.slane %v4927_v33, %v4869_v62  ;;  %v353_v23 = vrot.slane %v4927_v33, %v4875_v5  ;;  %v2746_v28 = vrot.slane %v4911_v7, 7 }
 0x1f1   :  { %2732 = vrot.lane.b32.xlu1 %v2720_v30, %s4672_s20  ;;  %v4392_v39 = vpack.i.bf16 %v4920_v26, %v4916_v22  ;;  %v2052_v3 = vmax.f32 %v1336_v46, 0.0  ;;  %v2051_v29 = vmax.f32 %v1334_v57, 0.0 }
 0x1f2   :  { %v4941_v45 = vpack.c.bf16 %v2049_v34, %v2049_v34  ;;  %v2729_v34 = vshrl.u32 %v4930_v38, 16 }
 0x1f3   :  { %v4968_v35 = vpack.c.bf16 %v2052_v3, %v2052_v3  ;;  %v4984_v46 = vpack.c.bf16 %v2051_v29, %v2051_v29 }
 0x1f4   :  { %2734 = vrot.lane.b32.xlu0 %v2724_v41, %s4672_s20  ;;  %v2198_v10 = vshll.u32 %v4941_v45, 16  ;;  %v313_v41 = vrot.slane %v4888_v19, %v4869_v62 }
 0x1f5   :  { %v1374_v50 = vpop.f32.mrb[16].mxu1  ;;  %v1415_v53 = vpop.f32.mrb[20].mxu0  ;;  %2750 = vrot.lane.b32.xlu1 %v2745_v44, %s4673_s23  ;;  %v2238_v57 = vshll.u32 %v4968_v35, 16 }
 0x1f6   :  { %v1375_v59 = vadd.f32 %v1374_v50, %v325_v42  ;;  %v1416_v60 = vadd.f32 %v1415_v53, %v333_v43  ;;  %v1376_v61 = vpop.f32.mrb[17].mxu1  ;;  %v4948_v63 = vpop.f32.mrb[21].mxu0  ;;  %v4962_v27 = vrot.slane %v2198_v10, 7  ;;  %v2731_v50 = vrot.slane %v2729_v34, 7  ;;  %v4991_v53 = vld [vmem:[%s6638_s4 + $0x18] sm:$0xff] }
 0x1f7   :  { %v1377_v4 = vadd.f32 %v1376_v61, %v329_v47  ;;  %v1378_v8 = vpop.f32.mrb[18].mxu1  ;;  %v1419_v9 = vpop.f32.mrb[22].mxu0  ;;  %v369_v29 = vrot.slane %v4991_v53, %v4850_v51  ;;  %v5017_v34 = vrot.slane %v2238_v57, 6 }
 0x1f8   :  { %v2053_v11 = vmax.f32 %v1375_v59, 0.0  ;;  %v2055_v13 = vmax.f32 %v1416_v60, 0.0  ;;  %v1379_v14 = vpop.f32.mrb[19].mxu1  ;;  %v1420_v15 = vpop.f32.mrb[23].mxu0  ;;  %2748 = vrot.lane.b32.xlu0 %v2172_v1, %s4673_s23  ;;  %v4397_v40 = vpack.i.bf16 %v4960_v25, %v4962_v27 }
 0x1f9   :  { %v2054_v18 = vmax.f32 %v1377_v4, 0.0  ;;  %2177 = vrot.lane.b32.xlu1 %v2171_v48, %s4672_s20  ;;  %v1295_v4 = vadd.f32 %v4918_v24, %v313_v41  ;;  %v357_v14 = vrot.slane %v4991_v53, %v4894_v31  ;;  %v365_v15 = vrot.slane %v4991_v53, %v4890_v20 }
 0x1fa   :  { %v4965_v30 = vpack.c.bf16 %v2053_v11, %v2053_v11  ;;  %v4977_v43 = vpack.c.bf16 %v2055_v13, %v2055_v13 }
 0x1fb   :  { %v4970_v36 = vpack.c.bf16 %v2054_v18, %v2054_v18 }
 0x1fc   :  { %v2242_v42 = vshll.u32 %v4965_v30, 16  ;;  %2752 = vrot.lane.b32.xlu0 %v2746_v28, %s4673_s23  ;;  %v2250_v11 = vshll.u32 %v4977_v43, 16 }
 0x1fd   :  { %v2246_v7 = vshll.u32 %v4970_v36, 16  ;;  %v4981_v38 = vpop.f32.mrb[20].mxu1  ;;  %v1497_v44 = vpop.f32.mrb[24].mxu0  ;;  %2736 = vrot.lane.b32.xlu1 %v2728_v37, %s4672_s20  ;;  %v2050_v37 = vmax.f32 %v1295_v4, 0.0 }
 0x1fe   :  { %v4986_v47 = vrot.slane %v2242_v42, 6  ;;  %v1498_v48 = vadd.f32 %v1497_v44, %v349_v16  ;;  %v1458_v49 = vpop.f32.mrb[21].mxu1  ;;  %v1499_v19 = vpop.f32.mrb[25].mxu0  ;;  %v5010_v18 = vrot.slane %v2250_v11, 6 }
 0x1ff   :  { %v4994_v59 = vrot.slane %v2246_v7, 6  ;;  %v1459_v60 = vadd.f32 %v1458_v49, %v345_v17  ;;  %v1500_v61 = vadd.f32 %v1499_v19, %v353_v23  ;;  %v1460_v2 = vpop.f32.mrb[22].mxu1  ;;  %v1501_v3 = vpop.f32.mrb[26].mxu0  ;;  %v2223_v23 = vrot.slane %v4984_v46, 6 }
 0x200   :  { %v2059_v8 = vmax.f32 %v1498_v48, 0.0  ;;  %v1461_v9 = vpop.f32.mrb[23].mxu1  ;;  %v1502_v10 = vpop.f32.mrb[27].mxu0  ;;  %2179 = vrot.lane.b32.xlu0 %v2172_v1, %s4672_s20  ;;  %v361_v1 = vrot.slane %v4991_v53, %v4896_v32  ;;  %v2747_v48 = vrot.slane %v4941_v45, 7  ;;  %v2221_v49 = vrot.slane %v4941_v45, 6 }
 0x201   :  { %v2060_v13 = vmax.f32 %v1500_v61, 0.0  ;;  %2738 = vrot.lane.b32.xlu1 %v2731_v50, %s4672_s20  ;;  %v2058_v17 = vmax.f32 %v1459_v60, 0.0  ;;  %v2763_v9 = vshrl.u32 %v4941_v45, 16  ;;  %v2224_v45 = vrot.slane %v4968_v35, 6 }
 0x202   :  { %v5006_v24 = vpack.c.bf16 %v2059_v8, %v2059_v8 }
 0x203   :  { %v5013_v28 = vpack.c.bf16 %v2060_v13, %v2060_v13  ;;  %v5032_v57 = vpack.c.bf16 %v2058_v17, %v2058_v17 }
 0x204   :  { %v2294_v41 = vshll.u32 %v5006_v24, 16  ;;  %4393 = vrot.lane.b32.xlu0 %v4392_v39, %s4673_s23 }
 0x205   :  { %v2298_v42 = vshll.u32 %v5013_v28, 16  ;;  %v1538_v7 = vpop.f32.mrb[24].mxu1  ;;  %v1579_v44 = vpop.f32.mrb[28].mxu0  ;;  %2229 = vrot.lane.b32.xlu1 %v2223_v23, %s4674_s26 }
 0x206   :  { %v5030_v50 = vrot.slane %v2294_v41, 5  ;;  %v1539_v22 = vadd.f32 %v1538_v7, %v357_v14  ;;  %v5034_v26 = vadd.f32 %v1579_v44, %v365_v15  ;;  %v1540_v39 = vpop.f32.mrb[25].mxu1  ;;  %v1581_v60 = vpop.f32.mrb[29].mxu0  ;;  %v2100_v14 = vpack.c.bf16 %v2050_v37, %v2050_v37 }
 0x207   :  { %v5036_v61 = vrot.slane %v2298_v42, 5  ;;  %v5038_v2 = vadd.f32 %v1540_v39, %v361_v1  ;;  %v5040_v3 = vadd.f32 %v1581_v60, %v369_v29  ;;  %v1542_v4 = vpop.f32.mrb[26].mxu1  ;;  %v1583_v8 = vpop.f32.mrb[30].mxu0  ;;  %v373_v15 = vrot.slane %v4991_v53, %v4865_v21 }
 0x208   :  { %6664 = vst [vmem:[#allocation10_spill] sm:$0xff] %v5034_v26  ;;  %v2061_v10 = vmax.f32 %v1539_v22, 0.0  ;;  %v1543_v11 = vpop.f32.mrb[27].mxu1  ;;  %v1584_v13 = vpop.f32.mrb[31].mxu0  ;;  %2754 = vrot.lane.b32.xlu0 %v2747_v48, %s4673_s23  ;;  %v2290_v1 = vshll.u32 %v5032_v57, 16  ;;  %v381_v29 = vrot.slane %v4991_v53, %v4867_v58  ;;  %v2771_v41 = vshrl.u32 %v4984_v46, 16 }
 0x209   :  { %6665 = vst [vmem:[#allocation11_spill] sm:$0xff] %v5038_v2  ;;  %6666 = vst [vmem:[#allocation12_spill] sm:$0xff] %v5040_v3  ;;  %2225 = vrot.lane.b32.xlu1 %v2221_v49, %s4674_s26  ;;  %v2765_v37 = vrot.slane %v2763_v9, 6  ;;  %v377_v42 = vrot.slane %v4991_v53, %v4869_v62  ;;  %v385_v7 = vrot.slane %v4991_v53, %v4875_v5  ;;  %v2222_v48 = vrot.slane %v2100_v14, 6 }
 0x20a   :  { %v5050_v23 = vpack.c.bf16 %v2061_v10, %v2061_v10  ;;  %v5065_v9 = vrot.slane %v2290_v1, 5  ;;  %v2773_v0 = vrot.slane %v2771_v41, 6  ;;  %v2767_v41 = vshrl.u32 %v2100_v14, 16 }
 0x20c   :  { %v2302_v44 = vshll.u32 %v5050_v23, 16  ;;  %2793 = vrot.lane.b32.xlu0 %v2224_v45, %s4675_s27 }
 0x20d   :  { %v1620_v49 = vpop.f32.mrb[28].mxu1  ;;  %v1661_v22 = vpop.f32.mrb[32].mxu0  ;;  %2777 = vrot.lane.b32.xlu1 %v2765_v37, %s4674_s26 }
 0x20e   :  { %v5063_v39 = vrot.slane %v2302_v44, 5  ;;  %v1621_v46 = vadd.f32 %v1620_v49, %v373_v15  ;;  %v1662_v60 = vadd.f32 %v1661_v22, %v381_v29  ;;  %v1622_v4 = vpop.f32.mrb[29].mxu1  ;;  %v1663_v8 = vpop.f32.mrb[33].mxu0  ;;  %v5071_v15 = vld [vmem:[%s6638_s4 + $0x20] sm:$0xff]  ;;  %v337_v29 = vrot.slane %v4927_v33, %v4850_v51 }
 0x20f   :  { %v1623_v10 = vadd.f32 %v1622_v4, %v377_v42  ;;  %v1664_v53 = vadd.f32 %v1663_v8, %v385_v7  ;;  %v1624_v11 = vpop.f32.mrb[30].mxu1  ;;  %v1665_v13 = vpop.f32.mrb[34].mxu0  ;;  %v401_v7 = vrot.slane %v5071_v15, %v4850_v51  ;;  %v2774_v44 = vshrl.u32 %v4968_v35, 16 }
 0x210   :  { %v2065_v12 = vmax.f32 %v1621_v46, 0.0  ;;  %v2067_v17 = vmax.f32 %v1662_v60, 0.0  ;;  %v1625_v16 = vpop.f32.mrb[31].mxu1  ;;  %v1666_v19 = vpop.f32.mrb[35].mxu0  ;;  %2227 = vrot.lane.b32.xlu0 %v2222_v48, %s4674_s26  ;;  %v1418_v22 = vadd.f32 %v4948_v63, %v337_v29  ;;  %v397_v27 = vrot.slane %v5071_v15, %v4890_v20 }
 0x211   :  { %v2066_v37 = vmax.f32 %v1623_v10, 0.0  ;;  %v2068_v42 = vmax.f32 %v1664_v53, 0.0  ;;  %2781 = vrot.lane.b32.xlu1 %v2773_v0, %s4674_s26  ;;  %v2776_v53 = vrot.slane %v2774_v44, 6  ;;  %v2790_v44 = vrot.slane %v4965_v30, 6  ;;  %v5132_v30 = vld [vmem:[%s6638_s4 + $0x28] sm:$0xff] }
 0x212   :  { %v5078_v16 = vpack.c.bf16 %v2067_v17, %v2067_v17  ;;  %v5085_v48 = vpack.c.bf16 %v2065_v12, %v2065_v12  ;;  %v2056_v25 = vmax.f32 %v1418_v22, 0.0 }
 0x213   :  { %v5080_v19 = vpack.c.bf16 %v2066_v37, %v2066_v37  ;;  %v5091_v14 = vpack.c.bf16 %v2068_v42, %v2068_v42 }
 0x214   :  { %v2338_v49 = vshll.u32 %v5078_v16, 16  ;;  %2231 = vrot.lane.b32.xlu0 %v2224_v45, %s4674_s26  ;;  %v2769_v45 = vrot.slane %v2767_v41, 6  ;;  %v2330_v11 = vshll.u32 %v5085_v48, 16  ;;  %v2792_v41 = vrot.slane %v4977_v43, 6 }
 0x215   :  { %v2334_v0 = vshll.u32 %v5080_v19, 16  ;;  %v5093_v17 = vpop.f32.mrb[32].mxu1  ;;  %v1743_v46 = vpop.f32.mrb[36].mxu0  ;;  %4398 = vrot.lane.b32.xlu1 %v4397_v40, %s4673_s23  ;;  %v2342_v40 = vshll.u32 %v5091_v14, 16 }
 0x216   :  { %v5099_v12 = vrot.slane %v2338_v49, 4  ;;  %v5101_v35 = vpop.f32.mrb[33].mxu1  ;;  %v1745_v60 = vpop.f32.mrb[37].mxu0  ;;  %v409_v49 = vrot.slane %v5071_v15, %v4869_v62  ;;  %v5120_v22 = vrot.slane %v2330_v11, 4 }
 0x217   :  { %v5103_v4 = vrot.slane %v2334_v0, 4  ;;  %v1746_v63 = vadd.f32 %v1745_v60, %v401_v7  ;;  %v1706_v8 = vpop.f32.mrb[34].mxu1  ;;  %v1747_v10 = vpop.f32.mrb[38].mxu0  ;;  %v405_v7 = vrot.slane %v5071_v15, %v4865_v21  ;;  %v5122_v0 = vrot.slane %v2342_v40, 4 }
 0x218   :  { %6667 = vst [vmem:[#allocation13_spill] sm:$0xff] %v5099_v12  ;;  %v1707_v13 = vpop.f32.mrb[35].mxu1  ;;  %v1748_v29 = vpop.f32.mrb[39].mxu0  ;;  %2779 = vrot.lane.b32.xlu0 %v2769_v45, %s4674_s26  ;;  %v2106_v60 = vpack.c.bf16 %v2056_v25, %v2056_v25  ;;  %v341_v45 = vrot.slane %v4927_v33, %v4865_v21  ;;  %v2273_v40 = vrot.slane %v4977_v43, 5 }
 0x219   :  { %6668 = vst [vmem:[#allocation14_spill] sm:$0xff] %v5103_v4  ;;  %2783 = vrot.lane.b32.xlu1 %v2776_v53, %s4674_s26  ;;  %v2072_v42 = vmax.f32 %v1746_v63, 0.0  ;;  %v1744_v63 = vadd.f32 %v1743_v46, %v397_v27  ;;  %v2791_v53 = vrot.slane %v4970_v36, 6  ;;  %v421_v36 = vrot.slane %v5132_v30, %v4894_v31 }
 0x21b   :  { %v5135_v11 = vpack.c.bf16 %v2072_v42, %v2072_v42 }
 0x21c   :  { %2799 = vrot.lane.b32.xlu0 %v2792_v41, %s4675_s27  ;;  %v2808_v41 = vshrl.u32 %v4977_v43, 16  ;;  %v2274_v43 = vrot.slane %v2106_v60, 5 }
 0x21d   :  { %v1784_v8 = vpop.f32.mrb[36].mxu1  ;;  %v5126_v10 = vpop.f32.mrb[40].mxu0  ;;  %2795 = vrot.lane.b32.xlu1 %v2790_v44, %s4675_s27 }
 0x21e   :  { %v1785_v13 = vadd.f32 %v1784_v8, %v405_v7  ;;  %v1786_v29 = vpop.f32.mrb[37].mxu1  ;;  %v5137_v25 = vpop.f32.mrb[41].mxu0  ;;  %v2812_v7 = vshrl.u32 %v2106_v60, 16  ;;  %v2071_v8 = vmax.f32 %v1744_v63, 0.0 }
 0x21f   :  { %v1787_v33 = vadd.f32 %v1786_v29, %v409_v49  ;;  %v1788_v46 = vpop.f32.mrb[38].mxu1  ;;  %v1829_v27 = vpop.f32.mrb[42].mxu0  ;;  %v1457_v49 = vadd.f32 %v4981_v38, %v341_v45  ;;  %v433_v38 = vrot.slane %v5132_v30, %v4850_v51 }
 0x220   :  { %v2073_v44 = vmax.f32 %v1785_v13, 0.0  ;;  %v1789_v37 = vpop.f32.mrb[39].mxu1  ;;  %v1830_v1 = vpop.f32.mrb[43].mxu0  ;;  %2797 = vrot.lane.b32.xlu0 %v2791_v53, %s4675_s27  ;;  %v429_v53 = vrot.slane %v5132_v30, %v4890_v20  ;;  %v2810_v13 = vrot.slane %v2808_v41, 5  ;;  %v425_v46 = vrot.slane %v5132_v30, %v4896_v32 }
 0x221   :  { %v2074_v29 = vmax.f32 %v1787_v33, 0.0  ;;  %2277 = vrot.lane.b32.xlu1 %v2273_v40, %s4676_s12  ;;  %v2384_v37 = vshll.u32 %v5135_v11, 16  ;;  %v2057_v60 = vmax.f32 %v1457_v49, 0.0  ;;  %v5161_v33 = vpack.c.bf16 %v2071_v8, %v2071_v8 }
 0x222   :  { %v5149_v1 = vpack.c.bf16 %v2073_v44, %v2073_v44  ;;  %v2814_v41 = vrot.slane %v2812_v7, 5 }
 0x223   :  { %v5158_v63 = vpack.c.bf16 %v2074_v29, %v2074_v29  ;;  %v5164_v44 = vrot.slane %v2384_v37, 3 }
 0x224   :  { %v2388_v45 = vshll.u32 %v5149_v1, 16  ;;  %2279 = vrot.lane.b32.xlu0 %v2274_v43, %s4676_s12 }
 0x225   :  { %v1866_v27 = vpop.f32.mrb[40].mxu1  ;;  %v1907_v40 = vpop.f32.mrb[44].mxu0  ;;  %2822 = vrot.lane.b32.xlu1 %v2810_v13, %s4676_s12  ;;  %v2392_v37 = vshll.u32 %v5158_v63, 16  ;;  %v2107_v13 = vpack.c.bf16 %v2057_v60, %v2057_v60 }
 0x226   :  { %v5166_v42 = vrot.slane %v2388_v45, 3  ;;  %v1867_v3 = vadd.f32 %v1866_v27, %v421_v36  ;;  %v1908_v51 = vadd.f32 %v1907_v40, %v429_v53  ;;  %v1868_v26 = vpop.f32.mrb[41].mxu1  ;;  %v1909_v2 = vpop.f32.mrb[45].mxu0  ;;  %v445_v53 = vrot.slane %v5132_v30, %v4867_v58 }
 0x227   :  { %v1869_v29 = vadd.f32 %v1868_v26, %v425_v46  ;;  %v1910_v54 = vadd.f32 %v1909_v2, %v433_v38  ;;  %v1870_v4 = vpop.f32.mrb[42].mxu1  ;;  %v1911_v43 = vpop.f32.mrb[46].mxu0  ;;  %v6669_v26 = vpack.i.bf16 %v5017_v34, %v5010_v18  ;;  %v2380_v2 = vshll.u32 %v5161_v33, 16 }
 0x228   :  { %v2077_v49 = vmax.f32 %v1867_v3, 0.0  ;;  %v2079_v8 = vmax.f32 %v1908_v51, 0.0  ;;  %v1871_v12 = vpop.f32.mrb[43].mxu1  ;;  %v1912_v6 = vpop.f32.mrb[47].mxu0  ;;  %2824 = vrot.lane.b32.xlu0 %v2814_v41, %s4676_s12  ;;  %v449_v46 = vrot.slane %v5132_v30, %v4875_v5  ;;  %v6670_v34 = vpack.i.bf16 %v4994_v59, %v4986_v47 }
 0x229   :  { %v2078_v36 = vmax.f32 %v1869_v29, 0.0  ;;  %4403 = vrot.lane.b32.xlu1 %v6669_v26, %s4675_s27  ;;  %v2080_v12 = vmax.f32 %v1910_v54, 0.0  ;;  %v2836_v6 = vrot.slane %v5006_v24, 5  ;;  %v5193_v54 = vrot.slane %v2392_v37, 3 }
 0x22a   :  { %v5177_v3 = vpack.c.bf16 %v2079_v8, %v2079_v8  ;;  %v5186_v38 = vpack.c.bf16 %v2077_v49, %v2077_v49  ;;  %v2275_v24 = vrot.slane %v2107_v13, 5  ;;  %v2276_v47 = vrot.slane %v5032_v57, 5 }
 0x22b   :  { %v5180_v4 = vpack.c.bf16 %v2078_v36, %v2078_v36  ;;  %v5201_v41 = vpack.c.bf16 %v2080_v12, %v2080_v12  ;;  %v5206_v59 = vrot.slane %v2380_v2, 3  ;;  %v2816_v43 = vshrl.u32 %v2107_v13, 16 }
 0x22c   :  { %v2438_v18 = vshll.u32 %v5177_v3, 16  ;;  %4408 = vrot.lane.b32.xlu0 %v6670_v34, %s4675_s27  ;;  %v2430_v12 = vshll.u32 %v5186_v38, 16 }
 0x22d   :  { %v2434_v45 = vshll.u32 %v5180_v4, 16  ;;  %v5196_v60 = vpop.f32.mrb[44].mxu1  ;;  %v1989_v27 = vpop.f32.mrb[48].mxu0  ;;  %2841 = vrot.lane.b32.xlu1 %v2836_v6, %s4677_s3  ;;  %v250_v6 = vld [vmem:[%s6638_s4 + $0x30] sm:$0x3] }
 0x22e   :  { %v5199_v40 = vrot.slane %v2438_v18, 2  ;;  %v5203_v51 = vpop.f32.mrb[45].mxu1  ;;  %v1991_v29 = vpop.f32.mrb[49].mxu0  ;;  %v1990_v8 = vadd.f32 %v1989_v27, %v445_v53  ;;  %v2837_v53 = vrot.slane %v5013_v28, 5  ;;  %v2442_v27 = vshll.u32 %v5201_v41, 16 }
 0x22f   :  { %v5208_v49 = vrot.slane %v2434_v45, 2  ;;  %v1992_v37 = vadd.f32 %v1991_v29, %v449_v46  ;;  %v1952_v36 = vpop.f32.mrb[46].mxu1  ;;  %v1993_v26 = vpop.f32.mrb[50].mxu0  ;;  %v453_v45 = vrot.slane %v250_v6, %v4894_v31 }
 0x230   :  { %v1953_v18 = vpop.f32.mrb[47].mxu1  ;;  %v1994_v34 = vpop.f32.mrb[51].mxu0  ;;  %2839 = vrot.lane.b32.xlu0 %v2276_v47, %s4677_s3  ;;  %v2083_v29 = vmax.f32 %v1990_v8, 0.0  ;;  %v2818_v36 = vrot.slane %v2816_v43, 5  ;;  %v457_v26 = vrot.slane %v250_v6, %v4896_v32  ;;  %v5231_v2 = vrot.slane %v2442_v27, 2 }
 0x231   :  { %6671 = vst [vmem:[#allocation15_spill] sm:$0xff] %v5208_v49  ;;  %2281 = vrot.lane.b32.xlu1 %v2275_v24, %s4676_s12  ;;  %v2084_v46 = vmax.f32 %v1992_v37, 0.0  ;;  %v2819_v18 = vshrl.u32 %v5032_v57, 16  ;;  %v5226_v34 = vrot.slane %v2430_v12, 2  ;;  %v389_v27 = vrot.slane %v5071_v15, %v4894_v31 }
 0x232   :  { %v5233_v7 = vpack.c.bf16 %v2083_v29, %v2083_v29  ;;  %v6679_v12 = vpack.i.bf16 %v5120_v22, %v5122_v0 }
 0x233   :  { %v5229_v13 = vpack.c.bf16 %v2084_v46, %v2084_v46  ;;  %v2821_v6 = vrot.slane %v2819_v18, 5 }
 0x234   :  { %2843 = vrot.lane.b32.xlu0 %v2837_v53, %s4677_s3  ;;  %v2480_v29 = vshll.u32 %v5233_v7, 16 }
 0x235   :  { %v2030_v24 = vpop.f32.mrb[48].mxu1  ;;  %2826 = vrot.lane.b32.xlu1 %v2818_v36, %s4676_s12  ;;  %v2484_v46 = vshll.u32 %v5229_v13, 16 }
 0x236   :  { %v2031_v28 = vadd.f32 %v2030_v24, %v453_v45  ;;  %v2032_v37 = vpop.f32.mrb[49].mxu1  ;;  %v2838_v24 = vrot.slane %v5050_v23, 5 }
 0x237   :  { %v2033_v43 = vadd.f32 %v2032_v37, %v457_v26  ;;  %v2034_v8 = vpop.f32.mrb[50].mxu1  ;;  %v5260_v37 = vrot.slane %v2484_v46, 1 }
 0x238   :  { %v2085_v49 = vmax.f32 %v2031_v28, 0.0  ;;  %v2035_v57 = vpop.f32.mrb[51].mxu1  ;;  %2283 = vrot.lane.b32.xlu0 %v2276_v47, %s4676_s12  ;;  %v6672_v47 = vpack.i.bf16 %v5036_v61, %v5030_v50  ;;  %v393_v28 = vrot.slane %v5071_v15, %v4896_v32  ;;  %v1703_v8 = vadd.f32 %v5093_v17, %v389_v27 }
 0x239   :  { %v2086_v53 = vmax.f32 %v2033_v43, 0.0  ;;  %2828 = vrot.lane.b32.xlu1 %v2821_v6, %s4676_s12  ;;  %v6653_v61 = vrot.slane %v5085_v48, 4  ;;  %v5268_v6 = vrot.slane %v2480_v29, 1  ;;  %v2889_v57 = vshrl.u32 %v5091_v14, 16 }
 0x23a   :  { %v5240_v45 = vpack.c.bf16 %v2085_v49, %v2085_v49  ;;  %v6673_v49 = vpack.i.bf16 %v5065_v9, %v5063_v39  ;;  %v2871_v9 = vrot.slane %v5080_v19, 4  ;;  %v1705_v17 = vadd.f32 %v5101_v35, %v393_v28 }
 0x23b   :  { %v5245_v36 = vpack.c.bf16 %v2086_v53, %v2086_v53  ;;  %v2872_v53 = vrot.slane %v5078_v16, 4  ;;  %v2069_v46 = vmax.f32 %v1703_v8, 0.0  ;;  %v417_v29 = vrot.slane %v5071_v15, %v4875_v5 }
 0x23c   :  { %v2488_v26 = vshll.u32 %v5240_v45, 16  ;;  %4413 = vrot.lane.b32.xlu0 %v6672_v47, %s4677_s3  ;;  %v2070_v27 = vmax.f32 %v1705_v17, 0.0  ;;  %v265_v47 = vrot.slane %v4855_v52, %v4896_v32  ;;  %v413_v35 = vrot.slane %v5071_v15, %v4867_v58 }
 0x23d   :  { %v2492_v18 = vshll.u32 %v5245_v36, 16  ;;  %4418 = vrot.lane.b32.xlu1 %v6673_v49, %s4677_s3  ;;  %v5288_v19 = vpack.c.bf16 %v2069_v46, %v2069_v46  ;;  %v2873_v16 = vrot.slane %v5091_v14, 4  ;;  %v2916_v5 = vrot.slane %v5135_v11, 3 }
 0x23e   :  { %v5262_v43 = vrot.slane %v2488_v26, 1  ;;  %v2891_v26 = vrot.slane %v2889_v57, 3  ;;  %v5297_v49 = vpack.c.bf16 %v2070_v27, %v2070_v27  ;;  %v1828_v32 = vadd.f32 %v5137_v25, %v417_v29 }
 0x23f   :  { %v5265_v50 = vrot.slane %v2492_v18, 1  ;;  %v269_v18 = vrot.slane %v4855_v52, %v4890_v20  ;;  %v1049_v28 = vadd.f32 %v4863_v56, %v265_v47  ;;  %v2893_v58 = vshrl.u32 %v5288_v19, 16 }
 0x240   :  { %2845 = vrot.lane.b32.xlu0 %v2838_v24, %s4677_s3  ;;  %v2900_v24 = vshrl.u32 %v5161_v33, 16  ;;  %v1826_v15 = vadd.f32 %v5126_v10, %v413_v35  ;;  %v6658_v8 = vrot.slane %v5161_v33, 3  ;;  %v2897_v20 = vshrl.u32 %v5297_v49, 16 }
 0x241   :  { %2874 = vrot.lane.b32.xlu1 %v6653_v61, %s4671_s17  ;;  %v1088_v52 = vadd.f32 %v4861_v55, %v269_v18  ;;  %v2076_v11 = vmax.f32 %v1828_v32, 0.0  ;;  %v2895_v17 = vrot.slane %v2893_v58, 3  ;;  %v2934_v55 = vshrl.u32 %v5158_v63, 16 }
 0x242   :  { %v2902_v25 = vrot.slane %v2900_v24, 3  ;;  %v2075_v56 = vmax.f32 %v1826_v15, 0.0  ;;  %v2899_v46 = vrot.slane %v2897_v20, 3  ;;  %v2917_v29 = vrot.slane %v5149_v1, 3 }
 0x243   :  { %v2039_v10 = vmax.f32 %v1088_v52, 0.0  ;;  %v5314_v57 = vpack.c.bf16 %v2076_v11, %v2076_v11  ;;  %v2936_v1 = vrot.slane %v2934_v55, 2  ;;  %v441_v55 = vrot.slane %v5132_v30, %v4869_v62 }
 0x244   :  { %2876 = vrot.lane.b32.xlu0 %v2871_v9, %s4671_s17  ;;  %v2038_v9 = vmax.f32 %v1049_v28, 0.0  ;;  %v2918_v28 = vrot.slane %v5158_v63, 3  ;;  %v2365_v0 = vrot.slane %v5288_v19, 3 }
 0x245   :  { %2878 = vrot.lane.b32.xlu1 %v2872_v53, %s4671_s17  ;;  %v5326_v47 = vpack.c.bf16 %v2039_v10, %v2039_v10  ;;  %v2942_v35 = vshrl.u32 %v5314_v57, 16 }
 0x246   :  { %v5319_v27 = vpack.c.bf16 %v2038_v9, %v2038_v9 }
 0x247   :  { %v2692_v52 = vshrl.u32 %v5326_v47, 16  ;;  %v2944_v11 = vrot.slane %v2942_v35, 2 }
 0x248   :  { %2903 = vrot.lane.b32.xlu0 %v2891_v26, %s4672_s20  ;;  %6674 = vst [vmem:[#allocation16_spill] sm:$0xff] %v5319_v27  ;;  %v5322_v26 = vpack.c.bf16 %v2075_v56, %v2075_v56 }
 0x249   :  { %2880 = vrot.lane.b32.xlu1 %v2873_v16, %s4671_s17 }
 0x24a   :  { %v2938_v32 = vshrl.u32 %v5322_v26, 16 }
 0x24c   :  { %2921 = vrot.lane.b32.xlu0 %v2916_v5, %s4673_s23  ;;  %v2689_v5 = vshrl.u32 %v5319_v27, 16 }
 0x24d   :  { %2919 = vrot.lane.b32.xlu1 %v6658_v8, %s4673_s23 }
 0x24f   :  { %v5316_v53 = vpop.permute.xlu0 %2703 }
 0x250   :  { %2909 = vrot.lane.b32.xlu0 %v2902_v25, %s4672_s20  ;;  %v437_v25 = vrot.slane %v5132_v30, %v4865_v21  ;;  %v1951_v30 = vadd.f32 %v5203_v51, %v441_v55 }
 0x251   :  { %2905 = vrot.lane.b32.xlu1 %v2895_v17, %s4672_s20  ;;  %v2940_v17 = vrot.slane %v2938_v32, 2 }
 0x252   :  { %v1949_v35 = vadd.f32 %v5196_v60, %v437_v25  ;;  %v2082_v51 = vmax.f32 %v1951_v30, 0.0  ;;  %v2990_v30 = vshrl.u32 %v5233_v7, 16 }
 0x254   :  { %2907 = vrot.lane.b32.xlu0 %v2899_v46, %s4672_s20  ;;  %v2961_v46 = vrot.slane %v5180_v4, 2 }
 0x255   :  { %2923 = vrot.lane.b32.xlu1 %v2917_v29, %s4673_s23  ;;  %v2945_v29 = vshrl.u32 %v5186_v38, 16 }
 0x256   :  { %v5334_v18 = vpop.permute.xlu0 %2705 }
 0x257   :  { %v2708_v24 = vpop.permute.xlu1 %2707  ;;  %v2947_v60 = vrot.slane %v2945_v29, 2  ;;  %v2963_v29 = vrot.slane %v5201_v41, 2 }
 0x258   :  { %v2712_v58 = vsel %vm2157_vm5, %v5334_v18, %v2708_v24  ;;  %2948 = vrot.lane.b32.xlu0 %v2936_v1, %s4674_s26 }
 0x259   :  { %v5344_v15 = vsel %vm5330_vm6, %v2689_v5, %v2712_v58  ;;  %2925 = vrot.lane.b32.xlu1 %v2918_v28, %s4673_s23  ;;  %v2979_v28 = vshrl.u32 %v5201_v41, 16 }
 0x25a   :  { %v5348_v20 = vpop.permute.xlu0 %2709 }
 0x25b   :  { %v2713_v9 = vsel %vm2157_vm5, %v2708_v24, %v5348_v20  ;;  %v5354_v56 = vpop.permute.xlu1 %4383  ;;  %v6656_v24 = vrot.slane %v5186_v38, 2 }
 0x25c   :  { %v5358_v10 = vsel %vm5330_vm6, %v2692_v52, %v2713_v9  ;;  %2952 = vrot.lane.b32.xlu0 %v2944_v11, %s4674_s26  ;;  %v6657_v1 = vunpack.i.l.bf16 %v5354_v56  ;;  %v2962_v52 = vrot.slane %v5177_v3, 2  ;;  %v2081_v11 = vmax.f32 %v1949_v35, 0.0 }
 0x25d   :  { %2950 = vrot.lane.b32.xlu1 %v2940_v17, %s4674_s26  ;;  %v2981_v17 = vrot.slane %v2979_v28, 1  ;;  %v5407_v3 = vpack.c.bf16 %v2082_v51, %v2082_v51  ;;  %v3007_v35 = vrot.slane %v5229_v13, 1 }
 0x25e   :  { %v5365_v21 = vpop.permute.xlu0 %4388 }
 0x25f   :  { %v6654_v5 = vunpack.i.h.bf16 %v5365_v21  ;;  %v5371_v32 = vpop.permute.xlu1 %2173  ;;  %v2987_v51 = vshrl.u32 %v5407_v3, 16 }
 0x260   :  { %2966 = vrot.lane.b32.xlu0 %v2961_v46, %s4675_s27  ;;  %v5400_v46 = vpack.c.bf16 %v2081_v11, %v2081_v11  ;;  %v6655_v11 = vrot.slane %v5233_v7, 1 }
 0x261   :  { %v5380_v62 = vsel %vm2157_vm5, %v6654_v5, %v6657_v1  ;;  %2964 = vrot.lane.b32.xlu1 %v6656_v24, %s4675_s27  ;;  %v2989_v23 = vrot.slane %v2987_v51, 1  ;;  %v6682_v1 = vld [vmem:[#allocation14_spill] sm:$0xff] }
 0x262   :  { %v5386_v4 = vpop.permute.xlu0 %2175  ;;  %v2983_v28 = vshrl.u32 %v5400_v46, 16 }
 0x263   :  { %v5394_v25 = vpop.permute.xlu1 %2732 }
 0x264   :  { %2954 = vrot.lane.b32.xlu0 %v2947_v60, %s4674_s26  ;;  %v2985_v61 = vrot.slane %v2983_v28, 1 }
 0x265   :  { %2968 = vrot.lane.b32.xlu1 %v2962_v52, %s4675_s27 }
 0x266   :  { %v5398_v9 = vpop.permute.xlu0 %2734 }
 0x267   :  { %v5402_v55 = vpop.permute.xlu1 %2750 }
 0x268   :  { %2993 = vrot.lane.b32.xlu0 %v2981_v17, %s4676_s12  ;;  %v2992_v17 = vrot.slane %v2990_v30, 1 }
 0x269   :  { %2970 = vrot.lane.b32.xlu1 %v2963_v29, %s4675_s27 }
 0x26a   :  { %v5410_v60 = vpop.permute.xlu0 %2748 }
 0x26b   :  { %v5414_v52 = vpop.permute.xlu1 %2177 }
 0x26c   :  { %3012 = vrot.lane.b32.xlu0 %v3007_v35, %s4677_s3 }
 0x26d   :  { %3010 = vrot.lane.b32.xlu1 %v6655_v11, %s4677_s3 }
 0x26e   :  { %v2753_v13 = vpop.permute.xlu0 %2752 }
 0x26f   :  { %v2737_v29 = vpop.permute.xlu1 %2736  ;;  %v5432_v39 = vsel %vm2209_vm10, %v5402_v55, %v2753_v13 }
 0x270   :  { %v2741_v5 = vsel %vm6661_vm9, %v5398_v9, %v2737_v29  ;;  %2999 = vrot.lane.b32.xlu0 %v2992_v17, %s4676_s12  ;;  %v6681_v17 = vld [vmem:[#allocation13_spill] sm:$0xff] }
 0x271   :  { %v5436_v30 = vsel %vm2510_vm3, %v5344_v15, %v2741_v5  ;;  %2995 = vrot.lane.b32.xlu1 %v2985_v61, %s4676_s12  ;;  %v3008_v15 = vrot.slane %v5240_v45, 1  ;;  %v6680_v61 = vld [vmem:[#allocation9_spill] sm:$0xff]  ;;  %v6683_v8 = vpack.i.bf16 %v6681_v17, %v6682_v1  ;;  %v6686_v17 = vpack.i.bf16 %v5206_v59, %v5193_v54 }
 0x272   :  { %v2180_v28 = vpop.permute.xlu0 %2179  ;;  %v2694_v5 = vshrl.u32 %v6680_v61, 16 }
 0x273   :  { %v2739_v11 = vpop.permute.xlu1 %2738 }
 0x274   :  { %2997 = vrot.lane.b32.xlu0 %v2989_v23, %s4676_s12  ;;  %v2742_v58 = vsel %vm6661_vm9, %v2737_v29, %v2739_v11  ;;  %v3028_v22 = vsel %vm5330_vm6, %v2694_v5, %v5348_v20  ;;  %v2366_v23 = vrot.slane %v5297_v49, 3  ;;  %v2184_v5 = vsel %vm6661_vm9, %v5414_v52, %v2180_v28 }
 0x275   :  { %4428 = vrot.lane.b32.xlu1 %v6679_v12, %s4671_s17  ;;  %v3043_v12 = vsel %vm2510_vm3, %v3028_v22, %v2739_v11  ;;  %v3039_v29 = vsel %vm2510_vm3, %v5358_v10, %v2742_v58  ;;  %v2364_v10 = vrot.slane %v5091_v14, 3  ;;  %v6684_v58 = vrot.slane %v5161_v33, 3 }
 0x276   :  { %v5448_v24 = vpop.permute.xlu0 %4393  ;;  %v2415_v14 = vrot.slane %v5322_v26, 2  ;;  %v3009_v33 = vrot.slane %v5245_v36, 1  ;;  %v4615_v36 = vld [vmem:[%s6638_s4] sm:$0xff]  ;;  %s4678_s4 = smov 126  }
 0x277   :  { %v5452_v51 = vpop.permute.xlu1 %2229  ;;  %v261_v26 = vrot.slane %v4615_v36, %v4894_v31 }
 0x278   :  { %4423 = vrot.lane.b32.xlu0 %v6683_v8, %s4671_s17  ;;  %s4684_s17 = smov 86  }
 0x279   :  { %3014 = vrot.lane.b32.xlu1 %v3008_v15, %s4677_s3 }
 0x27a   :  { %v2755_v45 = vpop.permute.xlu0 %2754 }
 0x27b   :  { %v2758_v27 = vsel %vm2209_vm10, %v2753_v13, %v2755_v45  ;;  %v3048_v8 = vsel %vm5426_vm11, %v3043_v12, %v2755_v45  ;;  %v5471_v1 = vpop.permute.xlu1 %2225 }
 0x27c   :  { %v3047_v20 = vsel %vm5426_vm11, %v3039_v29, %v2758_v27  ;;  %2370 = vrot.lane.b32.xlu0 %v2365_v0, %s4672_s20  ;;  %v6685_v27 = vpack.i.bf16 %v5166_v42, %v5164_v44  ;;  %v6687_v0 = vunpack.i.l.bf16 %v5354_v56  ;;  %v4396_v44 = vunpack.i.h.bf16 %v5448_v24 }
 0x27d   :  { %2372 = vrot.lane.b32.xlu1 %v2366_v23, %s4672_s20  ;;  %v2416_v29 = vrot.slane %v5314_v57, 2 }
 0x27e   :  { %v5477_v19 = vpop.permute.xlu0 %2793  ;;  %v2516_v42 = vsel %vm5330_vm6, %v6680_v61, %v6687_v0  ;;  %v6688_v61 = vsel %vm5330_vm6, %v5326_v47, %v5380_v62  ;;  %v6689_v62 = vrot.slane %v5186_v38, 2 }
 0x27f   :  { %v5479_v49 = vpop.permute.xlu1 %2777  ;;  %v2532_v59 = vsel %vm2510_vm3, %v2516_v42, %v2180_v28  ;;  %v5524_v12 = vsel %vm2510_vm3, %v6688_v61, %v2184_v5  ;;  %v6693_v42 = vld [vmem:[#allocation15_spill] sm:$0xff] }
 0x280   :  { %2374 = vrot.lane.b32.xlu0 %v6684_v58, %s4672_s20  ;;  %v6692_v58 = vld [vmem:[#allocation8_spill] sm:$0xff] }
 0x281   :  { %2368 = vrot.lane.b32.xlu1 %v2364_v10, %s4672_s20 }
 0x282   :  { %v5486_v11 = vpop.permute.xlu0 %2227 }
 0x283   :  { %v2782_v13 = vpop.permute.xlu1 %2781 }
 0x284   :  { %4433 = vrot.lane.b32.xlu0 %v6685_v27, %s4673_s23  ;;  %v1047_v27 = vadd.f32 %v6692_v58, %v261_v26 }
 0x285   :  { %4438 = vrot.lane.b32.xlu1 %v6686_v17, %s4673_s23 }
 0x286   :  { %v5497_v15 = vpop.permute.xlu0 %2231 }
 0x287   :  { %v5502_v22 = vpop.permute.xlu1 %4398 }
 0x288   :  { %v4400_v54 = vunpack.i.l.bf16 %v5502_v22  ;;  %2420 = vrot.lane.b32.xlu0 %v2415_v14, %s4674_s26 }
 0x289   :  { %3016 = vrot.lane.b32.xlu1 %v3009_v33, %s4677_s3  ;;  %v2414_v33 = vrot.slane %v5158_v63, 2  ;;  %v6695_v63 = vsel %vm5426_vm11, %v5436_v30, %v5432_v39 }
 0x28a   :  { %v5529_v28 = vsel %vm2209_vm10, %v4396_v44, %v4400_v54  ;;  %v2540_v45 = vsel %vm5426_vm11, %v2532_v59, %v4400_v54  ;;  %v2780_v23 = vpop.permute.xlu0 %2779  ;;  %v2037_v54 = vmax.f32 %v1047_v27, 0.0  ;;  %v2465_v59 = vrot.slane %v5400_v46, 1  ;;  %v6698_v27 = vld [vmem:[#allocation10_spill] sm:$0xff] }
 0x28b   :  { %v2539_v31 = vsel %vm5426_vm11, %v5524_v12, %v5529_v28  ;;  %v2784_v47 = vpop.permute.xlu1 %2783  ;;  %v2786_v5 = vsel %vm2233_vm15, %v2780_v23, %v2782_v13 }
 0x28c   :  { %2424 = vrot.lane.b32.xlu0 %v6689_v62, %s4674_s26  ;;  %v5549_v57 = vsel %vm2534_vm7, %v3048_v8, %v2784_v47  ;;  %v2787_v0 = vsel %vm2233_vm15, %v2782_v13, %v2784_v47  ;;  %v6694_v8 = vpack.i.bf16 %v5199_v40, %v6693_v42  ;;  %v5572_v26 = vsel %vm2534_vm7, %v6695_v63, %v2786_v5 }
 0x28d   :  { %2422 = vrot.lane.b32.xlu1 %v2416_v29, %s4674_s26  ;;  %v5575_v13 = vsel %vm2534_vm7, %v3047_v20, %v2787_v0  ;;  %v6696_v29 = vld [vmem:[#allocation11_spill] sm:$0xff]  ;;  %v6697_v20 = vpack.i.bf16 %v5226_v34, %v5231_v2  ;;  %v5600_v62 = vpack.c.bf16 %v2037_v54, %v2037_v54  ;;  %v2466_v5 = vrot.slane %v5407_v3, 1 }
 0x28e   :  { %v5551_v17 = vpop.permute.xlu0 %2799  ;;  %v2062_v47 = vmax.f32 %v6696_v29, 0.0  ;;  %v2711_v3 = vsel %vm2157_vm5, %v5316_v53, %v5334_v18  ;;  %v2464_v29 = vrot.slane %v5201_v41, 1  ;;  %v2756_v53 = vsel %vm2209_vm10, %v5410_v60, %v5402_v55 }
 0x28f   :  { %v3068_v38 = vsel %vm5542_vm14, %v5549_v57, %v5551_v17  ;;  %v2796_v14 = vpop.permute.xlu1 %2795  ;;  %v2686_v2 = vshrl.u32 %v5600_v62, 16  ;;  %v2556_v41 = vsel %vm2534_vm7, %v2540_v45, %v5497_v15 }
 0x290   :  { %4443 = vrot.lane.b32.xlu0 %v6694_v8, %s4675_s27  ;;  %v5606_v42 = vpack.c.bf16 %v2062_v47, %v2062_v47  ;;  %v6699_v8 = vrot.slane %v5233_v7, 1  ;;  %v4390_v47 = vunpack.i.l.bf16 %v5365_v21  ;;  %v2801_v60 = vsel %vm2261_vm1, %v5477_v19, %v2796_v14 }
 0x291   :  { %2418 = vrot.lane.b32.xlu1 %v2414_v33, %s4674_s26  ;;  %v2063_v33 = vmax.f32 %v6698_v27, 0.0  ;;  %v3025_v18 = vsel %vm5330_vm6, %v2686_v2, %v2711_v3  ;;  %v4401_v2 = vunpack.i.h.bf16 %v5502_v22 }
 0x292   :  { %v2798_v36 = vpop.permute.xlu0 %2797  ;;  %v2855_v7 = vshrl.u32 %v5606_v42, 16 }
 0x293   :  { %v5578_v40 = vsel %vm2261_vm1, %v2796_v14, %v2798_v36  ;;  %v5582_v61 = vsel %vm2261_vm1, %v2798_v36, %v5551_v17  ;;  %v5584_v46 = vpop.permute.xlu1 %2277  ;;  %v5615_v54 = vpack.c.bf16 %v2063_v33, %v2063_v33  ;;  %v6701_v33 = vpack.i.bf16 %v5262_v43, %v5260_v37 }
 0x294   :  { %v3066_v39 = vsel %vm5542_vm14, %v5572_v26, %v5578_v40  ;;  %v3067_v30 = vsel %vm5542_vm14, %v5575_v13, %v5582_v61  ;;  %2470 = vrot.lane.b32.xlu0 %v2465_v59, %s4676_s12  ;;  %v6700_v59 = vld [vmem:[#allocation12_spill] sm:$0xff]  ;;  %v2785_v37 = vsel %vm2233_vm15, %v5479_v49, %v2780_v23  ;;  %v2236_v23 = vsel %vm2233_vm15, %v5452_v51, %v5497_v15 }
 0x295   :  { %4448 = vrot.lane.b32.xlu1 %v6697_v20, %s4675_s27  ;;  %v2064_v36 = vmax.f32 %v6700_v59, 0.0  ;;  %v2740_v20 = vsel %vm6661_vm9, %v5394_v25, %v5398_v9  ;;  %v4386_v25 = vunpack.i.h.bf16 %v5354_v56  ;;  %v6702_v59 = vpack.i.bf16 %v5268_v6, %v5265_v50 }
 0x296   :  { %v5602_v58 = vpop.permute.xlu0 %2279  ;;  %v3031_v55 = vsel %vm2510_vm3, %v3025_v18, %v2740_v20  ;;  %v5684_v15 = vsel %vm2534_vm7, %v2539_v31, %v2236_v23  ;;  %v2859_v22 = vshrl.u32 %v5615_v54, 16  ;;  %v2857_v20 = vrot.slane %v2855_v7, 4 }
 0x297   :  { %v2823_v0 = vpop.permute.xlu1 %2822  ;;  %v2158_v56 = vsel %vm2157_vm5, %v4386_v25, %v4390_v47  ;;  %v3045_v49 = vsel %vm5426_vm11, %v3031_v55, %v2756_v53  ;;  %v2326_v25 = vrot.slane %v5615_v54, 4  ;;  %v2235_v26 = vsel %vm2233_vm15, %v5486_v11, %v5452_v51 }
 0x298   :  { %2474 = vrot.lane.b32.xlu0 %v6699_v8, %s4676_s12  ;;  %v3051_v19 = vsel %vm2534_vm7, %v3045_v49, %v2785_v37  ;;  %v2325_v37 = vrot.slane %v5606_v42, 4 }
 0x299   :  { %2472 = vrot.lane.b32.xlu1 %v2466_v5, %s4676_s12  ;;  %v3065_v50 = vsel %vm5542_vm14, %v3051_v19, %v2801_v60  ;;  %v2861_v60 = vrot.slane %v2859_v22, 4  ;;  %v6706_v22 = vld [vmem:[#allocation16_spill] sm:$0xff] }
 0x29a   :  { %v5613_v34 = vpop.permute.xlu0 %2824 }
 0x29b   :  { %v5621_v63 = vpop.permute.xlu1 %4403  ;;  %v2830_v8 = vsel %vm1008_vm2, %v2823_v0, %v5613_v34  ;;  %v5687_v0 = vpack.c.bf16 %v2064_v36, %v2064_v36  ;;  %v2182_v36 = vsel %vm6661_vm9, %v5371_v32, %v5386_v4 }
 0x29c   :  { %v4405_v27 = vunpack.i.l.bf16 %v5621_v63  ;;  %4453 = vrot.lane.b32.xlu0 %v6701_v33, %s4677_s3  ;;  %v3071_v12 = vsel %vm2558_vm12, %v3065_v50, %v2830_v8  ;;  %v2513_v33 = vsel %vm5330_vm6, %v5600_v62, %v2158_v56  ;;  %v4406_v49 = vunpack.i.h.bf16 %v5621_v63 }
 0x29d   :  { %2468 = vrot.lane.b32.xlu1 %v2464_v29, %s4676_s12  ;;  %v2863_v32 = vshrl.u32 %v5687_v0, 16  ;;  %v2327_v62 = vrot.slane %v5687_v0, 4  ;;  %v2520_v56 = vsel %vm2510_vm3, %v2513_v33, %v2182_v36  ;;  %v6705_v8 = vunpack.i.h.bf16 %v5365_v21 }
 0x29e   :  { %v5645_v43 = vpop.permute.xlu0 %4408  ;;  %v5649_v9 = vsel %vm5542_vm14, %v2556_v41, %v4405_v27 }
 0x29f   :  { %v4411_v45 = vunpack.i.h.bf16 %v5645_v43  ;;  %v2842_v5 = vpop.permute.xlu1 %2841  ;;  %v4410_v41 = vunpack.i.l.bf16 %v5645_v43  ;;  %v2866_v43 = vshrl.u32 %v5085_v48, 16 }
 0x2a1   :  { %v5666_v14 = vsel %vm2261_vm1, %v4411_v45, %v4405_v27  ;;  %4458 = vrot.lane.b32.xlu1 %v6702_v59, %s4677_s3  ;;  %v4395_v27 = vunpack.i.l.bf16 %v5448_v24  ;;  %v2183_v59 = vsel %vm6661_vm9, %v5386_v4, %v5414_v52  ;;  %v2234_v4 = vsel %vm2233_vm15, %v5471_v1, %v5486_v11 }
 0x2a2   :  { %v2840_v6 = vpop.permute.xlu0 %2839  ;;  %v2563_v29 = vsel %vm5542_vm14, %v5684_v15, %v5666_v14  ;;  %v2262_v15 = vsel %vm2261_vm1, %v4406_v49, %v4410_v41  ;;  %v2263_v50 = vsel %vm2261_vm1, %v4410_v41, %v4411_v45 }
 0x2a3   :  { %v2847_v28 = vsel %vm2313_vm13, %v2840_v6, %v2842_v5  ;;  %v2282_v31 = vpop.permute.xlu1 %2281  ;;  %v2210_v7 = vsel %vm2209_vm10, %v4401_v2, %v4395_v27  ;;  %v2159_v2 = vsel %vm2157_vm5, %v4390_v47, %v6705_v8  ;;  %v2865_v47 = vrot.slane %v2863_v32, 4 }
 0x2a4   :  { %v3085_v53 = vsel %vm5674_vm0, %v3071_v12, %v2847_v28  ;;  %v2537_v19 = vsel %vm5426_vm11, %v2520_v56, %v2210_v7  ;;  %v2514_v0 = vsel %vm5330_vm6, %v6706_v22, %v2159_v2  ;;  %v2287_v51 = vsel %vm1008_vm2, %v5602_v58, %v2282_v31 }
 0x2a5   :  { %v5709_v18 = vsel %vm2582_vm4, %v3085_v53, %v2857_v20  ;;  %v2544_v24 = vsel %vm2534_vm7, %v2537_v19, %v2234_v4  ;;  %v2524_v1 = vsel %vm2510_vm3, %v2514_v0, %v2183_v59  ;;  %vm2606_vm6 = vcmask 1044480  }
 0x2a6   :  { %v2844_v55 = vpop.permute.xlu0 %2843  ;;  %v2561_v6 = vsel %vm5542_vm14, %v2544_v24, %v2262_v15  ;;  %v2286_v20 = vsel %vm1008_vm2, %v5584_v46, %v5602_v58  ;;  %vm2630_vm3 = vcmask 1045504  }
 0x2a7   :  { %v2827_v23 = vpop.permute.xlu1 %2826  ;;  %v2848_v63 = vsel %vm2313_vm13, %v2842_v5, %v2844_v55  ;;  %v2568_v53 = vsel %vm2558_vm12, %v2561_v6, %v2286_v20 }
 0x2a8   :  { %v2831_v14 = vsel %vm1008_vm2, %v5613_v34, %v2827_v23  ;;  %v2211_v34 = vsel %vm2209_vm10, %v4395_v27, %v4396_v44 }
 0x2a9   :  { %v3075_v21 = vsel %vm2558_vm12, %v3066_v39, %v2831_v14  ;;  %v2868_v39 = vrot.slane %v2866_v43, 4  ;;  %v2538_v16 = vsel %vm5426_vm11, %v2524_v1, %v2211_v34 }
 0x2aa   :  { %v3086_v52 = vsel %vm5674_vm0, %v3075_v21, %v2848_v63  ;;  %v2284_v5 = vpop.permute.xlu0 %2283  ;;  %v2548_v11 = vsel %vm2534_vm7, %v2538_v16, %v2235_v26  ;;  %vm2631_vm7 = vsmask.f32 5376 }
 0x2ab   :  { %v2829_v40 = vpop.permute.xlu1 %2828  ;;  %v5752_v44 = vsel %vm2582_vm4, %v3086_v52, %v2861_v60  ;;  %v2288_v27 = vsel %vm1008_vm2, %v2282_v31, %v2284_v5  ;;  %v2562_v35 = vsel %vm5542_vm14, %v2548_v11, %v2263_v50  ;;  %v2580_v41 = vsel %vm2558_vm12, %v5649_v9, %v2284_v5  ;;  %vm5838_vm11 = vmand %vm2630_vm3, %vm2631_vm7 }
 0x2ac   :  { %v2832_v45 = vsel %vm1008_vm2, %v2827_v23, %v2829_v40  ;;  %v2572_v7 = vsel %vm2558_vm12, %v2562_v35, %v2287_v51  ;;  %v2576_v58 = vsel %vm2558_vm12, %v2563_v29, %v2288_v27  ;;  %v3083_v60 = vsel %vm2558_vm12, %v3068_v38, %v2829_v40 }
 0x2ad   :  { %v3079_v31 = vsel %vm2558_vm12, %v3067_v30, %v2832_v45  ;;  %vm2654_vm12 = vcmask 1046528   ;;  %vm2655_vm14 = vsmask.f32 6400  ;;  %vm2678_vm7 = vcmask 1047552  }
 0x2ae   :  { %v4414_v12 = vpop.permute.xlu0 %4413 }
 0x2af   :  { %v4416_v28 = vunpack.i.h.bf16 %v4414_v12  ;;  %v4415_v36 = vunpack.i.l.bf16 %v4414_v12  ;;  %v4419_v33 = vpop.permute.xlu1 %4418 }
 0x2b0   :  { %v4421_v32 = vunpack.i.h.bf16 %v4419_v33  ;;  %v4420_v46 = vunpack.i.l.bf16 %v4419_v33 }
 0x2b1   :  { %v2315_v9 = vsel %vm2313_vm13, %v4415_v36, %v4416_v28 }
 0x2b2   :  { %v2586_v56 = vsel %vm5674_vm0, %v2572_v7, %v2315_v9  ;;  %v2314_v29 = vsel %vm2313_vm13, %v4421_v32, %v4415_v36  ;;  %v2316_v49 = vsel %vm2313_vm13, %v4416_v28, %v4420_v46  ;;  %v5794_v13 = vsel %vm5674_vm0, %v2580_v41, %v4420_v46  ;;  %v2846_v61 = vpop.permute.xlu0 %2845 }
 0x2b3   :  { %v2585_v10 = vsel %vm5674_vm0, %v2568_v53, %v2314_v29  ;;  %v2587_v57 = vsel %vm5674_vm0, %v2576_v58, %v2316_v49  ;;  %v2849_v17 = vsel %vm2313_vm13, %v2844_v55, %v2846_v61  ;;  %v3088_v38 = vsel %vm5674_vm0, %v3083_v60, %v2846_v61  ;;  %v2875_v30 = vpop.permute.xlu1 %2874  ;;  %v6048_v53 = vld [vmem:[%s6639_s5] sm:$0xff] }
 0x2b4   :  { %v3087_v23 = vsel %vm5674_vm0, %v3079_v31, %v2849_v17  ;;  %v3103_v43 = vsel %vm2582_vm4, %v3088_v38, %v2868_v39  ;;  %v5809_v8 = vsel %vm2582_vm4, %v2586_v56, %v2326_v25  ;;  %v5812_v2 = vsel %vm2582_vm4, %v2587_v57, %v2327_v62  ;;  %vm5822_vm0 = vmand %vm2606_vm6, %vm2607_vm8 }
 0x2b5   :  { %v3099_v19 = vsel %vm2582_vm4, %v3087_v23, %v2865_v47  ;;  %v5818_v55 = vsel %vm2582_vm4, %v2585_v10, %v2325_v37  ;;  %vm5856_vm8 = vmand %vm2654_vm12, %vm2655_vm14  ;;  %vm2679_vm14 = vsmask.f32 7424 }
 0x2b6   :  { %v2877_v54 = vpop.permute.xlu0 %2876 }
 0x2b7   :  { %v2879_v14 = vpop.permute.xlu1 %2878  ;;  %v2882_v58 = vsel %vm2157_vm5, %v2875_v30, %v2877_v54 }
 0x2b8   :  { %v2883_v25 = vsel %vm2157_vm5, %v2877_v54, %v2879_v14  ;;  %v3105_v10 = vsel %vm5822_vm0, %v5709_v18, %v2882_v58  ;;  %v6052_v18 = vcombine.high %v6048_v53, %v6048_v53 }
 0x2b9   :  { %v3106_v62 = vsel %vm5822_vm0, %v5752_v44, %v2883_v25 }
 0x2ba   :  { %v2904_v59 = vpop.permute.xlu0 %2903  ;;  %4322 = vmatprep.mubr.msk.bf16.mxu0 %vm2313_vm13, %v6052_v18  ;;  %4323 = vmatprep.mubr.msk.bf16.mxu1 %vm2313_vm13, %v6052_v18 }
 0x2bb   :  { %v2881_v15 = vpop.permute.xlu1 %2880 }
 0x2bc   :  { %v2884_v42 = vsel %vm2157_vm5, %v2879_v14, %v2881_v15  ;;  %v3108_v37 = vsel %vm5822_vm0, %v3103_v43, %v2881_v15 }
 0x2bd   :  { %v3107_v63 = vsel %vm5822_vm0, %v3099_v19, %v2884_v42 }
 0x2be   :  { %v2922_v21 = vpop.permute.xlu0 %2921 }
 0x2bf   :  { %v2920_v47 = vpop.permute.xlu1 %2919 }
 0x2c0   :  { %v2927_v23 = vsel %vm2209_vm10, %v2920_v47, %v2922_v21 }
 0x2c2   :  { %v2910_v34 = vpop.permute.xlu0 %2909 }
 0x2c3   :  { %v2906_v4 = vpop.permute.xlu1 %2905  ;;  %v3123_v1 = vsel %vm2606_vm6, %v3108_v37, %v2910_v34 }
 0x2c4   :  { %v2911_v9 = vsel %vm6661_vm9, %v2904_v59, %v2906_v4 }
 0x2c5   :  { %v3111_v17 = vsel %vm2606_vm6, %v3105_v10, %v2911_v9 }
 0x2c6   :  { %v2908_v52 = vpop.permute.xlu0 %2907  ;;  %v3125_v19 = vsel %vm5838_vm11, %v3111_v17, %v2927_v23 }
 0x2c7   :  { %v2912_v5 = vsel %vm6661_vm9, %v2906_v4, %v2908_v52  ;;  %v2924_v22 = vpop.permute.xlu1 %2923  ;;  %v2913_v40 = vsel %vm6661_vm9, %v2908_v52, %v2910_v34  ;;  %vm5883_vm9 = vmand %vm2678_vm7, %vm2679_vm14  ;;  %v6715_v4 = vrot.slane %v5085_v48, 4  ;;  %vm6716_vm7 = vcmask 785408  }
 0x2c8   :  { %v3115_v0 = vsel %vm2606_vm6, %v3106_v62, %v2912_v5  ;;  %v2928_v24 = vsel %vm2209_vm10, %v2922_v21, %v2924_v22  ;;  %v3119_v6 = vsel %vm2606_vm6, %v3107_v63, %v2913_v40  ;;  %vm6717_vm14 = vmmov %vm6716_vm7 }
 0x2c9   :  { %v3126_v44 = vsel %vm5838_vm11, %v3115_v0, %v2928_v24  ;;  %v2604_v52 = vsel %vm2582_vm4, %v5794_v13, %v6715_v4 }
 0x2ca   :  { %v2949_v39 = vpop.permute.xlu0 %2948 }
 0x2cb   :  { %v2926_v50 = vpop.permute.xlu1 %2925 }
 0x2cc   :  { %v2929_v16 = vsel %vm2209_vm10, %v2924_v22, %v2926_v50  ;;  %v3128_v51 = vsel %vm5838_vm11, %v3123_v1, %v2926_v50 }
 0x2cd   :  { %v3127_v11 = vsel %vm5838_vm11, %v3119_v6, %v2929_v16 }
 0x2ce   :  { %v2953_v20 = vpop.permute.xlu0 %2952 }
 0x2cf   :  { %v2951_v27 = vpop.permute.xlu1 %2950 }
 0x2d0   :  { %v2957_v35 = vsel %vm2233_vm15, %v2951_v27, %v2953_v20  ;;  %v2956_v30 = vsel %vm2233_vm15, %v2949_v39, %v2951_v27 }
 0x2d1   :  { %v3135_v33 = vsel %vm2630_vm3, %v3126_v44, %v2957_v35  ;;  %v3131_v14 = vsel %vm2630_vm3, %v3125_v19, %v2956_v30 }
 0x2d2   :  { %v2967_v45 = vpop.permute.xlu0 %2966 }
 0x2d3   :  { %v2965_v12 = vpop.permute.xlu1 %2964 }
 0x2d4   :  { %v2972_v43 = vsel %vm2261_vm1, %v2965_v12, %v2967_v45 }
 0x2d5   :  { %v3145_v62 = vsel %vm5856_vm8, %v3131_v14, %v2972_v43 }
 0x2d6   :  { %v2955_v28 = vpop.permute.xlu0 %2954 }
 0x2d7   :  { %v2969_v36 = vpop.permute.xlu1 %2968  ;;  %v2958_v41 = vsel %vm2233_vm15, %v2953_v20, %v2955_v28  ;;  %v3143_v31 = vsel %vm2630_vm3, %v3128_v51, %v2955_v28 }
 0x2d8   :  { %v2973_v7 = vsel %vm2261_vm1, %v2967_v45, %v2969_v36  ;;  %v3139_v56 = vsel %vm2630_vm3, %v3127_v11, %v2958_v41 }
 0x2d9   :  { %v3146_v32 = vsel %vm5856_vm8, %v3135_v33, %v2973_v7 }
 0x2da   :  { %v2994_v46 = vpop.permute.xlu0 %2993 }
 0x2db   :  { %v2971_v60 = vpop.permute.xlu1 %2970 }
 0x2dc   :  { %v2974_v29 = vsel %vm2261_vm1, %v2969_v36, %v2971_v60  ;;  %v3148_v49 = vsel %vm5856_vm8, %v3143_v31, %v2971_v60 }
 0x2dd   :  { %v3147_v61 = vsel %vm5856_vm8, %v3139_v56, %v2974_v29 }
 0x2de   :  { %v3013_v57 = vpop.permute.xlu0 %3012 }
 0x2df   :  { %v3011_v38 = vpop.permute.xlu1 %3010 }
 0x2e0   :  { %v3018_v15 = vsel %vm2313_vm13, %v3011_v38, %v3013_v57 }
 0x2e2   :  { %v3000_v54 = vpop.permute.xlu0 %2999 }
 0x2e3   :  { %v2996_v25 = vpop.permute.xlu1 %2995  ;;  %v5927_v7 = vsel %vm2654_vm12, %v3148_v49, %v3000_v54 }
 0x2e4   :  { %v3001_v59 = vsel %vm1008_vm2, %v2994_v46, %v2996_v25 }
 0x2e5   :  { %v3151_v42 = vsel %vm2654_vm12, %v3145_v62, %v3001_v59 }
 0x2e6   :  { %v2998_v37 = vpop.permute.xlu0 %2997  ;;  %v3165_v63 = vsel %vm5883_vm9, %v3151_v42, %v3018_v15 }
 0x2e7   :  { %3173 = vrot.lane.b32.xlu0 %v3165_v63, %s4677_s3  ;;  %v5895_v21 = vpop.permute.xlu1 %4428  ;;  %v3002_v34 = vsel %vm1008_vm2, %v2996_v25, %v2998_v37  ;;  %v3003_v12 = vsel %vm1008_vm2, %v2998_v37, %v3000_v54 }
 0x2e8   :  { %v4430_v47 = vunpack.i.l.bf16 %v5895_v21  ;;  %v5909_v44 = vsel %vm2654_vm12, %v3146_v32, %v3002_v34  ;;  %v5938_v58 = vsel %vm2654_vm12, %v3147_v61, %v3003_v12 }
 0x2ea   :  { %v4424_v5 = vpop.permute.xlu0 %4423  ;;  %v2612_v22 = vsel %vm5822_vm0, %v2604_v52, %v4430_v47 }
 0x2eb   :  { %v4426_v0 = vunpack.i.h.bf16 %v4424_v5  ;;  %v3015_v24 = vpop.permute.xlu1 %3014  ;;  %v4425_v10 = vunpack.i.l.bf16 %v4424_v5 }
 0x2ec   :  { %v5906_v40 = vsel %vm2313_vm13, %v3013_v57, %v3015_v24 }
 0x2ed   :  { %v2355_v39 = vsel %vm2157_vm5, %v4426_v0, %v4430_v47  ;;  %v3166_v48 = vsel %vm5883_vm9, %v5909_v44, %v5906_v40  ;;  %v2354_v43 = vsel %vm2157_vm5, %v4425_v10, %v4426_v0  ;;  %v4431_v47 = vunpack.i.h.bf16 %v5895_v21 }
 0x2ee   :  { %v2371_v13 = vpop.permute.xlu0 %2370  ;;  %v2611_v1 = vsel %vm5822_vm0, %v5812_v2, %v2355_v39  ;;  %v2610_v34 = vsel %vm5822_vm0, %v5809_v8, %v2354_v43 }
 0x2ef   :  { %v2373_v50 = vpop.permute.xlu1 %2372  ;;  %v2353_v0 = vsel %vm2157_vm5, %v4431_v47, %v4425_v10  ;;  %vm3217_vm5 = vcmask 1039360  }
 0x2f0   :  { %v2377_v14 = vsel %vm6717_vm14, %v2371_v13, %v2373_v50 }
 0x2f1   :  { %v2620_v5 = vsel %vm2606_vm6, %v2610_v34, %v2377_v14 }
 0x2f2   :  { %v2375_v6 = vpop.permute.xlu0 %2374 }
 0x2f3   :  { %v2369_v16 = vpop.permute.xlu1 %2368  ;;  %v2378_v11 = vsel %vm6716_vm7, %v2373_v50, %v2375_v6  ;;  %v2628_v35 = vsel %vm2606_vm6, %v2612_v22, %v2375_v6 }
 0x2f4   :  { %v2624_v28 = vsel %vm2606_vm6, %v2611_v1, %v2378_v11  ;;  %v2376_v50 = vsel %vm6716_vm7, %v2369_v16, %v2371_v13 }
 0x2f6   :  { %v4434_v51 = vpop.permute.xlu0 %4433 }
 0x2f7   :  { %v4436_v20 = vunpack.i.h.bf16 %v4434_v51  ;;  %v4439_v27 = vpop.permute.xlu1 %4438  ;;  %v4435_v17 = vunpack.i.l.bf16 %v4434_v51 }
 0x2f8   :  { %v4440_v45 = vunpack.i.l.bf16 %v4439_v27  ;;  %v4441_v4 = vunpack.i.h.bf16 %v4439_v27 }
 0x2f9   :  { %v2404_v42 = vsel %vm2209_vm10, %v4435_v17, %v4436_v20 }
 0x2fa   :  { %v2405_v36 = vsel %vm2209_vm10, %v4436_v20, %v4440_v45  ;;  %v2421_v33 = vpop.permute.xlu0 %2420  ;;  %v2636_v2 = vsel %vm5838_vm11, %v2628_v35, %v4440_v45  ;;  %v2403_v20 = vsel %vm2209_vm10, %v4441_v4, %v4435_v17  ;;  %v2609_v45 = vsel %vm5822_vm0, %v5818_v55, %v2353_v0 }
 0x2fb   :  { %v5929_v41 = vpop.permute.xlu1 %3016  ;;  %v2635_v32 = vsel %vm5838_vm11, %v2624_v28, %v2405_v36  ;;  %v2616_v16 = vsel %vm2606_vm6, %v2609_v45, %v2376_v50  ;;  %vm3281_vm10 = vcmask 883712   ;;  %vm3377_vm6 = vcmask 719872  }
 0x2fc   :  { %v5935_v46 = vsel %vm2313_vm13, %v3015_v24, %v5929_v41  ;;  %v3168_v31 = vsel %vm5883_vm9, %v5927_v7, %v5929_v41  ;;  %v2634_v24 = vsel %vm5838_vm11, %v2620_v5, %v2404_v42  ;;  %vm3409_vm0 = vcmask 711680  }
 0x2fd   :  { %v3167_v60 = vsel %vm5883_vm9, %v5938_v58, %v5935_v46 }
 0x2fe   :  { %v2425_v9 = vpop.permute.xlu0 %2424 }
 0x2ff   :  { %v2423_v56 = vpop.permute.xlu1 %2422  ;;  %v2652_v19 = vsel %vm2630_vm3, %v2636_v2, %v2425_v9 }
 0x300   :  { %v2428_v61 = vsel %vm2233_vm15, %v2423_v56, %v2425_v9  ;;  %v2427_v52 = vsel %vm2233_vm15, %v2421_v33, %v2423_v56 }
 0x301   :  { %v2648_v25 = vsel %vm2630_vm3, %v2635_v32, %v2428_v61  ;;  %v2644_v8 = vsel %vm2630_vm3, %v2634_v24, %v2427_v52  ;;  %v2633_v32 = vsel %vm5838_vm11, %v2616_v16, %v2403_v20 }
 0x302   :  { %v4444_v29 = vpop.permute.xlu0 %4443 }
 0x303   :  { %v2419_v49 = vpop.permute.xlu1 %2418  ;;  %v4446_v30 = vunpack.i.h.bf16 %v4444_v29  ;;  %v4445_v54 = vunpack.i.l.bf16 %v4444_v29 }
 0x304   :  { %v2426_v12 = vsel %vm2233_vm15, %v2419_v49, %v2421_v33  ;;  %vm3313_vm15 = vcmask 875520  }
 0x305   :  { %v2454_v22 = vsel %vm2261_vm1, %v4445_v54, %v4446_v30  ;;  %v2640_v33 = vsel %vm2630_vm3, %v2633_v32, %v2426_v12  ;;  %vm3441_vm3 = vcmask 703488  }
 0x306   :  { %v2471_v57 = vpop.permute.xlu0 %2470  ;;  %v2658_v27 = vsel %vm5856_vm8, %v2644_v8, %v2454_v22 }
 0x307   :  { %v4449_v38 = vpop.permute.xlu1 %4448 }
 0x308   :  { %v4450_v23 = vunpack.i.l.bf16 %v4449_v38  ;;  %v4451_v39 = vunpack.i.h.bf16 %v4449_v38 }
 0x30a   :  { %v2455_v62 = vsel %vm2261_vm1, %v4446_v30, %v4450_v23  ;;  %v2475_v59 = vpop.permute.xlu0 %2474  ;;  %v2660_v15 = vsel %vm5856_vm8, %v2652_v19, %v4450_v23  ;;  %v2453_v28 = vsel %vm2261_vm1, %v4451_v39, %v4445_v54  ;;  %vm3345_vm1 = vcmask 867328  }
 0x30b   :  { %v2473_v37 = vpop.permute.xlu1 %2472  ;;  %v2659_v63 = vsel %vm5856_vm8, %v2648_v25, %v2455_v62  ;;  %v2676_v29 = vsel %vm2654_vm12, %v2660_v15, %v2475_v59  ;;  %v2657_v10 = vsel %vm5856_vm8, %v2640_v33, %v2453_v28  ;;  %v6718_v62 = vmov 0  }
 0x30c   :  { %v2477_v1 = vsel %vm1008_vm2, %v2471_v57, %v2473_v37  ;;  %v2478_v36 = vsel %vm1008_vm2, %v2473_v37, %v2475_v59  ;;  %v6194_v33 = vcombine.low %v6048_v53, %v6048_v53 }
 0x30d   :  { %v2668_v35 = vsel %vm2654_vm12, %v2658_v27, %v2477_v1  ;;  %v2672_v49 = vsel %vm2654_vm12, %v2659_v63, %v2478_v36 }
 0x30e   :  { %v4454_v21 = vpop.permute.xlu0 %4453 }
 0x30f   :  { %v4456_v6 = vunpack.i.h.bf16 %v4454_v21  ;;  %v4455_v51 = vunpack.i.l.bf16 %v4454_v21  ;;  %v2469_v11 = vpop.permute.xlu1 %2468 }
 0x310   :  { %v2476_v55 = vsel %vm1008_vm2, %v2469_v11, %v2471_v57 }
 0x311   :  { %v2504_v13 = vsel %vm2313_vm13, %v4455_v51, %v4456_v6  ;;  %v2664_v17 = vsel %vm2654_vm12, %v2657_v10, %v2476_v55 }
 0x312   :  { %v2682_v2 = vsel %vm5883_vm9, %v2668_v35, %v2504_v13 }
 0x313   :  { %3492 = vmatprep.subr.bf16.mxu0 %v2682_v2  ;;  %v4459_v3 = vpop.permute.xlu1 %4458 }
 0x314   :  { %v4461_v9 = vunpack.i.h.bf16 %v4459_v3  ;;  %v4460_v56 = vunpack.i.l.bf16 %v4459_v3 }
 0x316   :  { %v2503_v26 = vsel %vm2313_vm13, %v4461_v9, %v4455_v51  ;;  %v2505_v61 = vsel %vm2313_vm13, %v4456_v6, %v4460_v56  ;;  %v2684_v57 = vsel %vm5883_vm9, %v2676_v29, %v4460_v56  ;;  %v6207_v9 = vld [vmem:[#allocation4] sm:$0xff]  ;;  %v6213_v56 = vld [vmem:[#allocation4 + $0x8] sm:$0xff] }
 0x317   :  { %v2681_v38 = vsel %vm5883_vm9, %v2664_v17, %v2503_v26  ;;  %v2683_v30 = vsel %vm5883_vm9, %v2672_v49, %v2505_v61  ;;  %vm3249_vm9 = vcmask 1031168  }
 0x318   :  { %3233 = vrot.lane.b32.xlu1 %v2681_v38, %s4678_s4  ;;  %3201 = vrot.lane.b32.xlu0 %v2681_v38, %s4679_s16 }
 0x319   :  { %3493 = vmatpush1.bf16.msra.mxu0 %v2681_v38 }
 0x31c   :  { %3297 = vrot.lane.b32.xlu1 %v2681_v38, %s4680_s0  ;;  %3265 = vrot.lane.b32.xlu0 %v2681_v38, %s4681_s1 }
 0x320   :  { %3361 = vrot.lane.b32.xlu1 %v2681_v38, %s4682_s2  ;;  %3329 = vrot.lane.b32.xlu0 %v2681_v38, %s4683_s6 }
 0x324   :  { %3425 = vrot.lane.b32.xlu1 %v2681_v38, %s4684_s17  ;;  %3393 = vrot.lane.b32.xlu0 %v2681_v38, %s4685_s18 }
 0x328   :  { %3175 = vrot.lane.b32.xlu1 %v3166_v48, %s4677_s3  ;;  %3177 = vrot.lane.b32.xlu0 %v3167_v60, %s4677_s3 }
 0x32c   :  { %3179 = vrot.lane.b32.xlu1 %v3168_v31, %s4677_s3  ;;  %3203 = vrot.lane.b32.xlu0 %v2682_v2, %s4679_s16 }
 0x330   :  { %3235 = vrot.lane.b32.xlu1 %v2682_v2, %s4678_s4  ;;  %3267 = vrot.lane.b32.xlu0 %v2682_v2, %s4681_s1 }
 0x334   :  { %3299 = vrot.lane.b32.xlu1 %v2682_v2, %s4680_s0  ;;  %3331 = vrot.lane.b32.xlu0 %v2682_v2, %s4683_s6 }
 0x338   :  { %3363 = vrot.lane.b32.xlu1 %v2682_v2, %s4682_s2  ;;  %3395 = vrot.lane.b32.xlu0 %v2682_v2, %s4685_s18 }
 0x33c   :  { %3427 = vrot.lane.b32.xlu1 %v2682_v2, %s4684_s17  ;;  %3237 = vrot.lane.b32.xlu0 %v2683_v30, %s4678_s4 }
 0x340   :  { %3301 = vrot.lane.b32.xlu0 %v2683_v30, %s4680_s0  ;;  %3205 = vrot.lane.b32.xlu1 %v2683_v30, %s4679_s16 }
 0x344   :  { %3365 = vrot.lane.b32.xlu0 %v2683_v30, %s4682_s2  ;;  %3269 = vrot.lane.b32.xlu1 %v2683_v30, %s4681_s1 }
 0x348   :  { %3429 = vrot.lane.b32.xlu0 %v2683_v30, %s4684_s17  ;;  %3333 = vrot.lane.b32.xlu1 %v2683_v30, %s4683_s6 }
 0x34c   :  { %3397 = vrot.lane.b32.xlu1 %v2683_v30, %s4685_s18 }
 0x359   :  { %v3174_v40 = vpop.permute.xlu0 %3173 }
 0x35a   :  { %v3189_v44 = vsel %vm2313_vm13, %v2684_v57, %v3174_v40 }
 0x35b   :  { %3533 = vmatprep.subr.bf16.mxu1 %v3189_v44  ;;  %3207 = vrot.lane.b32.xlu0 %v3189_v44, %s4679_s16 }
 0x35c   :  { %3239 = vrot.lane.b32.xlu1 %v3189_v44, %s4678_s4  ;;  %3534 = vmatpush1.bf16.msra.mxu1 %v2683_v30 }
 0x35f   :  { %3271 = vrot.lane.b32.xlu0 %v3189_v44, %s4681_s1 }
 0x360   :  { %3303 = vrot.lane.b32.xlu1 %v3189_v44, %s4680_s0 }
 0x363   :  { %3335 = vrot.lane.b32.xlu0 %v3189_v44, %s4683_s6 }
 0x367   :  { %3367 = vrot.lane.b32.xlu0 %v3189_v44, %s4682_s2 }
 0x36b   :  { %3399 = vrot.lane.b32.xlu0 %v3189_v44, %s4685_s18 }
 0x36f   :  { %3431 = vrot.lane.b32.xlu0 %v3189_v44, %s4684_s17 }
 0x38a   :  { %v3234_v48 = vpop.permute.xlu1 %3233  ;;  %v3202_v7 = vpop.permute.xlu0 %3201 }
 0x38e   :  { %v6067_v41 = vpop.permute.xlu1 %3297  ;;  %v3266_v46 = vpop.permute.xlu0 %3265 }
 0x392   :  { %v6069_v58 = vpop.permute.xlu1 %3361  ;;  %v6071_v31 = vpop.permute.xlu0 %3329 }
 0x396   :  { %v6073_v60 = vpop.permute.xlu1 %3425  ;;  %v6075_v23 = vpop.permute.xlu0 %3393 }
 0x39a   :  { %v3176_v43 = vpop.permute.xlu1 %3175  ;;  %v3178_v19 = vpop.permute.xlu0 %3177 }
 0x39b   :  { %v6078_v54 = vsel %vm2313_vm13, %v3174_v40, %v3176_v43  ;;  %v6093_v37 = vsel %vm2313_vm13, %v3176_v43, %v3178_v19 }
 0x39c   :  { %3241 = vrot.lane.b32.xlu0 %v6078_v54, %s4678_s4  ;;  %3209 = vrot.lane.b32.xlu1 %v6078_v54, %s4679_s16 }
 0x39e   :  { %v3180_v14 = vpop.permute.xlu1 %3179  ;;  %v3204_v25 = vpop.permute.xlu0 %3203 }
 0x39f   :  { %v3183_v0 = vsel %vm2313_vm13, %v3178_v19, %v3180_v14  ;;  %v3218_v24 = vsel %vm3217_vm5, %v3202_v7, %v3204_v25 }
 0x3a0   :  { %3215 = vrot.lane.b32.xlu0 %v6718_v62, %s4679_s16  ;;  %3273 = vrot.lane.b32.xlu1 %v6078_v54, %s4681_s1  ;;  %v6124_v1 = vsel %vm1008_vm2, %v3183_v0, 0 }
 0x3a2   :  { %v3236_v59 = vpop.permute.xlu1 %3235  ;;  %v3268_v15 = vpop.permute.xlu0 %3267 }
 0x3a3   :  { %v3250_v50 = vsel %vm3249_vm9, %v3234_v48, %v3236_v59  ;;  %v3282_v51 = vsel %vm3281_vm10, %v3266_v46, %v3268_v15 }
 0x3a4   :  { %3305 = vrot.lane.b32.xlu0 %v6078_v54, %s4680_s0  ;;  %3337 = vrot.lane.b32.xlu1 %v6078_v54, %s4683_s6 }
 0x3a6   :  { %v3300_v42 = vpop.permute.xlu1 %3299  ;;  %v3332_v63 = vpop.permute.xlu0 %3331 }
 0x3a7   :  { %v3314_v27 = vsel %vm3313_vm15, %v6067_v41, %v3300_v42  ;;  %v3346_v35 = vsel %vm3345_vm1, %v6071_v31, %v3332_v63 }
 0x3a8   :  { %3211 = vrot.lane.b32.xlu0 %v6093_v37, %s4679_s16  ;;  %3369 = vrot.lane.b32.xlu1 %v6078_v54, %s4682_s2 }
 0x3aa   :  { %v3364_v47 = vpop.permute.xlu1 %3363  ;;  %v3396_v34 = vpop.permute.xlu0 %3395 }
 0x3ab   :  { %v3378_v28 = vsel %vm3377_vm6, %v6069_v58, %v3364_v47  ;;  %v3410_v32 = vsel %vm3409_vm0, %v6075_v23, %v3396_v34 }
 0x3ac   :  { %3243 = vrot.lane.b32.xlu0 %v6093_v37, %s4678_s4  ;;  %3401 = vrot.lane.b32.xlu1 %v6078_v54, %s4685_s18 }
 0x3ae   :  { %v6103_v4 = vpop.permute.xlu1 %3427  ;;  %v6111_v5 = vpop.permute.xlu0 %3237 }
 0x3af   :  { %v3251_v39 = vsel %vm3249_vm9, %v3236_v59, %v6111_v5  ;;  %v3442_v3 = vsel %vm3441_vm3, %v6073_v60, %v6103_v4 }
 0x3b0   :  { %3275 = vrot.lane.b32.xlu0 %v6093_v37, %s4681_s1  ;;  %3433 = vrot.lane.b32.xlu1 %v6078_v54, %s4684_s17 }
 0x3b2   :  { %v6109_v52 = vpop.permute.xlu1 %3205  ;;  %v6135_v6 = vpop.permute.xlu0 %3301 }
 0x3b3   :  { %v3219_v22 = vsel %vm3217_vm5, %v3204_v25, %v6109_v52  ;;  %v3315_v11 = vsel %vm3313_vm15, %v3300_v42, %v6135_v6 }
 0x3b4   :  { %3307 = vrot.lane.b32.xlu0 %v6093_v37, %s4680_s0  ;;  %3371 = vrot.lane.b32.xlu1 %v6093_v37, %s4682_s2 }
 0x3b5   :  { %3494 = vmatprep.subr.bf16.mxu0 %v3219_v22 }
 0x3b6   :  { %3495 = vmatpush1.bf16.msra.mxu0 %v3218_v24  ;;  %v6126_v21 = vpop.permute.xlu1 %3269  ;;  %v6154_v12 = vpop.permute.xlu0 %3365 }
 0x3b7   :  { %3496 = vmatprep.subr.bf16.mxu0 %v3251_v39  ;;  %v3283_v8 = vsel %vm3281_vm10, %v3268_v15, %v6126_v21  ;;  %v3379_v13 = vsel %vm3377_vm6, %v3364_v47, %v6154_v12 }
 0x3b8   :  { %3339 = vrot.lane.b32.xlu0 %v6093_v37, %s4683_s6  ;;  %3213 = vrot.lane.b32.xlu1 %v6124_v1, %s4679_s16 }
 0x3ba   :  { %3497 = vmatpush1.bf16.msra.mxu0 %v3250_v50  ;;  %v6144_v20 = vpop.permute.xlu1 %3333  ;;  %v6174_v2 = vpop.permute.xlu0 %3429 }
 0x3bb   :  { %3498 = vmatprep.subr.bf16.mxu0 %v3283_v8  ;;  %v3347_v45 = vsel %vm3345_vm1, %v3332_v63, %v6144_v20  ;;  %v3443_v55 = vsel %vm3441_vm3, %v6103_v4, %v6174_v2  ;;  %v6255_v8 = vld [vmem:[#allocation4 + $0x10] sm:$0xff] }
 0x3bc   :  { %3403 = vrot.lane.b32.xlu0 %v6093_v37, %s4685_s18  ;;  %3245 = vrot.lane.b32.xlu1 %v6124_v1, %s4678_s4 }
 0x3be   :  { %3499 = vmatpush1.bf16.msra.mxu0 %v3282_v51  ;;  %v6164_v16 = vpop.permute.xlu1 %3397 }
 0x3bf   :  { %3500 = vmatprep.subr.bf16.mxu0 %v3315_v11  ;;  %v3411_v36 = vsel %vm3409_vm0, %v3396_v34, %v6164_v16 }
 0x3c0   :  { %3373 = vrot.lane.b32.xlu0 %v6124_v1, %s4682_s2  ;;  %3277 = vrot.lane.b32.xlu1 %v6124_v1, %s4681_s1 }
 0x3c2   :  { %3501 = vmatpush1.bf16.msra.mxu0 %v3314_v27 }
 0x3c3   :  { %3502 = vmatprep.subr.bf16.mxu0 %v3347_v45 }
 0x3c4   :  { %3279 = vrot.lane.b32.xlu0 %v6718_v62, %s4681_s1  ;;  %3309 = vrot.lane.b32.xlu1 %v6124_v1, %s4680_s0 }
 0x3c6   :  { %3503 = vmatpush1.bf16.msra.mxu0 %v3346_v35 }
 0x3c7   :  { %3504 = vmatprep.subr.bf16.mxu0 %v3379_v13 }
 0x3c8   :  { %3437 = vrot.lane.b32.xlu0 %v6124_v1, %s4684_s17  ;;  %3341 = vrot.lane.b32.xlu1 %v6124_v1, %s4683_s6 }
 0x3ca   :  { %3505 = vmatpush1.bf16.msra.mxu0 %v3378_v28 }
 0x3cb   :  { %3506 = vmatprep.subr.bf16.mxu0 %v3411_v36 }
 0x3cc   :  { %3343 = vrot.lane.b32.xlu0 %v6718_v62, %s4683_s6  ;;  %3247 = vrot.lane.b32.xlu1 %v6718_v62, %s4678_s4 }
 0x3cd   :  { %v3208_v29 = vpop.permute.xlu0 %3207 }
 0x3ce   :  { %3507 = vmatpush1.bf16.msra.mxu0 %v3410_v32  ;;  %v3240_v26 = vpop.permute.xlu1 %3239  ;;  %v3220_v44 = vsel %vm3217_vm5, %v6109_v52, %v3208_v29 }
 0x3cf   :  { %3508 = vmatprep.subr.bf16.mxu0 %v3443_v55  ;;  %v3252_v46 = vsel %vm3249_vm9, %v6111_v5, %v3240_v26 }
 0x3d0   :  { %3407 = vrot.lane.b32.xlu0 %v6718_v62, %s4685_s18  ;;  %3405 = vrot.lane.b32.xlu1 %v6124_v1, %s4685_s18 }
 0x3d1   :  { %v3272_v49 = vpop.permute.xlu0 %3271 }
 0x3d2   :  { %3509 = vmatpush1.bf16.msra.mxu0 %v3442_v3  ;;  %v3304_v57 = vpop.permute.xlu1 %3303  ;;  %v3284_v23 = vsel %vm3281_vm10, %v6126_v21, %v3272_v49 }
 0x3d3   :  { %3574 = vmatprep.subr.bf16.mxu0 %v6093_v37  ;;  %v3316_v14 = vsel %vm3313_vm15, %v6135_v6, %v3304_v57 }
 0x3d4   :  { %3435 = vrot.lane.b32.xlu1 %v6093_v37, %s4684_s17  ;;  %3465 = vrot.lane.b32.xlu0 %v6207_v9, %s4677_s3 }
 0x3d5   :  { %3525 = vmatmul.mubr.bf16.vlgmr.msra.gmra.mrb[52].mxu0 %v6194_v33  ;;  %v3336_v10 = vpop.permute.xlu0 %3335 }
 0x3d6   :  { %3575 = vmatpush1.bf16.msra.mxu0 %v6078_v54  ;;  %4324 = vmatprep.mubr.msk.bf16.mxu0 %vm2313_vm13, %v6052_v18  ;;  %v3348_v42 = vsel %vm3345_vm1, %v6144_v20, %v3336_v10 }
 0x3d8   :  { %3311 = vrot.lane.b32.xlu1 %v6718_v62, %s4680_s0  ;;  %3469 = vrot.lane.b32.xlu0 %v6255_v8, %s4677_s3 }
 0x3d9   :  { %v3368_v17 = vpop.permute.xlu0 %3367 }
 0x3da   :  { %v3380_v34 = vsel %vm3377_vm6, %v6154_v12, %v3368_v17 }
 0x3dc   :  { %3375 = vrot.lane.b32.xlu1 %v6718_v62, %s4682_s2 }
 0x3dd   :  { %v3400_v61 = vpop.permute.xlu0 %3399 }
 0x3de   :  { %v3412_v22 = vsel %vm3409_vm0, %v6164_v16, %v3400_v61 }
 0x3e0   :  { %3439 = vrot.lane.b32.xlu1 %v6718_v62, %s4684_s17 }
 0x3e1   :  { %v3432_v38 = vpop.permute.xlu0 %3431 }
 0x3e2   :  { %v3444_v50 = vsel %vm3441_vm3, %v6174_v2, %v3432_v38 }
 0x3e4   :  { %3467 = vrot.lane.b32.xlu1 %v6213_v56, %s4677_s3 }
 0x40e   :  { %v3242_v30 = vpop.permute.xlu0 %3241  ;;  %v3210_v53 = vpop.permute.xlu1 %3209 }
 0x40f   :  { %v3221_v40 = vsel %vm3217_vm5, %v3208_v29, %v3210_v53  ;;  %v3253_v48 = vsel %vm3249_vm9, %v3240_v26, %v3242_v30  ;;  %v6278_v26 = vld [vmem:[#allocation4 + $0x18] sm:$0xff] }
 0x410   :  { %3535 = vmatprep.subr.bf16.mxu1 %v3221_v40  ;;  %3471 = vrot.lane.b32.xlu1 %v6278_v26, %s4677_s3 }
 0x411   :  { %3536 = vmatpush1.bf16.msra.mxu1 %v3220_v44 }
 0x412   :  { %v3216_v7 = vpop.permute.xlu0 %3215  ;;  %v3274_v41 = vpop.permute.xlu1 %3273  ;;  %3537 = vmatprep.subr.bf16.mxu1 %v3253_v48 }
 0x413   :  { %v3285_v58 = vsel %vm3281_vm10, %v3272_v49, %v3274_v41 }
 0x415   :  { %3538 = vmatpush1.bf16.msra.mxu1 %v3252_v46 }
 0x416   :  { %v3306_v31 = vpop.permute.xlu0 %3305  ;;  %v6224_v60 = vpop.permute.xlu1 %3337  ;;  %3539 = vmatprep.subr.bf16.mxu1 %v3285_v58 }
 0x417   :  { %v3317_v43 = vsel %vm3313_vm15, %v3304_v57, %v3306_v31  ;;  %v3349_v25 = vsel %vm3345_vm1, %v3336_v10, %v6224_v60 }
 0x419   :  { %3540 = vmatpush1.bf16.msra.mxu1 %v3284_v23 }
 0x41a   :  { %v3212_v19 = vpop.permute.xlu0 %3211  ;;  %v6229_v54 = vpop.permute.xlu1 %3369  ;;  %3541 = vmatprep.subr.bf16.mxu1 %v3317_v43 }
 0x41b   :  { %v3381_v37 = vsel %vm3377_vm6, %v3368_v17, %v6229_v54  ;;  %v3222_v21 = vsel %vm3217_vm5, %v3210_v53, %v3212_v19 }
 0x41d   :  { %3542 = vmatpush1.bf16.msra.mxu1 %v3316_v14 }
 0x41e   :  { %v3244_v59 = vpop.permute.xlu0 %3243  ;;  %v6235_v15 = vpop.permute.xlu1 %3401  ;;  %3543 = vmatprep.subr.bf16.mxu1 %v3349_v25 }
 0x41f   :  { %v3413_v4 = vsel %vm3409_vm0, %v3400_v61, %v6235_v15  ;;  %v3254_v20 = vsel %vm3249_vm9, %v3242_v30, %v3244_v59 }
 0x421   :  { %3544 = vmatpush1.bf16.msra.mxu1 %v3348_v42 }
 0x422   :  { %v3276_v63 = vpop.permute.xlu0 %3275  ;;  %v6241_v47 = vpop.permute.xlu1 %3433  ;;  %3545 = vmatprep.subr.bf16.mxu1 %v3381_v37 }
 0x423   :  { %v3445_v0 = vsel %vm3441_vm3, %v3432_v38, %v6241_v47  ;;  %v3286_v12 = vsel %vm3281_vm10, %v3274_v41, %v3276_v63 }
 0x425   :  { %3546 = vmatpush1.bf16.msra.mxu1 %v3380_v34 }
 0x426   :  { %v3372_v52 = vpop.permute.xlu1 %3371  ;;  %3547 = vmatprep.subr.bf16.mxu1 %v3413_v4  ;;  %v3308_v5 = vpop.permute.xlu0 %3307 }
 0x427   :  { %v3382_v49 = vsel %vm3377_vm6, %v6229_v54, %v3372_v52 }
 0x429   :  { %3548 = vmatpush1.bf16.msra.mxu1 %v3412_v22 }
 0x42a   :  { %v3214_v24 = vpop.permute.xlu1 %3213  ;;  %3549 = vmatprep.subr.bf16.mxu1 %v3445_v0  ;;  %v3340_v6 = vpop.permute.xlu0 %3339 }
 0x42b   :  { %v3223_v39 = vsel %vm3217_vm5, %v3212_v19, %v3214_v24  ;;  %v3224_v35 = vsel %vm3217_vm5, %v3214_v24, %v3216_v7  ;;  %v3350_v32 = vsel %vm3345_vm1, %v6224_v60, %v3340_v6 }
 0x42c   :  { %3576 = vmatprep.subr.bf16.mxu0 %v3223_v39 }
 0x42d   :  { %3550 = vmatpush1.bf16.msra.mxu1 %v3444_v50  ;;  %3577 = vmatpush1.bf16.msra.mxu0 %v3222_v21 }
 0x42e   :  { %v3246_v51 = vpop.permute.xlu1 %3245  ;;  %3615 = vmatprep.subr.bf16.mxu1 %v6718_v62  ;;  %v3404_v13 = vpop.permute.xlu0 %3403 }
 0x42f   :  { %v3255_v11 = vsel %vm3249_vm9, %v3244_v59, %v3246_v51  ;;  %v3414_v38 = vsel %vm3409_vm0, %v6235_v15, %v3404_v13 }
 0x430   :  { %3566 = vmatmul.mubr.bf16.vlgmr.msra.gmra.mrb[52].mxu1 %v6194_v33  ;;  %3578 = vmatprep.subr.bf16.mxu0 %v3255_v11 }
 0x431   :  { %3579 = vmatpush1.bf16.msra.mxu0 %v3254_v20  ;;  %3616 = vmatpush1.bf16.msra.mxu1 %v6124_v1  ;;  %v3318_v1 = vsel %vm3313_vm15, %v3306_v31, %v3308_v5 }
 0x432   :  { %v3278_v27 = vpop.permute.xlu1 %3277  ;;  %3617 = vmatprep.subr.bf16.mxu1 %v3216_v7  ;;  %4325 = vmatprep.mubr.msk.bf16.mxu1 %vm2313_vm13, %v6052_v18  ;;  %v3374_v36 = vpop.permute.xlu0 %3373 }
 0x433   :  { %v3287_v45 = vsel %vm3281_vm10, %v3276_v63, %v3278_v27  ;;  %v3383_v55 = vsel %vm3377_vm6, %v3372_v52, %v3374_v36 }
 0x434   :  { %3580 = vmatprep.subr.bf16.mxu0 %v3287_v45 }
 0x435   :  { %3581 = vmatpush1.bf16.msra.mxu0 %v3286_v12  ;;  %3618 = vmatpush1.bf16.msra.mxu1 %v3224_v35 }
 0x436   :  { %v3310_v16 = vpop.permute.xlu1 %3309  ;;  %v3280_v10 = vpop.permute.xlu0 %3279 }
 0x437   :  { %v3319_v28 = vsel %vm3313_vm15, %v3308_v5, %v3310_v16  ;;  %v3288_v61 = vsel %vm3281_vm10, %v3278_v27, %v3280_v10 }
 0x438   :  { %3582 = vmatprep.subr.bf16.mxu0 %v3319_v28 }
 0x439   :  { %3583 = vmatpush1.bf16.msra.mxu0 %v3318_v1 }
 0x43a   :  { %v3342_v2 = vpop.permute.xlu1 %3341  ;;  %v3438_v30 = vpop.permute.xlu0 %3437 }
 0x43b   :  { %v3351_v18 = vsel %vm3345_vm1, %v3340_v6, %v3342_v2 }
 0x43c   :  { %3584 = vmatprep.subr.bf16.mxu0 %v3351_v18 }
 0x43d   :  { %3585 = vmatpush1.bf16.msra.mxu0 %v3350_v32 }
 0x43e   :  { %3586 = vmatprep.subr.bf16.mxu0 %v3383_v55  ;;  %v3248_v3 = vpop.permute.xlu1 %3247  ;;  %v3344_v41 = vpop.permute.xlu0 %3343 }
 0x43f   :  { %v3256_v29 = vsel %vm3249_vm9, %v3246_v51, %v3248_v3  ;;  %3619 = vmatprep.subr.bf16.mxu1 %v3248_v3  ;;  %v3352_v46 = vsel %vm3345_vm1, %v3342_v2, %v3344_v41 }
 0x440   :  { %3620 = vmatpush1.bf16.msra.mxu1 %v3256_v29 }
 0x441   :  { %3587 = vmatpush1.bf16.msra.mxu0 %v3382_v49  ;;  %3621 = vmatprep.subr.bf16.mxu1 %v3280_v10 }
 0x442   :  { %v3406_v17 = vpop.permute.xlu1 %3405  ;;  %v3408_v60 = vpop.permute.xlu0 %3407 }
 0x443   :  { %v3415_v57 = vsel %vm3409_vm0, %v3404_v13, %v3406_v17  ;;  %v3416_v23 = vsel %vm3409_vm0, %v3406_v17, %v3408_v60 }
 0x444   :  { %3588 = vmatprep.subr.bf16.mxu0 %v3415_v57  ;;  %3622 = vmatpush1.bf16.msra.mxu1 %v3288_v61 }
 0x445   :  { %3589 = vmatpush1.bf16.msra.mxu0 %v3414_v38 }
 0x446   :  { %v3436_v53 = vpop.permute.xlu1 %3435 }
 0x447   :  { %v3446_v40 = vsel %vm3441_vm3, %v6241_v47, %v3436_v53  ;;  %v3447_v44 = vsel %vm3441_vm3, %v3436_v53, %v3438_v30 }
 0x448   :  { %3590 = vmatprep.subr.bf16.mxu0 %v3447_v44 }
 0x449   :  { %3591 = vmatpush1.bf16.msra.mxu0 %v3446_v40 }
 0x44a   :  { %v3312_v48 = vpop.permute.xlu1 %3311 }
 0x44b   :  { %v3320_v7 = vsel %vm3313_vm15, %v3310_v16, %v3312_v48  ;;  %3623 = vmatprep.subr.bf16.mxu1 %v3312_v48 }
 0x44c   :  { %3607 = vmatmul.mubr.bf16.vlgmr.msra.gmra.mrb[56].mxu0 %v6194_v33  ;;  %3624 = vmatpush1.bf16.msra.mxu1 %v3320_v7 }
 0x44d   :  { %3625 = vmatprep.subr.bf16.mxu1 %v3344_v41  ;;  %4040 = vmatprep.mubr.bf16.mxu0 %v6718_v62 }
 0x44e   :  { %v3376_v58 = vpop.permute.xlu1 %3375 }
 0x44f   :  { %v3384_v31 = vsel %vm3377_vm6, %v3374_v36, %v3376_v58 }
 0x450   :  { %3626 = vmatpush1.bf16.msra.mxu1 %v3352_v46 }
 0x451   :  { %3627 = vmatprep.subr.bf16.mxu1 %v3376_v58 }
 0x452   :  { %v3440_v43 = vpop.permute.xlu1 %3439 }
 0x453   :  { %v3448_v19 = vsel %vm3441_vm3, %v3438_v30, %v3440_v43 }
 0x454   :  { %3628 = vmatpush1.bf16.msra.mxu1 %v3384_v31 }
 0x455   :  { %3629 = vmatprep.subr.bf16.mxu1 %v3408_v60 }
 0x456   :  { %v3468_v21 = vpop.permute.xlu1 %3467 }
 0x458   :  { %3630 = vmatpush1.bf16.msra.mxu1 %v3416_v23 }
 0x459   :  { %3631 = vmatprep.subr.bf16.mxu1 %v3440_v43 }
 0x45c   :  { %3632 = vmatpush1.bf16.msra.mxu1 %v3448_v19 }
 0x45f   :  { %3648 = vmatmul.mubr.bf16.vlgmr.msra.gmra.mrb[56].mxu1 %v6194_v33 }
 0x460   :  { %4081 = vmatprep.mubr.bf16.mxu1 %v6718_v62 }
 0x4a8   :  { %v3526_v54 = vpop.f32.mrb[52].mxu0 }
 0x4a9   :  { %v3527_v14 = vadd.f32 %v3526_v54, %v6207_v9  ;;  %v3528_v25 = vpop.f32.mrb[53].mxu0  ;;  %v3977_v54 = vld [vmem:[%s6642_s8] sm:$0x7] }
 0x4aa   :  { %v3529_v59 = vadd.f32 %v3528_v25, %v6213_v56  ;;  %v3530_v15 = vpop.f32.mrb[54].mxu0  ;;  %v3466_v56 = vpop.permute.xlu0 %3465 }
 0x4ab   :  { %v6300_v42 = vpack.c.bf16 %v3527_v14, %v3527_v14  ;;  %v3531_v37 = vpop.f32.mrb[55].mxu0  ;;  %v3480_v47 = vsel %vm2313_vm13, %v6278_v26, %v3466_v56  ;;  %v3473_v6 = vsel %vm2313_vm13, %v3466_v56, %v3468_v21 }
 0x4ac   :  { %v6302_v63 = vpack.c.bf16 %v3529_v59, %v3529_v59 }
 0x4ad   :  { %3703 = vrot.lane.b32.xlu1 %v6300_v42, %s4678_s4  ;;  %v3672_v33 = vrot.slane %v6300_v42, 4 }
 0x4ae   :  { %3843 = vrot.lane.b32.xlu0 %v6302_v63, %s4684_s17  ;;  %v3673_v9 = vrot.slane %v6302_v63, 4  ;;  %v3470_v16 = vpop.permute.xlu0 %3469 }
 0x4af   :  { %v3474_v32 = vsel %vm2313_vm13, %v3468_v21, %v3470_v16 }
 0x4b1   :  { %3749 = vrot.lane.b32.xlu1 %v6300_v42, %s4680_s0 }
 0x4b2   :  { %3680 = vrot.lane.b32.xlu0 %v3672_v33, %s4679_s16 }
 0x4b5   :  { %3795 = vrot.lane.b32.xlu1 %v6300_v42, %s4682_s2 }
 0x4b6   :  { %3726 = vrot.lane.b32.xlu0 %v3672_v33, %s4681_s1 }
 0x4b9   :  { %3841 = vrot.lane.b32.xlu1 %v6300_v42, %s4684_s17 }
 0x4ba   :  { %3772 = vrot.lane.b32.xlu0 %v3672_v33, %s4683_s6 }
 0x4bd   :  { %3705 = vrot.lane.b32.xlu1 %v6302_v63, %s4678_s4 }
 0x4be   :  { %3818 = vrot.lane.b32.xlu0 %v3672_v33, %s4685_s18 }
 0x4c1   :  { %3751 = vrot.lane.b32.xlu1 %v6302_v63, %s4680_s0 }
 0x4c2   :  { %3682 = vrot.lane.b32.xlu0 %v3673_v9, %s4679_s16 }
 0x4c5   :  { %3797 = vrot.lane.b32.xlu1 %v6302_v63, %s4682_s2 }
 0x4c9   :  { %3728 = vrot.lane.b32.xlu1 %v3673_v9, %s4681_s1 }
 0x4cd   :  { %3774 = vrot.lane.b32.xlu1 %v3673_v9, %s4683_s6 }
 0x4d1   :  { %3820 = vrot.lane.b32.xlu1 %v3673_v9, %s4685_s18 }
 0x503   :  { %v3567_v34 = vpop.f32.mrb[52].mxu1 }
 0x504   :  { %v3568_v4 = vadd.f32 %v3567_v34, %v6255_v8  ;;  %v3569_v52 = vpop.f32.mrb[53].mxu1  ;;  %v3472_v8 = vpop.permute.xlu1 %3471 }
 0x505   :  { %v3570_v5 = vadd.f32 %v3569_v52, %v3480_v47  ;;  %v3571_v22 = vpop.f32.mrb[54].mxu1  ;;  %v3475_v57 = vsel %vm2313_vm13, %v3470_v16, %v3472_v8  ;;  %vm6720_vm13 = vmmov 0  }
 0x506   :  { %v6333_v0 = vpack.c.bf16 %v3568_v4, %v3568_v4  ;;  %v3572_v24 = vpop.f32.mrb[55].mxu1  ;;  %v3481_v38 = vsel %vm1008_vm2, %v3475_v57, 0.0  ;;  %vm3983_vm2 = vcmask 588800  }
 0x507   :  { %v6335_v39 = vpack.c.bf16 %v3570_v5, %v3570_v5 }
 0x508   :  { %3845 = vrot.lane.b32.xlu1 %v6333_v0, %s4684_s17  ;;  %3707 = vrot.lane.b32.xlu0 %v6333_v0, %s4678_s4  ;;  %v3674_v50 = vrot.slane %v6333_v0, 4 }
 0x509   :  { %v3675_v28 = vrot.slane %v6335_v39, 4 }
 0x50c   :  { %3709 = vrot.lane.b32.xlu1 %v6335_v39, %s4678_s4  ;;  %3753 = vrot.lane.b32.xlu0 %v6333_v0, %s4680_s0 }
 0x510   :  { %3755 = vrot.lane.b32.xlu1 %v6335_v39, %s4680_s0  ;;  %3799 = vrot.lane.b32.xlu0 %v6333_v0, %s4682_s2 }
 0x514   :  { %3801 = vrot.lane.b32.xlu1 %v6335_v39, %s4682_s2  ;;  %3847 = vrot.lane.b32.xlu0 %v6335_v39, %s4684_s17 }
 0x518   :  { %3730 = vrot.lane.b32.xlu0 %v3674_v50, %s4681_s1  ;;  %3684 = vrot.lane.b32.xlu1 %v3674_v50, %s4679_s16 }
 0x51f   :  { %v3608_v51 = vpop.f32.mrb[56].mxu0  ;;  %v6357_v11 = vpop.permute.xlu1 %3703 }
 0x520   :  { %v3609_v20 = vadd.f32 %v3608_v51, %v3473_v6  ;;  %v3610_v27 = vpop.f32.mrb[57].mxu0  ;;  %v6372_v36 = vpop.permute.xlu0 %3843 }
 0x521   :  { %v3612_v45 = vpop.f32.mrb[58].mxu0  ;;  %v3611_v55 = vadd.f32 %v3610_v27, %v3474_v32 }
 0x522   :  { %v6359_v12 = vpack.c.bf16 %v3609_v20, %v3609_v20  ;;  %v3613_v35 = vpop.f32.mrb[59].mxu0 }
 0x523   :  { %v6361_v13 = vpop.permute.xlu1 %3749  ;;  %v6387_v17 = vpack.c.bf16 %v3611_v55, %v3611_v55 }
 0x524   :  { %3711 = vrot.lane.b32.xlu0 %v6359_v12, %s4678_s4  ;;  %3849 = vrot.lane.b32.xlu1 %v6359_v12, %s4684_s17  ;;  %v3676_v26 = vrot.slane %v6359_v12, 4  ;;  %v3681_v41 = vpop.permute.xlu0 %3680 }
 0x525   :  { %v3677_v61 = vrot.slane %v6387_v17, 4 }
 0x527   :  { %v6368_v1 = vpop.permute.xlu1 %3795 }
 0x528   :  { %3776 = vrot.lane.b32.xlu0 %v3674_v50, %s4683_s6  ;;  %3686 = vrot.lane.b32.xlu1 %v3675_v28, %s4679_s16  ;;  %v3727_v58 = vpop.permute.xlu0 %3726 }
 0x52b   :  { %v3842_v2 = vpop.permute.xlu1 %3841 }
 0x52c   :  { %3757 = vrot.lane.b32.xlu0 %v6359_v12, %s4680_s0  ;;  %3732 = vrot.lane.b32.xlu1 %v3675_v28, %s4681_s1  ;;  %v6379_v18 = vsel %vm3441_vm3, %v3842_v2, %v6372_v36  ;;  %v3773_v60 = vpop.permute.xlu0 %3772 }
 0x52f   :  { %v3706_v7 = vpop.permute.xlu1 %3705 }
 0x530   :  { %3822 = vrot.lane.b32.xlu0 %v3674_v50, %s4685_s18  ;;  %3778 = vrot.lane.b32.xlu1 %v3675_v28, %s4683_s6  ;;  %v3819_v43 = vpop.permute.xlu0 %3818  ;;  %v3719_v6 = vsel %vm3249_vm9, %v6357_v11, %v3706_v7 }
 0x532   :  { %v3649_v3 = vpop.f32.mrb[56].mxu1 }
 0x533   :  { %v3651_v29 = vpop.f32.mrb[57].mxu1  ;;  %v3650_v53 = vadd.f32 %v3649_v3, %v3481_v38  ;;  %v3752_v46 = vpop.permute.xlu1 %3751 }
 0x534   :  { %3803 = vrot.lane.b32.xlu0 %v6359_v12, %s4682_s2  ;;  %3824 = vrot.lane.b32.xlu1 %v3675_v28, %s4685_s18  ;;  %v3653_v49 = vpop.f32.mrb[58].mxu1  ;;  %v3663_v30 = vpack.c.bf16 %v3651_v29, %v3651_v29  ;;  %v3683_v14 = vpop.permute.xlu0 %3682  ;;  %v3765_v35 = vsel %vm3313_vm15, %v6361_v13, %v3752_v46 }
 0x535   :  { %v3654_v10 = vpop.f32.mrb[59].mxu1  ;;  %v6405_v40 = vpack.c.bf16 %v3650_v53, %v3650_v53  ;;  %v3696_v4 = vsel %vm3217_vm5, %v3681_v41, %v3683_v14 }
 0x536   :  { %v3679_v48 = vrot.slane %v3663_v30, 4  ;;  %v3866_v8 = vsel %vm2582_vm4, %v6300_v42, %v3696_v4 }
 0x537   :  { %v3678_v44 = vrot.slane %v6405_v40, 4  ;;  %v3798_v31 = vpop.permute.xlu1 %3797 }
 0x538   :  { %3688 = vrot.lane.b32.xlu0 %v3676_v26, %s4679_s16  ;;  %3713 = vrot.lane.b32.xlu1 %v6387_v17, %s4678_s4  ;;  %v3811_v13 = vsel %vm3377_vm6, %v6368_v1, %v3798_v31 }
 0x53b   :  { %v3729_v23 = vpop.permute.xlu1 %3728 }
 0x53c   :  { %3734 = vrot.lane.b32.xlu0 %v3676_v26, %s4681_s1  ;;  %3759 = vrot.lane.b32.xlu1 %v6387_v17, %s4680_s0  ;;  %v3742_v51 = vsel %vm3281_vm10, %v3727_v58, %v3729_v23  ;;  %v6501_v58 = vld [vmem:[%s6641_s7] sm:$0x3] }
 0x53d   :  { %v3894_v27 = vsel %vm2582_vm4, %v3719_v6, %v3742_v51 }
 0x53f   :  { %v3775_v19 = vpop.permute.xlu1 %3774 }
 0x540   :  { %3780 = vrot.lane.b32.xlu0 %v3676_v26, %s4683_s6  ;;  %3736 = vrot.lane.b32.xlu1 %v3677_v61, %s4681_s1  ;;  %v3788_v42 = vsel %vm3345_vm1, %v3773_v60, %v3775_v19 }
 0x541   :  { %v3922_v55 = vsel %vm2582_vm4, %v3765_v35, %v3788_v42 }
 0x543   :  { %v3821_v25 = vpop.permute.xlu1 %3820 }
 0x544   :  { %3826 = vrot.lane.b32.xlu0 %v3676_v26, %s4685_s18  ;;  %3782 = vrot.lane.b32.xlu1 %v3677_v61, %s4683_s6  ;;  %v3834_v49 = vsel %vm3409_vm0, %v3819_v43, %v3821_v25 }
 0x548   :  { %3690 = vrot.lane.b32.xlu0 %v3677_v61, %s4679_s16  ;;  %3717 = vrot.lane.b32.xlu1 %v3663_v30, %s4678_s4 }
 0x54c   :  { %3715 = vrot.lane.b32.xlu0 %v6405_v40, %s4678_s4  ;;  %3763 = vrot.lane.b32.xlu1 %v3663_v30, %s4680_s0 }
 0x550   :  { %3761 = vrot.lane.b32.xlu0 %v6405_v40, %s4680_s0  ;;  %3692 = vrot.lane.b32.xlu1 %v3678_v44, %s4679_s16 }
 0x554   :  { %3694 = vrot.lane.b32.xlu0 %v3679_v48, %s4679_s16  ;;  %3805 = vrot.lane.b32.xlu1 %v6387_v17, %s4682_s2 }
 0x558   :  { %3740 = vrot.lane.b32.xlu0 %v3679_v48, %s4681_s1  ;;  %3828 = vrot.lane.b32.xlu1 %v3677_v61, %s4685_s18 }
 0x55c   :  { %3786 = vrot.lane.b32.xlu0 %v3679_v48, %s4683_s6  ;;  %3809 = vrot.lane.b32.xlu1 %v3663_v30, %s4682_s2 }
 0x560   :  { %3807 = vrot.lane.b32.xlu0 %v6405_v40, %s4682_s2  ;;  %3851 = vrot.lane.b32.xlu1 %v6387_v17, %s4684_s17 }
 0x564   :  { %3738 = vrot.lane.b32.xlu0 %v3678_v44, %s4681_s1  ;;  %3855 = vrot.lane.b32.xlu1 %v3663_v30, %s4684_s17  ;;  %v3950_v30 = vsel %vm2582_vm4, %v3811_v13, %v3834_v49 }
 0x568   :  { %3784 = vrot.lane.b32.xlu0 %v3678_v44, %s4683_s6 }
 0x56c   :  { %3830 = vrot.lane.b32.xlu0 %v3678_v44, %s4685_s18 }
 0x570   :  { %3832 = vrot.lane.b32.xlu0 %v3679_v48, %s4685_s18  ;;  %v3988_v48 = vsel %vm2582_vm4, %v6379_v18, 0 }
 0x574   :  { %3853 = vrot.lane.b32.xlu0 %v6405_v40, %s4684_s17 }
 0x578   :  { %3980 = vperm.xlu0 %4462, %v3977_v54  }
 0x57a   :  { %v6435_v59 = vpop.permute.xlu1 %3845  ;;  %v6437_v15 = vpop.permute.xlu0 %3707 }
 0x57b   :  { %v3720_v50 = vsel %vm3249_vm9, %v3706_v7, %v6437_v15  ;;  %v3858_v53 = vsel %vm3441_vm3, %v6372_v36, %v6435_v59 }
 0x57e   :  { %v6439_v37 = vpop.permute.xlu1 %3709  ;;  %v6441_v33 = vpop.permute.xlu0 %3753 }
 0x57f   :  { %v3766_v28 = vsel %vm3313_vm15, %v3752_v46, %v6441_v33 }
 0x582   :  { %v6443_v9 = vpop.permute.xlu1 %3755  ;;  %v6445_v56 = vpop.permute.xlu0 %3799 }
 0x583   :  { %v3812_v61 = vsel %vm3377_vm6, %v3798_v31, %v6445_v56 }
 0x586   :  { %v6447_v47 = vpop.permute.xlu1 %3801  ;;  %v6449_v34 = vpop.permute.xlu0 %3847 }
 0x58a   :  { %v3731_v52 = vpop.permute.xlu0 %3730  ;;  %v3685_v5 = vpop.permute.xlu1 %3684 }
 0x58b   :  { %v3743_v22 = vsel %vm3281_vm10, %v3729_v23, %v3731_v52  ;;  %v3697_v24 = vsel %vm3217_vm5, %v3683_v14, %v3685_v5 }
 0x58c   :  { %v3870_v21 = vsel %vm2582_vm4, %v6302_v63, %v3697_v24  ;;  %v3898_v20 = vsel %vm2582_vm4, %v3720_v50, %v3743_v22 }
 0x58d   :  { %4008 = vmatprep.subr.bf16.mxu0 %v3870_v21 }
 0x58e   :  { %4009 = vmatpush1.bf16.msra.mxu0 %v3866_v8 }
 0x58f   :  { %4010 = vmatprep.subr.bf16.mxu0 %v3898_v20  ;;  %v3859_v20 = vsel %vm3441_vm3, %v6435_v59, %v6449_v34 }
 0x592   :  { %4011 = vmatpush1.bf16.msra.mxu0 %v3894_v27 }
 0x596   :  { %v6465_v63 = vpop.permute.xlu0 %3711  ;;  %v6467_v45 = vpop.permute.xlu1 %3849 }
 0x597   :  { %v3860_v27 = vsel %vm3441_vm3, %v6449_v34, %v6467_v45 }
 0x59a   :  { %v3777_v16 = vpop.permute.xlu0 %3776  ;;  %v3687_v11 = vpop.permute.xlu1 %3686 }
 0x59b   :  { %v3789_v2 = vsel %vm3345_vm1, %v3775_v19, %v3777_v16  ;;  %v3698_v7 = vsel %vm3217_vm5, %v3685_v5, %v3687_v11  ;;  %v3722_v19 = vsel %vm3249_vm9, %v6439_v37, %v6465_v63 }
 0x59c   :  { %v3926_v32 = vsel %vm2582_vm4, %v3766_v28, %v3789_v2  ;;  %v3874_v18 = vsel %vm2582_vm4, %v6333_v0, %v3698_v7  ;;  %v3721_v0 = vsel %vm3249_vm9, %v6437_v15, %v6439_v37  ;;  %v3767_v15 = vsel %vm3313_vm15, %v6441_v33, %v6443_v9 }
 0x59d   :  { %4012 = vmatprep.subr.bf16.mxu0 %v3926_v32  ;;  %v3813_v33 = vsel %vm3377_vm6, %v6445_v56, %v6447_v47  ;;  %v3994_v56 = vsel %vm2582_vm4, %v3859_v20, 0 }
 0x59e   :  { %v6477_v3 = vpop.permute.xlu0 %3757  ;;  %4013 = vmatpush1.bf16.msra.mxu0 %v3922_v55  ;;  %v3733_v29 = vpop.permute.xlu1 %3732 }
 0x59f   :  { %v3744_v60 = vsel %vm3281_vm10, %v3731_v52, %v3733_v29  ;;  %v3768_v52 = vsel %vm3313_vm15, %v6443_v9, %v6477_v3 }
 0x5a0   :  { %v3902_v14 = vsel %vm2582_vm4, %v3721_v0, %v3744_v60 }
 0x5a2   :  { %v3823_v10 = vpop.permute.xlu0 %3822  ;;  %v3779_v26 = vpop.permute.xlu1 %3778 }
 0x5a3   :  { %v3835_v57 = vsel %vm3409_vm0, %v3821_v25, %v3823_v10  ;;  %v3790_v25 = vsel %vm3345_vm1, %v3777_v16, %v3779_v26 }
 0x5a4   :  { %v3954_v38 = vsel %vm2582_vm4, %v3812_v61, %v3835_v57  ;;  %v3930_v22 = vsel %vm2582_vm4, %v3767_v15, %v3790_v25 }
 0x5a5   :  { %4014 = vmatprep.subr.bf16.mxu0 %v3954_v38 }
 0x5a6   :  { %v6490_v44 = vpop.permute.xlu0 %3803  ;;  %4015 = vmatpush1.bf16.msra.mxu0 %v3950_v30  ;;  %v3825_v1 = vpop.permute.xlu1 %3824 }
 0x5a7   :  { %4326 = vmatprep.subr.msk.bf16.mxu0 %vm2582_vm4, %v3858_v53  ;;  %v3836_v24 = vsel %vm3409_vm0, %v3823_v10, %v3825_v1  ;;  %v3814_v8 = vsel %vm3377_vm6, %v6447_v47, %v6490_v44 }
 0x5a8   :  { %v3958_v51 = vsel %vm2582_vm4, %v3813_v33, %v3836_v24 }
 0x5aa   :  { %v3689_v41 = vpop.permute.xlu0 %3688  ;;  %4017 = vmatpush1.bf16.msra.mxu0 %v3988_v48  ;;  %v6496_v46 = vpop.permute.xlu1 %3713 }
 0x5ab   :  { %v3699_v36 = vsel %vm3217_vm5, %v3687_v11, %v3689_v41  ;;  %v6719_v11 = vmov 0.0   ;;  %v3723_v48 = vsel %vm3249_vm9, %v6465_v63, %v6496_v46 }
 0x5ac   :  { %v3878_v31 = vsel %vm2582_vm4, %v6335_v39, %v3699_v36 }
 0x5ad   :  { %4049 = vmatprep.subr.bf16.mxu1 %v3878_v31  ;;  %4327 = vmatmul.mubr.msk.bf16.vlgmr.msra.gmra.mrb[60].mxu0 %vm3983_vm2, %v6501_v58 }
 0x5ae   :  { %v3735_v23 = vpop.permute.xlu0 %3734  ;;  %4050 = vmatpush1.bf16.msra.mxu1 %v3874_v18  ;;  %v6511_v43 = vpop.permute.xlu1 %3759  ;;  %4122 = vmatprep.mubr.bf16.mxu0 %v6718_v62 }
 0x5af   :  { %v3745_v39 = vsel %vm3281_vm10, %v3733_v29, %v3735_v23 }
 0x5b0   :  { %v3906_v54 = vsel %vm2582_vm4, %v3722_v19, %v3745_v39  ;;  %v3769_v39 = vsel %vm3313_vm15, %v6477_v3, %v6511_v43 }
 0x5b1   :  { %4051 = vmatprep.subr.bf16.mxu1 %v3906_v54 }
 0x5b2   :  { %v6524_v4 = vpop.permute.xlu0 %3780  ;;  %4052 = vmatpush1.bf16.msra.mxu1 %v3902_v14  ;;  %v3737_v62 = vpop.permute.xlu1 %3736 }
 0x5b3   :  { %v3791_v5 = vsel %vm3345_vm1, %v3779_v26, %v6524_v4 }
 0x5b4   :  { %v3934_v37 = vsel %vm2582_vm4, %v3768_v52, %v3791_v5 }
 0x5b5   :  { %4053 = vmatprep.subr.bf16.mxu1 %v3934_v37 }
 0x5b6   :  { %v6537_v21 = vpop.permute.xlu0 %3826  ;;  %4054 = vmatpush1.bf16.msra.mxu1 %v3930_v22  ;;  %v3783_v50 = vpop.permute.xlu1 %3782 }
 0x5b7   :  { %v3837_v6 = vsel %vm3409_vm0, %v3825_v1, %v6537_v21  ;;  %v3792_v31 = vsel %vm3345_vm1, %v6524_v4, %v3783_v50 }
 0x5b8   :  { %v3962_v9 = vsel %vm2582_vm4, %v3814_v8, %v3837_v6  ;;  %v3938_v14 = vsel %vm2582_vm4, %v3769_v39, %v3792_v31 }
 0x5b9   :  { %4055 = vmatprep.subr.bf16.mxu1 %v3962_v9 }
 0x5ba   :  { %v3691_v35 = vpop.permute.xlu0 %3690  ;;  %4056 = vmatpush1.bf16.msra.mxu1 %v3958_v51  ;;  %v3718_v42 = vpop.permute.xlu1 %3717 }
 0x5bb   :  { %4328 = vmatprep.subr.msk.bf16.mxu1 %vm2582_vm4, %v3860_v27  ;;  %v3700_v59 = vsel %vm3217_vm5, %v3689_v41, %v3691_v35 }
 0x5bc   :  { %v3882_v55 = vsel %vm2582_vm4, %v6359_v12, %v3700_v59 }
 0x5be   :  { %v3716_v47 = vpop.permute.xlu0 %3715  ;;  %4058 = vmatpush1.bf16.msra.mxu1 %v3994_v56  ;;  %v3764_v16 = vpop.permute.xlu1 %3763 }
 0x5bf   :  { %4346 = vmatprep.subr.bf16.mxu1 %v6719_v11  ;;  %v3724_v12 = vsel %vm3249_vm9, %v6496_v46, %v3716_v47  ;;  %v3725_v53 = vsel %vm3249_vm9, %v3716_v47, %v3718_v42 }
 0x5c1   :  { %4329 = vmatmul.mubr.msk.bf16.vlgmr.msra.gmra.mrb[60].mxu1 %vm3983_vm2, %v6501_v58 }
 0x5c2   :  { %v3762_v28 = vpop.permute.xlu0 %3761  ;;  %v3693_v2 = vpop.permute.xlu1 %3692  ;;  %4356 = vmatprep.mubr.msk.bf16.mxu1 %vm6720_vm13, %v6719_v11 }
 0x5c3   :  { %v3701_v34 = vsel %vm3217_vm5, %v3691_v35, %v3693_v2  ;;  %v3771_v63 = vsel %vm3313_vm15, %v3762_v28, %v3764_v16 }
 0x5c4   :  { %v3886_v32 = vsel %vm2582_vm4, %v6387_v17, %v3701_v34  ;;  %v3746_v17 = vsel %vm3281_vm10, %v3735_v23, %v3737_v62  ;;  %v3770_v23 = vsel %vm3313_vm15, %v6511_v43, %v3762_v28 }
 0x5c5   :  { %4090 = vmatprep.subr.bf16.mxu0 %v3886_v32  ;;  %v3910_v36 = vsel %vm2582_vm4, %v3723_v48, %v3746_v17 }
 0x5c6   :  { %v3695_v29 = vpop.permute.xlu0 %3694  ;;  %4091 = vmatpush1.bf16.msra.mxu0 %v3882_v55  ;;  %v3806_v26 = vpop.permute.xlu1 %3805 }
 0x5c7   :  { %v3702_v13 = vsel %vm3217_vm5, %v3693_v2, %v3695_v29  ;;  %v3815_v3 = vsel %vm3377_vm6, %v6490_v44, %v3806_v26 }
 0x5c8   :  { %v3890_v49 = vsel %vm2582_vm4, %v6405_v40, %v3702_v13 }
 0x5c9   :  { %4347 = vmatpush3.bf16.msra.mxu1 %v3890_v49 }
 0x5ca   :  { %v3741_v10 = vpop.permute.xlu0 %3740  ;;  %4348 = vmatprep.subr.bf16.mxu1 %v6719_v11  ;;  %v3829_v38 = vpop.permute.xlu1 %3828 }
 0x5cb   :  { %v3838_v25 = vsel %vm3409_vm0, %v6537_v21, %v3829_v38 }
 0x5cc   :  { %v3966_v15 = vsel %vm2582_vm4, %v3815_v3, %v3838_v25 }
 0x5ce   :  { %v3787_v61 = vpop.permute.xlu0 %3786  ;;  %v3810_v18 = vpop.permute.xlu1 %3809 }
 0x5d2   :  { %v3808_v57 = vpop.permute.xlu0 %3807  ;;  %v3852_v43 = vpop.permute.xlu1 %3851 }
 0x5d3   :  { %v3817_v22 = vsel %vm3377_vm6, %v3808_v57, %v3810_v18 }
 0x5d6   :  { %v3739_v30 = vpop.permute.xlu0 %3738  ;;  %v3856_v8 = vpop.permute.xlu1 %3855 }
 0x5d7   :  { %v3747_v1 = vsel %vm3281_vm10, %v3737_v62, %v3739_v30  ;;  %v3748_v40 = vsel %vm3281_vm10, %v3739_v30, %v3741_v10  ;;  %v3816_v62 = vsel %vm3377_vm6, %v3806_v26, %v3808_v57 }
 0x5d8   :  { %v3914_v7 = vsel %vm2582_vm4, %v3724_v12, %v3747_v1  ;;  %v3918_v41 = vsel %vm2582_vm4, %v3725_v53, %v3748_v40 }
 0x5d9   :  { %4092 = vmatprep.subr.bf16.mxu0 %v3914_v7  ;;  %4349 = vmatpush3.bf16.msra.mxu1 %v3918_v41 }
 0x5da   :  { %v3785_v60 = vpop.permute.xlu0 %3784  ;;  %4093 = vmatpush1.bf16.msra.mxu0 %v3910_v36  ;;  %4350 = vmatprep.subr.bf16.mxu1 %v6719_v11 }
 0x5db   :  { %v3793_v46 = vsel %vm3345_vm1, %v3783_v50, %v3785_v60  ;;  %v3794_v19 = vsel %vm3345_vm1, %v3785_v60, %v3787_v61  ;;  %v3861_v50 = vsel %vm3441_vm3, %v6467_v45, %v3852_v43 }
 0x5dc   :  { %v3942_v0 = vsel %vm2582_vm4, %v3770_v23, %v3793_v46  ;;  %v3946_v54 = vsel %vm2582_vm4, %v3771_v63, %v3794_v19  ;;  %v4000_v9 = vsel %vm2582_vm4, %v3861_v50, 0 }
 0x5dd   :  { %4094 = vmatprep.subr.bf16.mxu0 %v3942_v0  ;;  %4351 = vmatpush3.bf16.msra.mxu1 %v3946_v54 }
 0x5de   :  { %v3831_v4 = vpop.permute.xlu0 %3830  ;;  %4095 = vmatpush1.bf16.msra.mxu0 %v3938_v14  ;;  %4352 = vmatprep.subr.bf16.mxu1 %v6719_v11 }
 0x5df   :  { %v3839_v52 = vsel %vm3409_vm0, %v3829_v38, %v3831_v4 }
 0x5e0   :  { %v3970_v5 = vsel %vm2582_vm4, %v3816_v62, %v3839_v52 }
 0x5e1   :  { %4096 = vmatprep.subr.bf16.mxu0 %v3970_v5 }
 0x5e2   :  { %v3833_v37 = vpop.permute.xlu0 %3832  ;;  %4097 = vmatpush1.bf16.msra.mxu0 %v3966_v15 }
 0x5e3   :  { %v3840_v24 = vsel %vm3409_vm0, %v3831_v4, %v3833_v37 }
 0x5e4   :  { %v3974_v21 = vsel %vm2582_vm4, %v3817_v22, %v3840_v24 }
 0x5e5   :  { %4353 = vmatpush3.bf16.msra.mxu1 %v3974_v21 }
 0x5e6   :  { %v3854_v44 = vpop.permute.xlu0 %3853  ;;  %4354 = vmatprep.subr.bf16.mxu1 %v6719_v11 }
 0x5e7   :  { %v3862_v6 = vsel %vm3441_vm3, %v3852_v43, %v3854_v44  ;;  %v3863_v33 = vsel %vm3441_vm3, %v3854_v44, %v3856_v8 }
 0x5e8   :  { %v4006_v51 = vsel %vm2582_vm4, %v3863_v33, 0  ;;  %4330 = vmatprep.subr.msk.bf16.mxu0 %vm2582_vm4, %v3862_v6 }
 0x5e9   :  { %4099 = vmatpush1.bf16.msra.mxu0 %v4000_v9  ;;  %4355 = vmatpush3.bf16.msra.mxu1 %v4006_v51 }
 0x5ec   :  { %4331 = vmatmul.mubr.msk.bf16.vlgmr.msra.gmra.mrb[64].mxu0 %vm3983_vm2, %v6501_v58  ;;  %4357 = vmatmul.mubr.msk.bf16.vlgmr.msra.gmra.mrb[64].mxu1 %vm3983_vm2, %v6501_v58 }
 0x5f7   :  { %v3981_v45 = vpop.permute.xlu0 %3980 }
 0x680   :  { %v4042_v20 = vpop.f32.mrb[60].mxu0 }
 0x681   :  { %v4044_v27 = vpop.f32.mrb[61].mxu0  ;;  %v4043_v35 = vadd.f32 %v4042_v20, %v3981_v45 }
 0x682   :  { %v4046_v42 = vpop.f32.mrb[62].mxu0  ;;  %v4045_v56 = vadd.f32 %v4044_v27, %v3981_v45 }
 0x683   :  { %v4047_v47 = vpop.f32.mrb[63].mxu0 }
 0x684   :  { %v4177_v16 = vcombine.low %v4043_v35, %v4045_v56 }
 0x686   :  { %4183 = vst [vmem:[%s6643_s9] sm:$0x77] %v4177_v16 }
 0x694   :  { %v4083_v11 = vpop.f32.mrb[60].mxu1 }
 0x695   :  { %v4084_v59 = vadd.f32 %v4083_v11, %v3981_v45  ;;  %v4085_v28 = vpop.f32.mrb[61].mxu1 }
 0x696   :  { %v4086_v2 = vadd.f32 %v4085_v28, %v3981_v45  ;;  %v4087_v34 = vpop.f32.mrb[62].mxu1 }
 0x697   :  { %v4088_v32 = vpop.f32.mrb[63].mxu1 }
 0x698   :  { %v4178_v55 = vcombine.low %v4084_v59, %v4086_v2 }
 0x69a   :  { %4184 = vst [vmem:[%s6643_s9 + $0x8] sm:$0x77] %v4178_v55 }
 0x6bf   :  { %v4124_v58 = vpop.f32.mrb[64].mxu0  ;;  %v4165_v29 = vpop.f32.mrb[64].mxu1 }
 0x6c0   :  { %v4125_v13 = vadd.f32 %v4124_v58, %v3981_v45  ;;  %v4166_v49 = vadd.f32 %v4165_v29, %v3981_v45  ;;  %v4126_v10 = vpop.f32.mrb[65].mxu0  ;;  %v4358_v26 = vpop.f32.mrb[65].mxu1 }
 0x6c1   :  { %v4127_v61 = vadd.f32 %v4126_v10, %v3981_v45  ;;  %v4128_v57 = vpop.f32.mrb[66].mxu0  ;;  %v4168_v38 = vpop.f32.mrb[66].mxu1 }
 0x6c2   :  { %4186 = vst [vmem:[%s6643_s9 + $0x18] sm:$0x7] %v4166_v49  ;;  %v4129_v17 = vpop.f32.mrb[67].mxu0  ;;  %v4359_v30 = vpop.f32.mrb[67].mxu1 }
 0x6c3   :  { %v4179_v12 = vcombine.low %v4125_v13, %v4127_v61 }
 0x6c5   :  { %4185 = vst [vmem:[%s6643_s9 + $0x10] sm:$0x77] %v4179_v12 }
 0x6c6   :  { %4191 = vsyncpa [#allocation3], 1 }
 0x6c7   :  { %4192 = vsyncpa [#allocation5], 1 }

</bundles_post_ra>
